<compile_context>
chip_gen: v7x
topology: tpu7x:2x2x1
jax: 0.10.0
libtpu: 0.0.40
codegen_flags: <defaults>
</compile_context>

<pallas_src>
import functools

import jax
import jax.numpy as jnp
from jax.experimental import pallas as pl
from jax.experimental.pallas import tpu as pltpu


def _round_up(x, m):
    return (x + m - 1) // m * m


# ----------------------------------------------------------------------------
# Pallas kernel: tiled (patches @ weight) with f32 accumulator + fused epilogue
# ----------------------------------------------------------------------------
def _fused_matmul_kernel(a_ref, b_ref, *rest, activation, also_sigmoid):
    if also_sigmoid:
        o_ref, s_ref, acc_ref = rest
    else:
        o_ref, acc_ref = rest
        s_ref = None

    @pl.when(pl.program_id(2) == 0)
    def _():
        acc_ref[...] = jnp.zeros_like(acc_ref)

    acc_ref[...] += jnp.dot(a_ref[...], b_ref[...],
                            preferred_element_type=jnp.float32)

    @pl.when(pl.program_id(2) == pl.num_programs(2) - 1)
    def _():
        acc = acc_ref[...]
        if activation == "leaky_relu":
            acc = jnp.where(acc >= 0.0, acc, 0.2 * acc)
        elif activation == "sigmoid":
            acc = jax.nn.sigmoid(acc)
        o_ref[...] = acc.astype(o_ref.dtype)
        if s_ref is not None:
            s_ref[...] = jax.nn.sigmoid(acc).astype(s_ref.dtype)


def fused_matmul(a, b, activation, also_sigmoid=False):
    """a: (M, K), b: (K, N) -> f32 (M, N) [+ sigmoid(M, N) if also_sigmoid].

    Operands are cast to bf16 for MXU peak throughput; accumulation is f32.
    M/N/K are zero-padded to lane/sublane-aligned tile multiples and the
    result is sliced back (zero padding is exact for matmul).
    """
    M, K = a.shape
    K2, N = b.shape
    assert K == K2

    # --- tile selection (last-two-dims must be (8,128)-aligned) -------------
    m8 = _round_up(M, 8)
    tm = 256 if m8 >= 256 else m8              # tiny layers: one sublane-aligned tile
    M_pad = _round_up(m8, tm)

    n128 = _round_up(N, 128)
    tn = min(n128, 512)                         # full output channels where possible
    N_pad = _round_up(n128, tn)

    k128 = _round_up(K, 128)
    tk = min(k128, 1024)                        # K reduction tile
    K_pad = _round_up(k128, tk)

    a_p = jnp.pad(a.astype(jnp.bfloat16), ((0, M_pad - M), (0, K_pad - K)))
    b_p = jnp.pad(b.astype(jnp.bfloat16), ((0, K_pad - K), (0, N_pad - N)))

    grid = (M_pad // tm, N_pad // tn, K_pad // tk)
    num_out = 2 if also_sigmoid else 1

    out_spec = pl.BlockSpec((tm, tn), lambda i, j, k: (i, j))
    out_shape = jax.ShapeDtypeStruct((M_pad, N_pad), jnp.float32)
    if also_sigmoid:
        out_shapes = (out_shape, out_shape)
        out_specs = (out_spec, out_spec)
    else:
        out_shapes = out_shape
        out_specs = out_spec

    # VMEM budget from the actual tiles (double-buffered ins/outs + acc),
    # plus headroom; capped well under v7x's 64 MiB physical VMEM.
    vmem_bytes = (2 * (tm * tk * 2 + tk * tn * 2)       # bf16 inputs, 2 buffers
                  + 2 * num_out * tm * tn * 4           # f32 outputs, 2 buffers
                  + tm * tn * 4                         # accumulator scratch
                  + (4 << 20))                          # compiler headroom
    vmem_bytes = int(min(max(vmem_bytes, 8 << 20), 48 << 20))

    cost = pl.CostEstimate(
        flops=2 * M_pad * N_pad * K_pad,
        transcendentals=(M_pad * N_pad) if (also_sigmoid or
                                            activation == "sigmoid") else 0,
        bytes_accessed=(M_pad * K_pad * 2 + K_pad * N_pad * 2
                        + num_out * M_pad * N_pad * 4),
    )

    kernel = functools.partial(_fused_matmul_kernel,
                               activation=activation,
                               also_sigmoid=also_sigmoid)

    result = pl.pallas_call(
        kernel,
        out_shape=out_shapes,
        grid_spec=pltpu.PrefetchScalarGridSpec(
            num_scalar_prefetch=0,
            grid=grid,
            in_specs=[
                pl.BlockSpec((tm, tk), lambda i, j, k: (i, k)),
                pl.BlockSpec((tk, tn), lambda i, j, k: (k, j)),
            ],
            out_specs=out_specs,
            scratch_shapes=[pltpu.VMEM((tm, tn), jnp.float32)],
        ),
        compiler_params=pltpu.CompilerParams(
            dimension_semantics=("parallel", "parallel", "arbitrary"),
            vmem_limit_bytes=vmem_bytes,
        ),
        cost_estimate=cost,
    )(a_p, b_p)

    if also_sigmoid:
        raw, sig = result
        return raw[:M, :N], sig[:M, :N]
    return result[:M, :N]


# ----------------------------------------------------------------------------
# Conv2d(kernel=4, padding=1, no bias) via im2col + tiled Pallas matmul
# ----------------------------------------------------------------------------
def conv2d_4x4(x_nhwc, w_oihw, stride, activation, also_sigmoid=False):
    """x_nhwc: (N, H, W, C); w_oihw: (O, C, 4, 4) as in PyTorch."""
    kh, kw, pad = 4, 4, 1
    n, h, w, c = x_nhwc.shape
    o_ch = w_oihw.shape[0]

    # cast to bf16 up-front so the im2col replication moves half the bytes
    xp = jnp.pad(x_nhwc.astype(jnp.bfloat16),
                 ((0, 0), (pad, pad), (pad, pad), (0, 0)))
    hp, wp = h + 2 * pad, w + 2 * pad
    oh = (hp - kh) // stride + 1
    ow = (wp - kw) // stride + 1
    assert oh > 0 and ow > 0, "spatial size too small for this conv stack"

    # TODO(synk): fold im2col into the Pallas kernel (tap-indexed K reduction /
    # manual strided DMA) to avoid the 4-16x HBM replication at large images.
    patches = []
    for i in range(kh):
        for j in range(kw):
            patches.append(
                xp[:, i:i + stride * oh:stride, j:j + stride * ow:stride, :])
    p = jnp.stack(patches, axis=3)                      # (N, OH, OW, KH*KW, C)
    a = p.reshape(n * oh * ow, kh * kw * c)

    # weight (O, C, KH, KW) -> (KH, KW, C, O) -> (KH*KW*C, O) to match im2col
    b = jnp.transpose(w_oihw, (2, 3, 1, 0)).reshape(kh * kw * c, o_ch)

    out = fused_matmul(a, b, activation, also_sigmoid=also_sigmoid)
    if also_sigmoid:
        raw, sig = out
        return raw.reshape(n, oh, ow, o_ch), sig.reshape(n, oh, ow, o_ch)
    return out.reshape(n, oh, ow, o_ch)


# ----------------------------------------------------------------------------
# spectral_norm: W / sigma via power iteration (wrapper-side glue)
# ----------------------------------------------------------------------------
def spectral_normalize(w, n_iters=8, eps=1e-12):
    o = w.shape[0]
    w_mat = w.reshape(o, -1).astype(jnp.float32)
    u0 = jnp.full((o,), 1.0 / jnp.sqrt(o), jnp.float32)

    def body(_, u):
        v = w_mat.T @ u
        v = v / (jnp.linalg.norm(v) + eps)
        u = w_mat @ v
        u = u / (jnp.linalg.norm(u) + eps)
        return u

    u = jax.lax.fori_loop(0, n_iters, body, u0)
    v = w_mat.T @ u
    v = v / (jnp.linalg.norm(v) + eps)
    sigma = u @ (w_mat @ v)
    return w / sigma


# ----------------------------------------------------------------------------
# D_Net forward
# ----------------------------------------------------------------------------
def init_dnet_params(key, in_channels):
    shapes = [
        (64, in_channels, 4, 4),
        (128, 64, 4, 4),
        (256, 128, 4, 4),
        (512, 256, 4, 4),
        (1, 512, 4, 4),
    ]
    keys = jax.random.split(key, len(shapes))
    params = []
    for k, s in zip(keys, shapes):
        fan_in = s[1] * s[2] * s[3]
        params.append(jax.random.normal(k, s, jnp.float32) / jnp.sqrt(fan_in))
    return params


def d_net_forward(x_nchw, params, use_sigmoid=True, use_spectral_norm=True):
    """Matches D_Net.forward: returns (outputs, [conv1..conv5]) in NCHW."""
    x = jnp.transpose(x_nchw, (0, 2, 3, 1))  # NCHW -> NHWC

    if use_spectral_norm:
        params = [spectral_normalize(w) for w in params]

    strides = (2, 2, 2, 1, 1)
    feats_nhwc = []
    sig = None
    h = x
    for li in range(5):
        is_last = li == 4
        act = "leaky_relu" if not is_last else "none"
        if is_last and use_sigmoid:
            # fused dual output: raw conv5 (for feats) + sigmoid(conv5)
            h, sig = conv2d_4x4(h, params[li], strides[li], act,
                                also_sigmoid=True)
        else:
            h = conv2d_4x4(h, params[li], strides[li], act)
        feats_nhwc.append(h)

    outputs = sig if use_sigmoid else feats_nhwc[-1]
    to_nchw = lambda t: jnp.transpose(t, (0, 3, 1, 2))
    return to_nchw(outputs), [to_nchw(f) for f in feats_nhwc]


if __name__ == "__main__":
    key = jax.random.PRNGKey(0)
    k_x, k_w = jax.random.split(key)

    in_channels = 4
    # spatial must be >= ~24 so conv5 still has a positive output size;
    # 32 -> 16 -> 8 -> 4 -> 3 -> 2
    x = jax.random.normal(k_x, (2, in_channels, 32, 32), jnp.float32)  # NCHW
    params = init_dnet_params(k_w, in_channels)

    fwd = jax.jit(functools.partial(d_net_forward,
                                    use_sigmoid=True,
                                    use_spectral_norm=True))
    outputs, feats = fwd(x, params)
    outputs = jax.block_until_ready(outputs)
    feats = [jax.block_until_ready(f) for f in feats]

    expected = [(2, 64, 16, 16), (2, 128, 8, 8), (2, 256, 4, 4),
                (2, 512, 3, 3), (2, 1, 2, 2)]
    assert outputs.shape == (2, 1, 2, 2), outputs.shape
    for f, s in zip(feats, expected):
        assert f.shape == s, (f.shape, s)
    assert bool(jnp.all((outputs >= 0.0) & (outputs <= 1.0)))
    assert bool(jnp.all(jnp.isfinite(outputs)))
    # fused sigmoid output must match sigmoid of the raw conv5 feature
    assert bool(jnp.allclose(outputs, jax.nn.sigmoid(feats[-1]),
                             atol=1e-5, rtol=1e-5))

    print("KERNEL_OK")
</pallas_src>

<mosaic_0001>
module attributes {stable_mosaic.version = 11 : i64} {
  func.func @_fused_matmul_kernel(%arg0: i32, %arg1: i32, %arg2: i32, %arg3: memref<256x128xbf16, #tpu.memory_space<vmem>>, %arg4: memref<128x128xbf16, #tpu.memory_space<vmem>>, %arg5: memref<256x128xf32, #tpu.memory_space<vmem>>, %arg6: memref<256x128xf32, #tpu.memory_space<vmem>>) attributes {dimension_semantics = [#tpu.dimension_semantics<parallel>, #tpu.dimension_semantics<parallel>, #tpu.dimension_semantics<arbitrary>], iteration_bounds = array<i64: 2, 1, 1>, scalar_prefetch = 0 : i64, scratch_operands = 1 : i64, tpu.core_type = #tpu.core_type<tc>, window_params = [{transform_indices = @transform_0, window_bounds = array<i64: 256, 128>}, {transform_indices = @transform_1, window_bounds = array<i64: 128, 128>}, {transform_indices = @transform_2, window_bounds = array<i64: 256, 128>}]} {
    %c0_i32 = arith.constant 0 : i32
    %0 = arith.cmpi eq, %arg2, %c0_i32 : i32
    %1 = arith.extui %0 : i1 to i32
    %c0_i32_0 = arith.constant 0 : i32
    %2 = arith.cmpi ne, %1, %c0_i32_0 : i32
    scf.if %2 {
      %cst_10 = arith.constant 0.000000e+00 : f32
      %12 = vector.broadcast %cst_10 : f32 to vector<256x128xf32>
      %c0_11 = arith.constant 0 : index
      %c0_12 = arith.constant 0 : index
      %13 = vector.load %arg6[%c0_11, %c0_12] : memref<256x128xf32, #tpu.memory_space<vmem>>, vector<256x128xf32>
      tpu.vector_store %arg6[%c0_11, %c0_12], %12 {strides = array<i32>} : memref<256x128xf32, #tpu.memory_space<vmem>>, vector<256x128xf32>,
    } else {
    }
    %c0 = arith.constant 0 : index
    %c0_1 = arith.constant 0 : index
    %3 = vector.load %arg6[%c0, %c0_1] : memref<256x128xf32, #tpu.memory_space<vmem>>, vector<256x128xf32>
    %c0_2 = arith.constant 0 : index
    %c0_3 = arith.constant 0 : index
    %4 = vector.load %arg3[%c0_2, %c0_3] : memref<256x128xbf16, #tpu.memory_space<vmem>>, vector<256x128xbf16>
    %c0_4 = arith.constant 0 : index
    %c0_5 = arith.constant 0 : index
    %5 = vector.load %arg4[%c0_4, %c0_5] : memref<128x128xbf16, #tpu.memory_space<vmem>>, vector<128x128xbf16>
    %cst = arith.constant dense<0.000000e+00> : vector<256x128xf32>
    %6 = tpu.matmul %4, %5, %cst {dimension_numbers = #tpu.dot_dimension_numbers<[1], [0], [0], [1], [0, 0, 1, 1], [], []>} : vector<256x128xbf16>, vector<128x128xbf16>, vector<256x128xf32> -> vector<256x128xf32>
    %7 = arith.addf %3, %6 : vector<256x128xf32>
    %c0_6 = arith.constant 0 : index
    %c0_7 = arith.constant 0 : index
    %8 = vector.load %arg6[%c0_6, %c0_7] : memref<256x128xf32, #tpu.memory_space<vmem>>, vector<256x128xf32>
    tpu.vector_store %arg6[%c0_6, %c0_7], %7 {strides = array<i32>} : memref<256x128xf32, #tpu.memory_space<vmem>>, vector<256x128xf32>,
    %c0_i32_8 = arith.constant 0 : i32
    %9 = arith.cmpi eq, %arg2, %c0_i32_8 : i32
    %10 = arith.extui %9 : i1 to i32
    %c0_i32_9 = arith.constant 0 : i32
    %11 = arith.cmpi ne, %10, %c0_i32_9 : i32
    scf.if %11 {
      %c0_10 = arith.constant 0 : index
      %c0_11 = arith.constant 0 : index
      %12 = vector.load %arg6[%c0_10, %c0_11] : memref<256x128xf32, #tpu.memory_space<vmem>>, vector<256x128xf32>
      %cst_12 = arith.constant 0.000000e+00 : f32
      %13 = vector.broadcast %cst_12 : f32 to vector<256x128xf32>
      %14 = arith.cmpf oge, %12, %13 : vector<256x128xf32>
      %cst_13 = arith.constant 2.000000e-01 : f32
      %15 = vector.broadcast %cst_13 : f32 to vector<256x128xf32>
      %16 = arith.mulf %15, %12 : vector<256x128xf32>
      %17 = arith.select %14, %12, %16 : vector<256x128xi1>, vector<256x128xf32>
      %c0_14 = arith.constant 0 : index
      %c0_15 = arith.constant 0 : index
      %18 = vector.load %arg5[%c0_14, %c0_15] : memref<256x128xf32, #tpu.memory_space<vmem>>, vector<256x128xf32>
      tpu.vector_store %arg5[%c0_14, %c0_15], %17 {strides = array<i32>} : memref<256x128xf32, #tpu.memory_space<vmem>>, vector<256x128xf32>,
    } else {
    }
    return
  }
  func.func @transform_0(%arg0: i32, %arg1: i32, %arg2: i32) -> (i32, i32) {
    %c0_i32 = arith.constant 0 : i32
    return %arg0, %arg2 : i32, i32
  }
  func.func @transform_1(%arg0: i32, %arg1: i32, %arg2: i32) -> (i32, i32) {
    %c0_i32 = arith.constant 0 : i32
    return %arg2, %arg1 : i32, i32
  }
  func.func @transform_2(%arg0: i32, %arg1: i32, %arg2: i32) -> (i32, i32) {
    %c0_i32 = arith.constant 0 : i32
    return %arg0, %arg1 : i32, i32
  }
}

module attributes {stable_mosaic.version = 11 : i64} {
  func.func @_fused_matmul_kernel(%arg0: i32, %arg1: i32, %arg2: i32, %arg3: memref<128x1024xbf16, #tpu.memory_space<vmem>>, %arg4: memref<1024x128xbf16, #tpu.memory_space<vmem>>, %arg5: memref<128x128xf32, #tpu.memory_space<vmem>>, %arg6: memref<128x128xf32, #tpu.memory_space<vmem>>) attributes {dimension_semantics = [#tpu.dimension_semantics<parallel>, #tpu.dimension_semantics<parallel>, #tpu.dimension_semantics<arbitrary>], iteration_bounds = array<i64: 1, 1, 1>, scalar_prefetch = 0 : i64, scratch_operands = 1 : i64, tpu.core_type = #tpu.core_type<tc>, window_params = [{transform_indices = @transform_0, window_bounds = array<i64: 128, 1024>}, {transform_indices = @transform_1, window_bounds = array<i64: 1024, 128>}, {transform_indices = @transform_2, window_bounds = array<i64: 128, 128>}]} {
    %c0_i32 = arith.constant 0 : i32
    %0 = arith.cmpi eq, %arg2, %c0_i32 : i32
    %1 = arith.extui %0 : i1 to i32
    %c0_i32_0 = arith.constant 0 : i32
    %2 = arith.cmpi ne, %1, %c0_i32_0 : i32
    scf.if %2 {
      %cst_10 = arith.constant 0.000000e+00 : f32
      %12 = vector.broadcast %cst_10 : f32 to vector<128x128xf32>
      %c0_11 = arith.constant 0 : index
      %c0_12 = arith.constant 0 : index
      %13 = vector.load %arg6[%c0_11, %c0_12] : memref<128x128xf32, #tpu.memory_space<vmem>>, vector<128x128xf32>
      tpu.vector_store %arg6[%c0_11, %c0_12], %12 {strides = array<i32>} : memref<128x128xf32, #tpu.memory_space<vmem>>, vector<128x128xf32>,
    } else {
    }
    %c0 = arith.constant 0 : index
    %c0_1 = arith.constant 0 : index
    %3 = vector.load %arg6[%c0, %c0_1] : memref<128x128xf32, #tpu.memory_space<vmem>>, vector<128x128xf32>
    %c0_2 = arith.constant 0 : index
    %c0_3 = arith.constant 0 : index
    %4 = vector.load %arg3[%c0_2, %c0_3] : memref<128x1024xbf16, #tpu.memory_space<vmem>>, vector<128x1024xbf16>
    %c0_4 = arith.constant 0 : index
    %c0_5 = arith.constant 0 : index
    %5 = vector.load %arg4[%c0_4, %c0_5] : memref<1024x128xbf16, #tpu.memory_space<vmem>>, vector<1024x128xbf16>
    %cst = arith.constant dense<0.000000e+00> : vector<128x128xf32>
    %6 = tpu.matmul %4, %5, %cst {dimension_numbers = #tpu.dot_dimension_numbers<[1], [0], [0], [1], [0, 0, 1, 1], [], []>} : vector<128x1024xbf16>, vector<1024x128xbf16>, vector<128x128xf32> -> vector<128x128xf32>
    %7 = arith.addf %3, %6 : vector<128x128xf32>
    %c0_6 = arith.constant 0 : index
    %c0_7 = arith.constant 0 : index
    %8 = vector.load %arg6[%c0_6, %c0_7] : memref<128x128xf32, #tpu.memory_space<vmem>>, vector<128x128xf32>
    tpu.vector_store %arg6[%c0_6, %c0_7], %7 {strides = array<i32>} : memref<128x128xf32, #tpu.memory_space<vmem>>, vector<128x128xf32>,
    %c0_i32_8 = arith.constant 0 : i32
    %9 = arith.cmpi eq, %arg2, %c0_i32_8 : i32
    %10 = arith.extui %9 : i1 to i32
    %c0_i32_9 = arith.constant 0 : i32
    %11 = arith.cmpi ne, %10, %c0_i32_9 : i32
    scf.if %11 {
      %c0_10 = arith.constant 0 : index
      %c0_11 = arith.constant 0 : index
      %12 = vector.load %arg6[%c0_10, %c0_11] : memref<128x128xf32, #tpu.memory_space<vmem>>, vector<128x128xf32>
      %cst_12 = arith.constant 0.000000e+00 : f32
      %13 = vector.broadcast %cst_12 : f32 to vector<128x128xf32>
      %14 = arith.cmpf oge, %12, %13 : vector<128x128xf32>
      %cst_13 = arith.constant 2.000000e-01 : f32
      %15 = vector.broadcast %cst_13 : f32 to vector<128x128xf32>
      %16 = arith.mulf %15, %12 : vector<128x128xf32>
      %17 = arith.select %14, %12, %16 : vector<128x128xi1>, vector<128x128xf32>
      %c0_14 = arith.constant 0 : index
      %c0_15 = arith.constant 0 : index
      %18 = vector.load %arg5[%c0_14, %c0_15] : memref<128x128xf32, #tpu.memory_space<vmem>>, vector<128x128xf32>
      tpu.vector_store %arg5[%c0_14, %c0_15], %17 {strides = array<i32>} : memref<128x128xf32, #tpu.memory_space<vmem>>, vector<128x128xf32>,
    } else {
    }
    return
  }
  func.func @transform_0(%arg0: i32, %arg1: i32, %arg2: i32) -> (i32, i32) {
    %c0_i32 = arith.constant 0 : i32
    return %arg0, %arg2 : i32, i32
  }
  func.func @transform_1(%arg0: i32, %arg1: i32, %arg2: i32) -> (i32, i32) {
    %c0_i32 = arith.constant 0 : i32
    return %arg2, %arg1 : i32, i32
  }
  func.func @transform_2(%arg0: i32, %arg1: i32, %arg2: i32) -> (i32, i32) {
    %c0_i32 = arith.constant 0 : i32
    return %arg0, %arg1 : i32, i32
  }
}

module attributes {stable_mosaic.version = 11 : i64} {
  func.func @_fused_matmul_kernel(%arg0: i32, %arg1: i32, %arg2: i32, %arg3: memref<32x1024xbf16, #tpu.memory_space<vmem>>, %arg4: memref<1024x256xbf16, #tpu.memory_space<vmem>>, %arg5: memref<32x256xf32, #tpu.memory_space<vmem>>, %arg6: memref<32x256xf32, #tpu.memory_space<vmem>>) attributes {dimension_semantics = [#tpu.dimension_semantics<parallel>, #tpu.dimension_semantics<parallel>, #tpu.dimension_semantics<arbitrary>], iteration_bounds = array<i64: 1, 1, 2>, scalar_prefetch = 0 : i64, scratch_operands = 1 : i64, tpu.core_type = #tpu.core_type<tc>, window_params = [{transform_indices = @transform_0, window_bounds = array<i64: 32, 1024>}, {transform_indices = @transform_1, window_bounds = array<i64: 1024, 256>}, {transform_indices = @transform_2, window_bounds = array<i64: 32, 256>}]} {
    %c0_i32 = arith.constant 0 : i32
    %0 = arith.cmpi eq, %arg2, %c0_i32 : i32
    %1 = arith.extui %0 : i1 to i32
    %c0_i32_0 = arith.constant 0 : i32
    %2 = arith.cmpi ne, %1, %c0_i32_0 : i32
    scf.if %2 {
      %cst_9 = arith.constant 0.000000e+00 : f32
      %12 = vector.broadcast %cst_9 : f32 to vector<32x256xf32>
      %c0_10 = arith.constant 0 : index
      %c0_11 = arith.constant 0 : index
      %13 = vector.load %arg6[%c0_10, %c0_11] : memref<32x256xf32, #tpu.memory_space<vmem>>, vector<32x256xf32>
      tpu.vector_store %arg6[%c0_10, %c0_11], %12 {strides = array<i32>} : memref<32x256xf32, #tpu.memory_space<vmem>>, vector<32x256xf32>,
    } else {
    }
    %c0 = arith.constant 0 : index
    %c0_1 = arith.constant 0 : index
    %3 = vector.load %arg6[%c0, %c0_1] : memref<32x256xf32, #tpu.memory_space<vmem>>, vector<32x256xf32>
    %c0_2 = arith.constant 0 : index
    %c0_3 = arith.constant 0 : index
    %4 = vector.load %arg3[%c0_2, %c0_3] : memref<32x1024xbf16, #tpu.memory_space<vmem>>, vector<32x1024xbf16>
    %c0_4 = arith.constant 0 : index
    %c0_5 = arith.constant 0 : index
    %5 = vector.load %arg4[%c0_4, %c0_5] : memref<1024x256xbf16, #tpu.memory_space<vmem>>, vector<1024x256xbf16>
    %cst = arith.constant dense<0.000000e+00> : vector<32x256xf32>
    %6 = tpu.matmul %4, %5, %cst {dimension_numbers = #tpu.dot_dimension_numbers<[1], [0], [0], [1], [0, 0, 1, 1], [], []>} : vector<32x1024xbf16>, vector<1024x256xbf16>, vector<32x256xf32> -> vector<32x256xf32>
    %7 = arith.addf %3, %6 : vector<32x256xf32>
    %c0_6 = arith.constant 0 : index
    %c0_7 = arith.constant 0 : index
    %8 = vector.load %arg6[%c0_6, %c0_7] : memref<32x256xf32, #tpu.memory_space<vmem>>, vector<32x256xf32>
    tpu.vector_store %arg6[%c0_6, %c0_7], %7 {strides = array<i32>} : memref<32x256xf32, #tpu.memory_space<vmem>>, vector<32x256xf32>,
    %c1_i32 = arith.constant 1 : i32
    %9 = arith.cmpi eq, %arg2, %c1_i32 : i32
    %10 = arith.extui %9 : i1 to i32
    %c0_i32_8 = arith.constant 0 : i32
    %11 = arith.cmpi ne, %10, %c0_i32_8 : i32
    scf.if %11 {
      %c0_9 = arith.constant 0 : index
      %c0_10 = arith.constant 0 : index
      %12 = vector.load %arg6[%c0_9, %c0_10] : memref<32x256xf32, #tpu.memory_space<vmem>>, vector<32x256xf32>
      %cst_11 = arith.constant 0.000000e+00 : f32
      %13 = vector.broadcast %cst_11 : f32 to vector<32x256xf32>
      %14 = arith.cmpf oge, %12, %13 : vector<32x256xf32>
      %cst_12 = arith.constant 2.000000e-01 : f32
      %15 = vector.broadcast %cst_12 : f32 to vector<32x256xf32>
      %16 = arith.mulf %15, %12 : vector<32x256xf32>
      %17 = arith.select %14, %12, %16 : vector<32x256xi1>, vector<32x256xf32>
      %c0_13 = arith.constant 0 : index
      %c0_14 = arith.constant 0 : index
      %18 = vector.load %arg5[%c0_13, %c0_14] : memref<32x256xf32, #tpu.memory_space<vmem>>, vector<32x256xf32>
      tpu.vector_store %arg5[%c0_13, %c0_14], %17 {strides = array<i32>} : memref<32x256xf32, #tpu.memory_space<vmem>>, vector<32x256xf32>,
    } else {
    }
    return
  }
  func.func @transform_0(%arg0: i32, %arg1: i32, %arg2: i32) -> (i32, i32) {
    %c0_i32 = arith.constant 0 : i32
    return %arg0, %arg2 : i32, i32
  }
  func.func @transform_1(%arg0: i32, %arg1: i32, %arg2: i32) -> (i32, i32) {
    %c0_i32 = arith.constant 0 : i32
    return %arg2, %arg1 : i32, i32
  }
  func.func @transform_2(%arg0: i32, %arg1: i32, %arg2: i32) -> (i32, i32) {
    %c0_i32 = arith.constant 0 : i32
    return %arg0, %arg1 : i32, i32
  }
}

module attributes {stable_mosaic.version = 11 : i64} {
  func.func @_fused_matmul_kernel(%arg0: i32, %arg1: i32, %arg2: i32, %arg3: memref<24x1024xbf16, #tpu.memory_space<vmem>>, %arg4: memref<1024x512xbf16, #tpu.memory_space<vmem>>, %arg5: memref<24x512xf32, #tpu.memory_space<vmem>>, %arg6: memref<24x512xf32, #tpu.memory_space<vmem>>) attributes {dimension_semantics = [#tpu.dimension_semantics<parallel>, #tpu.dimension_semantics<parallel>, #tpu.dimension_semantics<arbitrary>], iteration_bounds = array<i64: 1, 1, 4>, scalar_prefetch = 0 : i64, scratch_operands = 1 : i64, tpu.core_type = #tpu.core_type<tc>, window_params = [{transform_indices = @transform_0, window_bounds = array<i64: 24, 1024>}, {transform_indices = @transform_1, window_bounds = array<i64: 1024, 512>}, {transform_indices = @transform_2, window_bounds = array<i64: 24, 512>}]} {
    %c0_i32 = arith.constant 0 : i32
    %0 = arith.cmpi eq, %arg2, %c0_i32 : i32
    %1 = arith.extui %0 : i1 to i32
    %c0_i32_0 = arith.constant 0 : i32
    %2 = arith.cmpi ne, %1, %c0_i32_0 : i32
    scf.if %2 {
      %cst_9 = arith.constant 0.000000e+00 : f32
      %12 = vector.broadcast %cst_9 : f32 to vector<24x512xf32>
      %c0_10 = arith.constant 0 : index
      %c0_11 = arith.constant 0 : index
      %13 = vector.load %arg6[%c0_10, %c0_11] : memref<24x512xf32, #tpu.memory_space<vmem>>, vector<24x512xf32>
      tpu.vector_store %arg6[%c0_10, %c0_11], %12 {strides = array<i32>} : memref<24x512xf32, #tpu.memory_space<vmem>>, vector<24x512xf32>,
    } else {
    }
    %c0 = arith.constant 0 : index
    %c0_1 = arith.constant 0 : index
    %3 = vector.load %arg6[%c0, %c0_1] : memref<24x512xf32, #tpu.memory_space<vmem>>, vector<24x512xf32>
    %c0_2 = arith.constant 0 : index
    %c0_3 = arith.constant 0 : index
    %4 = vector.load %arg3[%c0_2, %c0_3] : memref<24x1024xbf16, #tpu.memory_space<vmem>>, vector<24x1024xbf16>
    %c0_4 = arith.constant 0 : index
    %c0_5 = arith.constant 0 : index
    %5 = vector.load %arg4[%c0_4, %c0_5] : memref<1024x512xbf16, #tpu.memory_space<vmem>>, vector<1024x512xbf16>
    %cst = arith.constant dense<0.000000e+00> : vector<24x512xf32>
    %6 = tpu.matmul %4, %5, %cst {dimension_numbers = #tpu.dot_dimension_numbers<[1], [0], [0], [1], [0, 0, 1, 1], [], []>} : vector<24x1024xbf16>, vector<1024x512xbf16>, vector<24x512xf32> -> vector<24x512xf32>
    %7 = arith.addf %3, %6 : vector<24x512xf32>
    %c0_6 = arith.constant 0 : index
    %c0_7 = arith.constant 0 : index
    %8 = vector.load %arg6[%c0_6, %c0_7] : memref<24x512xf32, #tpu.memory_space<vmem>>, vector<24x512xf32>
    tpu.vector_store %arg6[%c0_6, %c0_7], %7 {strides = array<i32>} : memref<24x512xf32, #tpu.memory_space<vmem>>, vector<24x512xf32>,
    %c3_i32 = arith.constant 3 : i32
    %9 = arith.cmpi eq, %arg2, %c3_i32 : i32
    %10 = arith.extui %9 : i1 to i32
    %c0_i32_8 = arith.constant 0 : i32
    %11 = arith.cmpi ne, %10, %c0_i32_8 : i32
    scf.if %11 {
      %c0_9 = arith.constant 0 : index
      %c0_10 = arith.constant 0 : index
      %12 = vector.load %arg6[%c0_9, %c0_10] : memref<24x512xf32, #tpu.memory_space<vmem>>, vector<24x512xf32>
      %cst_11 = arith.constant 0.000000e+00 : f32
      %13 = vector.broadcast %cst_11 : f32 to vector<24x512xf32>
      %14 = arith.cmpf oge, %12, %13 : vector<24x512xf32>
      %cst_12 = arith.constant 2.000000e-01 : f32
      %15 = vector.broadcast %cst_12 : f32 to vector<24x512xf32>
      %16 = arith.mulf %15, %12 : vector<24x512xf32>
      %17 = arith.select %14, %12, %16 : vector<24x512xi1>, vector<24x512xf32>
      %c0_13 = arith.constant 0 : index
      %c0_14 = arith.constant 0 : index
      %18 = vector.load %arg5[%c0_13, %c0_14] : memref<24x512xf32, #tpu.memory_space<vmem>>, vector<24x512xf32>
      tpu.vector_store %arg5[%c0_13, %c0_14], %17 {strides = array<i32>} : memref<24x512xf32, #tpu.memory_space<vmem>>, vector<24x512xf32>,
    } else {
    }
    return
  }
  func.func @transform_0(%arg0: i32, %arg1: i32, %arg2: i32) -> (i32, i32) {
    %c0_i32 = arith.constant 0 : i32
    return %arg0, %arg2 : i32, i32
  }
  func.func @transform_1(%arg0: i32, %arg1: i32, %arg2: i32) -> (i32, i32) {
    %c0_i32 = arith.constant 0 : i32
    return %arg2, %arg1 : i32, i32
  }
  func.func @transform_2(%arg0: i32, %arg1: i32, %arg2: i32) -> (i32, i32) {
    %c0_i32 = arith.constant 0 : i32
    return %arg0, %arg1 : i32, i32
  }
}

module attributes {stable_mosaic.version = 11 : i64} {
  func.func @_fused_matmul_kernel(%arg0: i32, %arg1: i32, %arg2: i32, %arg3: memref<8x1024xbf16, #tpu.memory_space<vmem>>, %arg4: memref<1024x128xbf16, #tpu.memory_space<vmem>>, %arg5: memref<8x128xf32, #tpu.memory_space<vmem>>, %arg6: memref<8x128xf32, #tpu.memory_space<vmem>>, %arg7: memref<8x128xf32, #tpu.memory_space<vmem>>) attributes {dimension_semantics = [#tpu.dimension_semantics<parallel>, #tpu.dimension_semantics<parallel>, #tpu.dimension_semantics<arbitrary>], iteration_bounds = array<i64: 1, 1, 8>, scalar_prefetch = 0 : i64, scratch_operands = 1 : i64, tpu.core_type = #tpu.core_type<tc>, window_params = [{transform_indices = @transform_0, window_bounds = array<i64: 8, 1024>}, {transform_indices = @transform_1, window_bounds = array<i64: 1024, 128>}, {transform_indices = @transform_2, window_bounds = array<i64: 8, 128>}, {transform_indices = @transform_3, window_bounds = array<i64: 8, 128>}]} {
    %c0_i32 = arith.constant 0 : i32
    %0 = arith.cmpi eq, %arg2, %c0_i32 : i32
    %1 = arith.extui %0 : i1 to i32
    %c0_i32_0 = arith.constant 0 : i32
    %2 = arith.cmpi ne, %1, %c0_i32_0 : i32
    scf.if %2 {
      %cst_9 = arith.constant 0.000000e+00 : f32
      %12 = vector.broadcast %cst_9 : f32 to vector<8x128xf32>
      %c0_10 = arith.constant 0 : index
      %c0_11 = arith.constant 0 : index
      %13 = vector.load %arg7[%c0_10, %c0_11] : memref<8x128xf32, #tpu.memory_space<vmem>>, vector<8x128xf32>
      tpu.vector_store %arg7[%c0_10, %c0_11], %12 {strides = array<i32>} : memref<8x128xf32, #tpu.memory_space<vmem>>, vector<8x128xf32>,
    } else {
    }
    %c0 = arith.constant 0 : index
    %c0_1 = arith.constant 0 : index
    %3 = vector.load %arg7[%c0, %c0_1] : memref<8x128xf32, #tpu.memory_space<vmem>>, vector<8x128xf32>
    %c0_2 = arith.constant 0 : index
    %c0_3 = arith.constant 0 : index
    %4 = vector.load %arg3[%c0_2, %c0_3] : memref<8x1024xbf16, #tpu.memory_space<vmem>>, vector<8x1024xbf16>
    %c0_4 = arith.constant 0 : index
    %c0_5 = arith.constant 0 : index
    %5 = vector.load %arg4[%c0_4, %c0_5] : memref<1024x128xbf16, #tpu.memory_space<vmem>>, vector<1024x128xbf16>
    %cst = arith.constant dense<0.000000e+00> : vector<8x128xf32>
    %6 = tpu.matmul %4, %5, %cst {dimension_numbers = #tpu.dot_dimension_numbers<[1], [0], [0], [1], [0, 0, 1, 1], [], []>} : vector<8x1024xbf16>, vector<1024x128xbf16>, vector<8x128xf32> -> vector<8x128xf32>
    %7 = arith.addf %3, %6 : vector<8x128xf32>
    %c0_6 = arith.constant 0 : index
    %c0_7 = arith.constant 0 : index
    %8 = vector.load %arg7[%c0_6, %c0_7] : memref<8x128xf32, #tpu.memory_space<vmem>>, vector<8x128xf32>
    tpu.vector_store %arg7[%c0_6, %c0_7], %7 {strides = array<i32>} : memref<8x128xf32, #tpu.memory_space<vmem>>, vector<8x128xf32>,
    %c7_i32 = arith.constant 7 : i32
    %9 = arith.cmpi eq, %arg2, %c7_i32 : i32
    %10 = arith.extui %9 : i1 to i32
    %c0_i32_8 = arith.constant 0 : i32
    %11 = arith.cmpi ne, %10, %c0_i32_8 : i32
    scf.if %11 {
      %c0_9 = arith.constant 0 : index
      %c0_10 = arith.constant 0 : index
      %12 = vector.load %arg7[%c0_9, %c0_10] : memref<8x128xf32, #tpu.memory_space<vmem>>, vector<8x128xf32>
      %c0_11 = arith.constant 0 : index
      %c0_12 = arith.constant 0 : index
      %13 = vector.load %arg5[%c0_11, %c0_12] : memref<8x128xf32, #tpu.memory_space<vmem>>, vector<8x128xf32>
      tpu.vector_store %arg5[%c0_11, %c0_12], %12 {strides = array<i32>} : memref<8x128xf32, #tpu.memory_space<vmem>>, vector<8x128xf32>,
      %14 = arith.negf %12 : vector<8x128xf32>
      %15 = math.exp %14 : vector<8x128xf32>
      %cst_13 = arith.constant 1.000000e+00 : f32
      %16 = vector.broadcast %cst_13 : f32 to vector<8x128xf32>
      %17 = arith.addf %16, %15 : vector<8x128xf32>
      %18 = arith.divf %16, %17 : vector<8x128xf32>
      %c0_14 = arith.constant 0 : index
      %c0_15 = arith.constant 0 : index
      %19 = vector.load %arg6[%c0_14, %c0_15] : memref<8x128xf32, #tpu.memory_space<vmem>>, vector<8x128xf32>
      tpu.vector_store %arg6[%c0_14, %c0_15], %18 {strides = array<i32>} : memref<8x128xf32, #tpu.memory_space<vmem>>, vector<8x128xf32>,
    } else {
    }
    return
  }
  func.func @transform_0(%arg0: i32, %arg1: i32, %arg2: i32) -> (i32, i32) {
    %c0_i32 = arith.constant 0 : i32
    return %arg0, %arg2 : i32, i32
  }
  func.func @transform_1(%arg0: i32, %arg1: i32, %arg2: i32) -> (i32, i32) {
    %c0_i32 = arith.constant 0 : i32
    return %arg2, %arg1 : i32, i32
  }
  func.func @transform_2(%arg0: i32, %arg1: i32, %arg2: i32) -> (i32, i32) {
    %c0_i32 = arith.constant 0 : i32
    return %arg0, %arg1 : i32, i32
  }
  func.func @transform_3(%arg0: i32, %arg1: i32, %arg2: i32) -> (i32, i32) {
    %c0_i32 = arith.constant 0 : i32
    return %arg0, %arg1 : i32, i32
  }
}

</mosaic_0001>

<bundles_post_ra>
// kernel: custom-call
= control target key start
LH: loop header
LB: loop body
LE: loop exit
PB: predicated region body
PF: predicated region fallthrough
CT: control target
= control target key end

     0   :  { %s6_s0 = inlined_call_operand.vmem [shape: f32[64], index: 0, kind: output, shape index: {}]  }

// kernel: d_net_forward.5
= control target key start
LH: loop header
LB: loop body
LE: loop exit
PB: predicated region body
PF: predicated region fallthrough
CT: control target
= control target key end

     0   :  { %s1177_s9 = smov 0   ;;  %s1179_s10 = smov 0   ;;  %s1290_s0 = inlined_call_operand.vmem [shape: bf16[512,128], index: 0, kind: input, shape index: {}]   ;;  %s1291_s1 = inlined_call_operand.vmem [shape: bf16[128,128], index: 1, kind: input, shape index: {}]   ;;  %s1292_s2 = inlined_call_operand.vmem [shape: f32[512,128], index: 2, kind: output, shape index: {}]  }
   0x1   :  { %s1181_s11 = smov 0  }
   0x2 LB: > { %s31_s12 = sadd.s32 1, %s1156_s10  ;;  %p971_p0 = scmp.ge.s32.totalorder %s1160_s11, 1  ;;  %s1160_s11 = sphi %s1181_s11, %s12_s11   ;;  %s1156_s10 = sphi %s1179_s10, %s1294_s10   ;;  %s1152_s9 = sphi %s1177_s9, %s1293_s9  }
   0x3   : > { %p33_p1 = scmp.ge.s32.totalorder %s31_s12, 2  ;;  %p155_p2 = scmp.lt.s32.totalorder %s1160_s11, 3 }
   0x5   : > { %s1296_s12 = smov (%p33_p1, %s31_s12), 0  ;;  %p156_p3 = pnand %p971_p0, %p155_p2 }
   0x6   : > { %v1114_v0 = vld [vmem:[%s1291_s1] sm:$0xff] (!%p156_p3)   ;;  %s972_s15 = sshll.u32 (!%p156_p3), %s1152_s9, 5  ;;  %v1115_v1 = vld [vmem:[%s1291_s1 + $0x8] sm:$0xff] (!%p156_p3)   ;;  %v1116_v2 = vld [vmem:[%s1291_s1 + $0x10] sm:$0xff] (!%p156_p3)  }
   0x7   : > { %159 = sbr.rel (%p156_p3) target bundleno = 285 (0x11d), region = 28  ;;  %p192_p4 = scmp.lt.s32.totalorder (!%p156_p3), %s972_s15, 63  ;;  %1026 = vmatprep.subr.bf16.mxu0 (!%p156_p3), %v1114_v0  ;;  %1074 = vmatprep.subr.bf16.mxu1 (!%p156_p3), %v1114_v0  ;;  %v1117_v3 = vld [vmem:[%s1291_s1 + $0x18] sm:$0xff] (!%p156_p3)   ;;  %v1118_v6 = vld [vmem:[%s1291_s1 + $0x20] sm:$0xff] (!%p156_p3)   ;;  %v1119_v7 = vld [vmem:[%s1291_s1 + $0x28] sm:$0xff] (!%p156_p3)  }
   0x8   : > { %1027 = vmatpush3.bf16.msra.mxu0 (!%p156_p3), %v1114_v0  ;;  %1082 = vmatpush3.bf16.msra.mxu1 (!%p156_p3), %v1114_v0  ;;  %v1120_v8 = vld [vmem:[%s1291_s1 + $0x30] sm:$0xff] (!%p156_p3)   ;;  %v1121_v9 = vld [vmem:[%s1291_s1 + $0x38] sm:$0xff] (!%p156_p3)  }
   0x9   : > { %1028 = vmatprep.subr.bf16.mxu0 (!%p156_p3), %v1115_v1  ;;  %1075 = vmatprep.subr.bf16.mxu1 (!%p156_p3), %v1115_v1 }
   0xc   : > { %1029 = vmatpush3.bf16.msra.mxu0 (!%p156_p3), %v1115_v1  ;;  %1083 = vmatpush3.bf16.msra.mxu1 (!%p156_p3), %v1115_v1 }
   0xd   : > { %1030 = vmatprep.subr.bf16.mxu0 (!%p156_p3), %v1116_v2  ;;  %1076 = vmatprep.subr.bf16.mxu1 (!%p156_p3), %v1116_v2 }
   0xe   : > { %s1298_s15 = smov (!%p192_p4, %s972_s15), 63 }
   0xf   : > { %s973_s20 = sshll.u32 %s1298_s15, 2  ;;  %s975_s6 = sshll.u32 %s1298_s15, 3 }
  0x10   : > { %s1210_s23 = scalar_lea.vmem %s1290_s0, %s973_s20  ;;  %1031 = vmatpush3.bf16.msra.mxu0 %v1116_v2  ;;  %1084 = vmatpush3.bf16.msra.mxu1 %v1116_v2  ;;  %s1247_s9 = scalar_lea.vmem %s1292_s2, %s975_s6 }
  0x11   : > { %v1122_v4 = vld [vmem:[%s1210_s23] sm:$0xff]   ;;  %1032 = vmatprep.subr.bf16.mxu0 %v1117_v3  ;;  %1077 = vmatprep.subr.bf16.mxu1 %v1117_v3  ;;  %v1124_v10 = vld [vmem:[%s1210_s23 + $0x8] sm:$0xff]   ;;  %v1126_v12 = vld [vmem:[%s1210_s23 + $0x10] sm:$0xff]  }
  0x12   : > { %v1123_v5 = vld [vmem:[%s1210_s23 + $0x40] sm:$0xff]   ;;  %1042 = vmatprep.mubr.bf16.mxu0 %v1122_v4  ;;  %v1125_v11 = vld [vmem:[%s1210_s23 + $0x48] sm:$0xff]   ;;  %v1127_v13 = vld [vmem:[%s1210_s23 + $0x50] sm:$0xff]  }
  0x13   : > { %1058 = vmatprep.mubr.bf16.mxu1 %v1123_v5  ;;  %v1128_v14 = vld [vmem:[%s1210_s23 + $0x18] sm:$0xff]   ;;  %v1130_v16 = vld [vmem:[%s1210_s23 + $0x20] sm:$0xff]   ;;  %v1132_v18 = vld [vmem:[%s1210_s23 + $0x28] sm:$0xff]  }
  0x14   : > { %1033 = vmatpush3.bf16.msra.mxu0 %v1117_v3  ;;  %1085 = vmatpush3.bf16.msra.mxu1 %v1117_v3  ;;  %v1129_v15 = vld [vmem:[%s1210_s23 + $0x58] sm:$0xff]   ;;  %v1131_v17 = vld [vmem:[%s1210_s23 + $0x60] sm:$0xff]   ;;  %v1133_v19 = vld [vmem:[%s1210_s23 + $0x68] sm:$0xff]  }
  0x15   : > { %1034 = vmatprep.subr.bf16.mxu0 %v1118_v6  ;;  %1078 = vmatprep.subr.bf16.mxu1 %v1118_v6  ;;  %v1134_v20 = vld [vmem:[%s1210_s23 + $0x30] sm:$0xff]   ;;  %v1136_v22 = vld [vmem:[%s1210_s23 + $0x38] sm:$0xff]  }
  0x16   : > { %v1135_v21 = vld [vmem:[%s1210_s23 + $0x70] sm:$0xff]   ;;  %v1137_v23 = vld [vmem:[%s1210_s23 + $0x78] sm:$0xff]  }
  0x18   : > { %1035 = vmatpush3.bf16.msra.mxu0 %v1118_v6  ;;  %1086 = vmatpush3.bf16.msra.mxu1 %v1118_v6 }
  0x19   : > { %1036 = vmatprep.subr.bf16.mxu0 %v1119_v7  ;;  %1079 = vmatprep.subr.bf16.mxu1 %v1119_v7 }
  0x1c   : > { %1037 = vmatpush3.bf16.msra.mxu0 %v1119_v7  ;;  %1087 = vmatpush3.bf16.msra.mxu1 %v1119_v7 }
  0x1d   : > { %1038 = vmatprep.subr.bf16.mxu0 %v1120_v8  ;;  %1080 = vmatprep.subr.bf16.mxu1 %v1120_v8 }
  0x20   : > { %1039 = vmatpush3.bf16.msra.mxu0 %v1120_v8  ;;  %1088 = vmatpush3.bf16.msra.mxu1 %v1120_v8 }
  0x21   : > { %1040 = vmatprep.subr.bf16.mxu0 %v1121_v9  ;;  %1081 = vmatprep.subr.bf16.mxu1 %v1121_v9 }
  0x24   : > { %1041 = vmatpush3.bf16.msra.mxu0 %v1121_v9  ;;  %1089 = vmatpush3.bf16.msra.mxu1 %v1121_v9 }
  0x27   : > { %1043 = vmatmul.mubr.bf16.vlgmr.msra.gmra.mrb[0].mxu0 %v1124_v10  ;;  %1059 = vmatmul.mubr.bf16.vlgmr.msra.gmra.mrb[0].mxu1 %v1125_v11 }
  0x28   : > { %1046 = vmatprep.mubr.bf16.mxu0 %v1126_v12  ;;  %1062 = vmatprep.mubr.bf16.mxu1 %v1127_v13 }
  0x2f   : > { %1047 = vmatmul.mubr.bf16.gmra.mrb[4].mxu0 %v1128_v14  ;;  %1063 = vmatmul.mubr.bf16.gmra.mrb[4].mxu1 %v1129_v15 }
  0x30   : > { %1050 = vmatprep.mubr.bf16.mxu0 %v1130_v16  ;;  %1066 = vmatprep.mubr.bf16.mxu1 %v1131_v17 }
  0x37   : > { %1051 = vmatmul.mubr.bf16.gmra.mrb[8].mxu0 %v1132_v18  ;;  %1067 = vmatmul.mubr.bf16.gmra.mrb[8].mxu1 %v1133_v19 }
  0x38   : > { %1054 = vmatprep.mubr.bf16.mxu0 %v1134_v20  ;;  %1070 = vmatprep.mubr.bf16.mxu1 %v1135_v21 }
  0x3f   : > { %1055 = vmatmul.mubr.bf16.gmra.mrb[12].mxu0 %v1136_v22  ;;  %1071 = vmatmul.mubr.bf16.gmra.mrb[12].mxu1 %v1137_v23 }
  0xfa   : > { %v1044_v24 = vpop.f32.mrb[0].mxu0  ;;  %v1060_v25 = vpop.f32.mrb[0].mxu1 }
  0xfb   : > { %vm741_vm0 = vcmp.ge.f32.partialorder %v1044_v24, 0.0  ;;  %v773_v26 = vmul.f32 0.2, %v1044_v24  ;;  %vm757_vm1 = vcmp.ge.f32.partialorder %v1060_v25, 0.0  ;;  %v789_v27 = vmul.f32 0.2, %v1060_v25 }
  0xfc   : > { %v513_v28 = vpop.f32.mrb[1].mxu0  ;;  %v577_v29 = vpop.f32.mrb[1].mxu1 }
  0xfd   : > { %v805_v30 = vsel %vm741_vm0, %v1044_v24, %v773_v26  ;;  %v821_v31 = vsel %vm757_vm1, %v1060_v25, %v789_v27  ;;  %vm739_vm2 = vcmp.ge.f32.partialorder %v513_v28, 0.0  ;;  %v771_v32 = vmul.f32 0.2, %v513_v28  ;;  %v1045_v33 = vpop.f32.mrb[2].mxu0  ;;  %v1061_v34 = vpop.f32.mrb[2].mxu1 }
  0xfe   : > { %837 = vst [vmem:[%s1247_s9 + $0x10] sm:$0xff] %v805_v30  ;;  %853 = vst [vmem:[%s1247_s9 + $0x90] sm:$0xff] %v821_v31  ;;  %vm755_vm3 = vcmp.ge.f32.partialorder %v577_v29, 0.0  ;;  %v787_v35 = vmul.f32 0.2, %v577_v29  ;;  %vm742_vm4 = vcmp.ge.f32.partialorder %v1045_v33, 0.0 }
  0xff   : > { %v774_v36 = vmul.f32 0.2, %v1045_v33  ;;  %v803_v37 = vsel %vm739_vm2, %v513_v28, %v771_v32  ;;  %vm758_vm5 = vcmp.ge.f32.partialorder %v1061_v34, 0.0  ;;  %v790_v38 = vmul.f32 0.2, %v1061_v34  ;;  %v516_v39 = vpop.f32.mrb[3].mxu0 }
 0x100   : > { %v580_v40 = vpop.f32.mrb[3].mxu1  ;;  %835 = vst [vmem:[%s1247_s9] sm:$0xff] %v803_v37  ;;  %v819_v41 = vsel %vm755_vm3, %v577_v29, %v787_v35  ;;  %vm740_vm6 = vcmp.ge.f32.partialorder %v516_v39, 0.0  ;;  %v772_v43 = vmul.f32 0.2, %v516_v39 }
 0x101   : > { %v806_v42 = vsel %vm742_vm4, %v1045_v33, %v774_v36  ;;  %851 = vst [vmem:[%s1247_s9 + $0x80] sm:$0xff] %v819_v41  ;;  %v822_v44 = vsel %vm758_vm5, %v1061_v34, %v790_v38  ;;  %vm756_vm7 = vcmp.ge.f32.partialorder %v580_v40, 0.0  ;;  %v788_v45 = vmul.f32 0.2, %v580_v40 }
 0x102   : > { %838 = vst [vmem:[%s1247_s9 + $0x18] sm:$0xff] %v806_v42  ;;  %854 = vst [vmem:[%s1247_s9 + $0x98] sm:$0xff] %v822_v44  ;;  %v804_v46 = vsel %vm740_vm6, %v516_v39, %v772_v43  ;;  %v1048_v47 = vpop.f32.mrb[4].mxu0  ;;  %v1064_v48 = vpop.f32.mrb[4].mxu1 }
 0x103   : > { %836 = vst [vmem:[%s1247_s9 + $0x8] sm:$0xff] %v804_v46  ;;  %v820_v49 = vsel %vm756_vm7, %v580_v40, %v788_v45  ;;  %vm745_vm8 = vcmp.ge.f32.partialorder %v1048_v47, 0.0  ;;  %v777_v50 = vmul.f32 0.2, %v1048_v47  ;;  %vm761_vm9 = vcmp.ge.f32.partialorder %v1064_v48, 0.0  ;;  %v529_v51 = vpop.f32.mrb[5].mxu0 }
 0x104   : > { %v593_v52 = vpop.f32.mrb[5].mxu1  ;;  %852 = vst [vmem:[%s1247_s9 + $0x88] sm:$0xff] %v820_v49  ;;  %v793_v53 = vmul.f32 0.2, %v1064_v48  ;;  %vm743_vm10 = vcmp.ge.f32.partialorder %v529_v51, 0.0  ;;  %v1049_v57 = vpop.f32.mrb[6].mxu0 }
 0x105   : > { %v775_v54 = vmul.f32 0.2, %v529_v51  ;;  %vm759_vm11 = vcmp.ge.f32.partialorder %v593_v52, 0.0  ;;  %v809_v55 = vsel %vm745_vm8, %v1048_v47, %v777_v50  ;;  %v791_v56 = vmul.f32 0.2, %v593_v52  ;;  %v1065_v58 = vpop.f32.mrb[6].mxu1 }
 0x106   : > { %841 = vst [vmem:[%s1247_s9 + $0x30] sm:$0xff] %v809_v55  ;;  %v825_v59 = vsel %vm761_vm9, %v1064_v48, %v793_v53  ;;  %vm746_vm12 = vcmp.ge.f32.partialorder %v1049_v57, 0.0  ;;  %v778_v61 = vmul.f32 0.2, %v1049_v57  ;;  %v532_v62 = vpop.f32.mrb[7].mxu0  ;;  %v596_v63 = vpop.f32.mrb[7].mxu1 }
 0x107   : > { %v807_v60 = vsel %vm743_vm10, %v529_v51, %v775_v54  ;;  %857 = vst [vmem:[%s1247_s9 + $0xb0] sm:$0xff] %v825_v59  ;;  %v823_v0 = vsel %vm759_vm11, %v593_v52, %v791_v56  ;;  %vm762_vm13 = vcmp.ge.f32.partialorder %v1065_v58, 0.0  ;;  %v794_v1 = vmul.f32 0.2, %v1065_v58 }
 0x108   : > { %839 = vst [vmem:[%s1247_s9 + $0x20] sm:$0xff] %v807_v60  ;;  %vm744_vm14 = vcmp.ge.f32.partialorder %v532_v62, 0.0  ;;  %855 = vst [vmem:[%s1247_s9 + $0xa0] sm:$0xff] %v823_v0  ;;  %v810_v2 = vsel %vm746_vm12, %v1049_v57, %v778_v61  ;;  %v776_v3 = vmul.f32 0.2, %v532_v62  ;;  %vm760_vm15 = vcmp.ge.f32.partialorder %v596_v63, 0.0 }
 0x109   : > { %v792_v4 = vmul.f32 0.2, %v596_v63  ;;  %842 = vst [vmem:[%s1247_s9 + $0x38] sm:$0xff] %v810_v2  ;;  %v826_v5 = vsel %vm762_vm13, %v1065_v58, %v794_v1 }
 0x10a   : > { %858 = vst [vmem:[%s1247_s9 + $0xb8] sm:$0xff] %v826_v5  ;;  %v808_v6 = vsel %vm744_vm14, %v532_v62, %v776_v3  ;;  %v1052_v8 = vpop.f32.mrb[8].mxu0  ;;  %v1068_v9 = vpop.f32.mrb[8].mxu1 }
 0x10b   : > { %v824_v7 = vsel %vm760_vm15, %v596_v63, %v792_v4  ;;  %840 = vst [vmem:[%s1247_s9 + $0x28] sm:$0xff] %v808_v6  ;;  %vm749_vm0 = vcmp.ge.f32.partialorder %v1052_v8, 0.0  ;;  %v781_v10 = vmul.f32 0.2, %v1052_v8  ;;  %vm765_vm1 = vcmp.ge.f32.partialorder %v1068_v9, 0.0  ;;  %v545_v12 = vpop.f32.mrb[9].mxu0 }
 0x10c   : > { %856 = vst [vmem:[%s1247_s9 + $0xa8] sm:$0xff] %v824_v7  ;;  %v797_v11 = vmul.f32 0.2, %v1068_v9  ;;  %v609_v13 = vpop.f32.mrb[9].mxu1  ;;  %vm747_vm2 = vcmp.ge.f32.partialorder %v545_v12, 0.0  ;;  %v1053_v17 = vpop.f32.mrb[10].mxu0 }
 0x10d   : > { %v813_v14 = vsel %vm749_vm0, %v1052_v8, %v781_v10  ;;  %v779_v16 = vmul.f32 0.2, %v545_v12  ;;  %v1069_v18 = vpop.f32.mrb[10].mxu1  ;;  %vm763_vm3 = vcmp.ge.f32.partialorder %v609_v13, 0.0  ;;  %v795_v19 = vmul.f32 0.2, %v609_v13 }
 0x10e   : > { %v829_v15 = vsel %vm765_vm1, %v1068_v9, %v797_v11  ;;  %845 = vst [vmem:[%s1247_s9 + $0x50] sm:$0xff] %v813_v14  ;;  %vm750_vm4 = vcmp.ge.f32.partialorder %v1053_v17, 0.0  ;;  %v782_v20 = vmul.f32 0.2, %v1053_v17  ;;  %vm766_vm5 = vcmp.ge.f32.partialorder %v1069_v18, 0.0  ;;  %v548_v23 = vpop.f32.mrb[11].mxu0 }
 0x10f   : > { %861 = vst [vmem:[%s1247_s9 + $0xd0] sm:$0xff] %v829_v15  ;;  %v811_v21 = vsel %vm747_vm2, %v545_v12, %v779_v16  ;;  %v798_v22 = vmul.f32 0.2, %v1069_v18  ;;  %v612_v24 = vpop.f32.mrb[11].mxu1  ;;  %v827_v25 = vsel %vm763_vm3, %v609_v13, %v795_v19  ;;  %vm748_vm6 = vcmp.ge.f32.partialorder %v548_v23, 0.0 }
 0x110   : > { %843 = vst [vmem:[%s1247_s9 + $0x40] sm:$0xff] %v811_v21  ;;  %v814_v26 = vsel %vm750_vm4, %v1053_v17, %v782_v20  ;;  %v780_v27 = vmul.f32 0.2, %v548_v23  ;;  %859 = vst [vmem:[%s1247_s9 + $0xc0] sm:$0xff] %v827_v25  ;;  %vm764_vm7 = vcmp.ge.f32.partialorder %v612_v24, 0.0 }
 0x111   : > { %846 = vst [vmem:[%s1247_s9 + $0x58] sm:$0xff] %v814_v26  ;;  %v830_v28 = vsel %vm766_vm5, %v1069_v18, %v798_v22  ;;  %v796_v29 = vmul.f32 0.2, %v612_v24 }
 0x112   : > { %862 = vst [vmem:[%s1247_s9 + $0xd8] sm:$0xff] %v830_v28  ;;  %v812_v30 = vsel %vm748_vm6, %v548_v23, %v780_v27  ;;  %v1056_v31 = vpop.f32.mrb[12].mxu0  ;;  %v1072_v32 = vpop.f32.mrb[12].mxu1 }
 0x113   : > { %844 = vst [vmem:[%s1247_s9 + $0x48] sm:$0xff] %v812_v30  ;;  %v828_v33 = vsel %vm764_vm7, %v612_v24, %v796_v29  ;;  %vm753_vm8 = vcmp.ge.f32.partialorder %v1056_v31, 0.0  ;;  %v785_v34 = vmul.f32 0.2, %v1056_v31  ;;  %vm769_vm9 = vcmp.ge.f32.partialorder %v1072_v32, 0.0  ;;  %v561_v35 = vpop.f32.mrb[13].mxu0 }
 0x114   : > { %v625_v36 = vpop.f32.mrb[13].mxu1  ;;  %860 = vst [vmem:[%s1247_s9 + $0xc8] sm:$0xff] %v828_v33  ;;  %v801_v37 = vmul.f32 0.2, %v1072_v32  ;;  %vm751_vm10 = vcmp.ge.f32.partialorder %v561_v35, 0.0  ;;  %v1057_v41 = vpop.f32.mrb[14].mxu0 }
 0x115   : > { %v783_v38 = vmul.f32 0.2, %v561_v35  ;;  %vm767_vm11 = vcmp.ge.f32.partialorder %v625_v36, 0.0  ;;  %v817_v39 = vsel %vm753_vm8, %v1056_v31, %v785_v34  ;;  %v799_v40 = vmul.f32 0.2, %v625_v36  ;;  %v1073_v42 = vpop.f32.mrb[14].mxu1 }
 0x116   : > { %849 = vst [vmem:[%s1247_s9 + $0x70] sm:$0xff] %v817_v39  ;;  %v833_v43 = vsel %vm769_vm9, %v1072_v32, %v801_v37  ;;  %vm754_vm12 = vcmp.ge.f32.partialorder %v1057_v41, 0.0  ;;  %v786_v45 = vmul.f32 0.2, %v1057_v41  ;;  %v564_v46 = vpop.f32.mrb[15].mxu0  ;;  %v628_v47 = vpop.f32.mrb[15].mxu1 }
 0x117   : > { %v815_v44 = vsel %vm751_vm10, %v561_v35, %v783_v38  ;;  %865 = vst [vmem:[%s1247_s9 + $0xf0] sm:$0xff] %v833_v43  ;;  %v831_v48 = vsel %vm767_vm11, %v625_v36, %v799_v40  ;;  %vm770_vm13 = vcmp.ge.f32.partialorder %v1073_v42, 0.0  ;;  %v802_v49 = vmul.f32 0.2, %v1073_v42 }
 0x118   : > { %847 = vst [vmem:[%s1247_s9 + $0x60] sm:$0xff] %v815_v44  ;;  %vm752_vm14 = vcmp.ge.f32.partialorder %v564_v46, 0.0  ;;  %863 = vst [vmem:[%s1247_s9 + $0xe0] sm:$0xff] %v831_v48  ;;  %v818_v50 = vsel %vm754_vm12, %v1057_v41, %v786_v45  ;;  %v784_v51 = vmul.f32 0.2, %v564_v46  ;;  %vm768_vm15 = vcmp.ge.f32.partialorder %v628_v47, 0.0 }
 0x119   : > { %v800_v52 = vmul.f32 0.2, %v628_v47  ;;  %850 = vst [vmem:[%s1247_s9 + $0x78] sm:$0xff] %v818_v50  ;;  %v834_v53 = vsel %vm770_vm13, %v1073_v42, %v802_v49 }
 0x11a   : > { %866 = vst [vmem:[%s1247_s9 + $0xf8] sm:$0xff] %v834_v53  ;;  %v816_v54 = vsel %vm752_vm14, %v564_v46, %v784_v51 }
 0x11b   : > { %v832_v55 = vsel %vm768_vm15, %v628_v47, %v800_v52  ;;  %848 = vst [vmem:[%s1247_s9 + $0x68] sm:$0xff] %v816_v54 }
 0x11c   : > { %864 = vst [vmem:[%s1247_s9 + $0xe8] sm:$0xff] %v832_v55 }
 0x11d PF: > { %s12_s11 = sadd.s32 1, %s1160_s11   ;;  %s1293_s9 = smov %s1156_s10 }
 0x11e   : > { %p9_p5 = scmp.ge.s32.totalorder %s12_s11, 4   ;;  %s1294_s10 = smov %s1296_s12 }
 0x120   :  { %11 = sbr.rel (!%p9_p5) target bundleno = 2 (0x2), region = 69 }

// kernel: custom-call.1
= control target key start
LH: loop header
LB: loop body
LE: loop exit
PB: predicated region body
PF: predicated region fallthrough
CT: control target
= control target key end

     0   :  { %s6_s0 = inlined_call_operand.vmem [shape: f32[128], index: 0, kind: output, shape index: {}]  }

// kernel: d_net_forward.6
= control target key start
LH: loop header
LB: loop body
LE: loop exit
PB: predicated region body
PF: predicated region fallthrough
CT: control target
= control target key end

     0   :  { %s2394_s1 = inlined_call_operand.vmem [shape: bf16[1024,128], index: 1, kind: input, shape index: {}]   ;;  %s2395_s0 = inlined_call_operand.vmem [shape: bf16[128,1024], index: 0, kind: input, shape index: {}]   ;;  %s2396_s2 = inlined_call_operand.vmem [shape: f32[128,128], index: 2, kind: output, shape index: {}]  }
   0x1   :  { %v1835_v0 = vld [vmem:[%s2394_s1 + $0x40] sm:$0xff]   ;;  %v1839_v4 = vld [vmem:[%s2394_s1 + $0x48] sm:$0xff]   ;;  %v1843_v8 = vld [vmem:[%s2394_s1 + $0x50] sm:$0xff]  }
   0x2   :  { %v1836_v1 = vld [vmem:[%s2394_s1 + $0xc0] sm:$0xff]   ;;  %1579 = vmatprep.subr.bf16.mxu0 %v1835_v0  ;;  %v1840_v5 = vld [vmem:[%s2394_s1 + $0xc8] sm:$0xff]   ;;  %v1844_v9 = vld [vmem:[%s2394_s1 + $0xd0] sm:$0xff]  }
   0x3   :  { %v1837_v2 = vld [vmem:[%s2394_s1] sm:$0xff]   ;;  %1643 = vmatprep.subr.bf16.mxu1 %v1836_v1  ;;  %v1841_v6 = vld [vmem:[%s2394_s1 + $0x8] sm:$0xff]   ;;  %v1845_v10 = vld [vmem:[%s2394_s1 + $0x10] sm:$0xff]  }
   0x4   :  { %v1838_v3 = vld [vmem:[%s2394_s1 + $0x80] sm:$0xff]   ;;  %1580 = vmatpush3.bf16.msra.mxu0 %v1837_v2  ;;  %v1842_v7 = vld [vmem:[%s2394_s1 + $0x88] sm:$0xff]   ;;  %v1846_v11 = vld [vmem:[%s2394_s1 + $0x90] sm:$0xff]  }
   0x5   :  { %1644 = vmatpush3.bf16.msra.mxu1 %v1838_v3  ;;  %1581 = vmatprep.subr.bf16.mxu0 %v1839_v4  ;;  %v1847_v12 = vld [vmem:[%s2394_s1 + $0x58] sm:$0xff]   ;;  %v1851_v16 = vld [vmem:[%s2394_s1 + $0x60] sm:$0xff]   ;;  %v1855_v20 = vld [vmem:[%s2394_s1 + $0x68] sm:$0xff]  }
   0x6   :  { %1645 = vmatprep.subr.bf16.mxu1 %v1840_v5  ;;  %v1848_v13 = vld [vmem:[%s2394_s1 + $0xd8] sm:$0xff]   ;;  %v1852_v17 = vld [vmem:[%s2394_s1 + $0xe0] sm:$0xff]   ;;  %v1856_v21 = vld [vmem:[%s2394_s1 + $0xe8] sm:$0xff]  }
   0x7   :  { %v1849_v14 = vld [vmem:[%s2394_s1 + $0x18] sm:$0xff]   ;;  %v1853_v18 = vld [vmem:[%s2394_s1 + $0x20] sm:$0xff]   ;;  %v1857_v22 = vld [vmem:[%s2394_s1 + $0x28] sm:$0xff]  }
   0x8   :  { %1582 = vmatpush3.bf16.msra.mxu0 %v1841_v6  ;;  %v1850_v15 = vld [vmem:[%s2394_s1 + $0x98] sm:$0xff]   ;;  %v1854_v19 = vld [vmem:[%s2394_s1 + $0xa0] sm:$0xff]   ;;  %v1858_v23 = vld [vmem:[%s2394_s1 + $0xa8] sm:$0xff]  }
   0x9   :  { %1646 = vmatpush3.bf16.msra.mxu1 %v1842_v7  ;;  %1583 = vmatprep.subr.bf16.mxu0 %v1843_v8  ;;  %v1859_v24 = vld [vmem:[%s2394_s1 + $0x70] sm:$0xff]   ;;  %v1863_v28 = vld [vmem:[%s2394_s1 + $0x78] sm:$0xff]   ;;  %v48_v32 = vld [vmem:[%s2395_s0] sm:$0xff] }
   0xa   :  { %1647 = vmatprep.subr.bf16.mxu1 %v1844_v9  ;;  %v1860_v25 = vld [vmem:[%s2394_s1 + $0xf0] sm:$0xff]   ;;  %v1864_v29 = vld [vmem:[%s2394_s1 + $0xf8] sm:$0xff]   ;;  %v52_v33 = vld [vmem:[%s2395_s0 + $0x20] sm:$0xff] }
   0xb   :  { %v1861_v26 = vld [vmem:[%s2394_s1 + $0x30] sm:$0xff]   ;;  %v1865_v30 = vld [vmem:[%s2394_s1 + $0x38] sm:$0xff]   ;;  %v49_v34 = vld [vmem:[%s2395_s0 + $0x8] sm:$0xff]  ;;  %v1451_v35 = vcombine.low %v48_v32, %v52_v33  ;;  %v1452_v36 = vcombine.high %v48_v32, %v52_v33 }
   0xc   :  { %1584 = vmatpush3.bf16.msra.mxu0 %v1845_v10  ;;  %v1862_v27 = vld [vmem:[%s2394_s1 + $0xb0] sm:$0xff]   ;;  %v1866_v31 = vld [vmem:[%s2394_s1 + $0xb8] sm:$0xff]   ;;  %v53_v37 = vld [vmem:[%s2395_s0 + $0x28] sm:$0xff] }
   0xd   :  { %1648 = vmatpush3.bf16.msra.mxu1 %v1846_v11  ;;  %1585 = vmatprep.subr.bf16.mxu0 %v1847_v12  ;;  %v1453_v38 = vcombine.low %v49_v34, %v53_v37  ;;  %v1454_v39 = vcombine.high %v49_v34, %v53_v37  ;;  %v1867_v40 = vld [vmem:[%s2394_s1 + $0x140] sm:$0xff]   ;;  %v57_v47 = vld [vmem:[%s2395_s0 + $0x48] sm:$0xff]  ;;  %v1875_v62 = vld [vmem:[%s2394_s1 + $0x150] sm:$0xff]  }
   0xe   :  { %1649 = vmatprep.subr.bf16.mxu1 %v1848_v13  ;;  %976 = vmatprep.mubr.bf16.mxu0 %v1452_v36  ;;  %v1868_v41 = vld [vmem:[%s2394_s1 + $0x100] sm:$0xff]   ;;  %v61_v48 = vld [vmem:[%s2395_s0 + $0x68] sm:$0xff]  ;;  %v1876_v63 = vld [vmem:[%s2394_s1 + $0x110] sm:$0xff]  }
   0xf   :  { %1073 = vmatprep.mubr.bf16.mxu1 %v1454_v39  ;;  %v1869_v42 = vld [vmem:[%s2394_s1 + $0x1c0] sm:$0xff]   ;;  %v1462_v49 = vcombine.high %v57_v47, %v61_v48  ;;  %v1871_v50 = vld [vmem:[%s2394_s1 + $0x148] sm:$0xff]   ;;  %v1461_v53 = vcombine.low %v57_v47, %v61_v48  ;;  %v1877_v0 = vld [vmem:[%s2394_s1 + $0x1d0] sm:$0xff]  }
  0x10   :  { %1586 = vmatpush3.bf16.msra.mxu0 %v1849_v14  ;;  %v1870_v43 = vld [vmem:[%s2394_s1 + $0x180] sm:$0xff]   ;;  %v1872_v52 = vld [vmem:[%s2394_s1 + $0x108] sm:$0xff]   ;;  %v1878_v1 = vld [vmem:[%s2394_s1 + $0x190] sm:$0xff]  }
  0x11   :  { %1650 = vmatpush3.bf16.msra.mxu1 %v1850_v15  ;;  %1587 = vmatprep.subr.bf16.mxu0 %v1851_v16  ;;  %v56_v44 = vld [vmem:[%s2395_s0 + $0x40] sm:$0xff]  ;;  %v1873_v54 = vld [vmem:[%s2394_s1 + $0x1c8] sm:$0xff]   ;;  %v1879_v10 = vld [vmem:[%s2394_s1 + $0x158] sm:$0xff]  }
  0x12   :  { %1651 = vmatprep.subr.bf16.mxu1 %v1852_v17  ;;  %v60_v45 = vld [vmem:[%s2395_s0 + $0x60] sm:$0xff]  ;;  %v1874_v55 = vld [vmem:[%s2394_s1 + $0x188] sm:$0xff]   ;;  %v1880_v11 = vld [vmem:[%s2394_s1 + $0x118] sm:$0xff]  }
  0x13   :  { %v1460_v46 = vcombine.high %v56_v44, %v60_v45  ;;  %v1459_v51 = vcombine.low %v56_v44, %v60_v45  ;;  %v64_v56 = vld [vmem:[%s2395_s0 + $0x80] sm:$0xff]  ;;  %v65_v58 = vld [vmem:[%s2395_s0 + $0x88] sm:$0xff]  ;;  %v1881_v12 = vld [vmem:[%s2394_s1 + $0x1d8] sm:$0xff]  }
  0x14   :  { %1588 = vmatpush3.bf16.msra.mxu0 %v1853_v18  ;;  %v68_v57 = vld [vmem:[%s2395_s0 + $0xa0] sm:$0xff]  ;;  %v69_v59 = vld [vmem:[%s2395_s0 + $0xa8] sm:$0xff]  ;;  %v1882_v13 = vld [vmem:[%s2394_s1 + $0x198] sm:$0xff]  }
  0x15   :  { %1652 = vmatpush3.bf16.msra.mxu1 %v1854_v19  ;;  %1589 = vmatprep.subr.bf16.mxu0 %v1855_v20  ;;  %v1468_v60 = vcombine.high %v64_v56, %v68_v57  ;;  %v1470_v61 = vcombine.high %v65_v58, %v69_v59  ;;  %v1467_v2 = vcombine.low %v64_v56, %v68_v57  ;;  %v72_v3 = vld [vmem:[%s2395_s0 + $0xc0] sm:$0xff]  ;;  %v73_v5 = vld [vmem:[%s2395_s0 + $0xc8] sm:$0xff]  ;;  %v1892_v39 = vld [vmem:[%s2394_s1 + $0x130] sm:$0xff]  }
  0x16   :  { %1653 = vmatprep.subr.bf16.mxu1 %v1856_v21  ;;  %v76_v4 = vld [vmem:[%s2395_s0 + $0xe0] sm:$0xff]  ;;  %v1469_v6 = vcombine.low %v65_v58, %v69_v59  ;;  %v77_v8 = vld [vmem:[%s2395_s0 + $0xe8] sm:$0xff]  ;;  %v1896_v48 = vld [vmem:[%s2394_s1 + $0x138] sm:$0xff]  }
  0x17   :  { %v1476_v7 = vcombine.high %v72_v3, %v76_v4  ;;  %v1478_v9 = vcombine.high %v73_v5, %v77_v8  ;;  %v80_v14 = vld [vmem:[%s2395_s0 + $0x100] sm:$0xff]  ;;  %v81_v16 = vld [vmem:[%s2395_s0 + $0x108] sm:$0xff]  ;;  %v1475_v19 = vcombine.low %v72_v3, %v76_v4  ;;  %v1477_v21 = vcombine.low %v73_v5, %v77_v8  ;;  %v59_v8 = vld [vmem:[%s2395_s0 + $0x58] sm:$0xff] }
  0x18   :  { %1590 = vmatpush3.bf16.msra.mxu0 %v1857_v22  ;;  %v84_v15 = vld [vmem:[%s2395_s0 + $0x120] sm:$0xff]  ;;  %v85_v17 = vld [vmem:[%s2395_s0 + $0x128] sm:$0xff] }
  0x19   :  { %1654 = vmatpush3.bf16.msra.mxu1 %v1858_v23  ;;  %1591 = vmatprep.subr.bf16.mxu0 %v1859_v24  ;;  %v1883_v18 = vld [vmem:[%s2394_s1 + $0x160] sm:$0xff]   ;;  %v1484_v22 = vcombine.high %v80_v14, %v84_v15  ;;  %v1486_v24 = vcombine.high %v81_v16, %v85_v17  ;;  %v1889_v32 = vld [vmem:[%s2394_s1 + $0x1e8] sm:$0xff]   ;;  %v1483_v34 = vcombine.low %v80_v14, %v84_v15  ;;  %v66_v14 = vld [vmem:[%s2395_s0 + $0x90] sm:$0xff] }
  0x1a   :  { %1655 = vmatprep.subr.bf16.mxu1 %v1860_v25  ;;  %v1884_v20 = vld [vmem:[%s2394_s1 + $0x120] sm:$0xff]   ;;  %v1890_v33 = vld [vmem:[%s2394_s1 + $0x1a8] sm:$0xff]   ;;  %v70_v15 = vld [vmem:[%s2395_s0 + $0xb0] sm:$0xff] }
  0x1b   :  { %v1885_v23 = vld [vmem:[%s2394_s1 + $0x1e0] sm:$0xff]   ;;  %v97_v44 = vld [vmem:[%s2395_s0 + $0x188] sm:$0xff] }
  0x1c   :  { %1592 = vmatpush3.bf16.msra.mxu0 %v1861_v26  ;;  %v1886_v25 = vld [vmem:[%s2394_s1 + $0x1a0] sm:$0xff]   ;;  %v101_v45 = vld [vmem:[%s2395_s0 + $0x1a8] sm:$0xff] }
  0x1d   :  { %1656 = vmatpush3.bf16.msra.mxu1 %v1862_v27  ;;  %1593 = vmatprep.subr.bf16.mxu0 %v1863_v28  ;;  %v88_v26 = vld [vmem:[%s2395_s0 + $0x140] sm:$0xff]  ;;  %v1887_v28 = vld [vmem:[%s2394_s1 + $0x168] sm:$0xff]   ;;  %v1501_v59 = vcombine.low %v97_v44, %v101_v45 }
  0x1e   :  { %1657 = vmatprep.subr.bf16.mxu1 %v1864_v29  ;;  %v92_v27 = vld [vmem:[%s2395_s0 + $0x160] sm:$0xff]  ;;  %v89_v29 = vld [vmem:[%s2395_s0 + $0x148] sm:$0xff] }
  0x1f   :  { %v1492_v36 = vcombine.high %v88_v26, %v92_v27  ;;  %v1491_v47 = vcombine.low %v88_v26, %v92_v27  ;;  %v105_v56 = vld [vmem:[%s2395_s0 + $0x1c8] sm:$0xff]  ;;  %v1471_v26 = vcombine.low %v66_v14, %v70_v15 }
  0x20   :  { %1594 = vmatpush3.bf16.msra.mxu0 %v1865_v30  ;;  %v93_v30 = vld [vmem:[%s2395_s0 + $0x168] sm:$0xff] }
  0x21   :  { %1658 = vmatpush3.bf16.msra.mxu1 %v1866_v31  ;;  %1707 = vmatprep.subr.bf16.mxu0 %v1867_v40  ;;  %v1888_v31 = vld [vmem:[%s2394_s1 + $0x128] sm:$0xff]   ;;  %v1494_v37 = vcombine.high %v89_v29, %v93_v30  ;;  %v1893_v40 = vld [vmem:[%s2394_s1 + $0x1f0] sm:$0xff]  }
  0x22   :  { %1771 = vmatprep.subr.bf16.mxu1 %v1869_v42  ;;  %v100_v42 = vld [vmem:[%s2395_s0 + $0x1a0] sm:$0xff]  ;;  %v109_v57 = vld [vmem:[%s2395_s0 + $0x1e8] sm:$0xff] }
  0x23   :  { %977 = vmatmul.mubr.bf16.vlgmr.msra.gmra.mrb[0].mxu0 %v1451_v35  ;;  %v1485_v35 = vcombine.low %v81_v16, %v85_v17  ;;  %v1509_v3 = vcombine.low %v105_v56, %v109_v57  ;;  %v67_v16 = vld [vmem:[%s2395_s0 + $0x98] sm:$0xff] }
  0x24   :  { %1074 = vmatmul.mubr.bf16.vlgmr.msra.gmra.mrb[0].mxu1 %v1453_v38  ;;  %1708 = vmatpush3.bf16.msra.mxu0 %v1868_v41  ;;  %v1891_v38 = vld [vmem:[%s2394_s1 + $0x170] sm:$0xff]   ;;  %v96_v41 = vld [vmem:[%s2395_s0 + $0x180] sm:$0xff]  ;;  %v71_v17 = vld [vmem:[%s2395_s0 + $0xb8] sm:$0xff] }
  0x25   :  { %1772 = vmatpush3.bf16.msra.mxu1 %v1870_v43  ;;  %984 = vmatprep.mubr.bf16.mxu0 %v1460_v46  ;;  %v1894_v43 = vld [vmem:[%s2394_s1 + $0x1b0] sm:$0xff]   ;;  %v1895_v46 = vld [vmem:[%s2394_s1 + $0x178] sm:$0xff]   ;;  %v1499_v58 = vcombine.low %v96_v41, %v100_v42  ;;  %v1473_v27 = vcombine.low %v67_v16, %v71_v17 }
  0x26   :  { %1081 = vmatprep.mubr.bf16.mxu1 %v1462_v49  ;;  %1709 = vmatprep.subr.bf16.mxu0 %v1871_v50  ;;  %v1493_v49 = vcombine.low %v89_v29, %v93_v30  ;;  %v1500_v50 = vcombine.high %v96_v41, %v100_v42  ;;  %v82_v30 = vld [vmem:[%s2395_s0 + $0x110] sm:$0xff]  ;;  %v95_v41 = vld [vmem:[%s2395_s0 + $0x178] sm:$0xff] }
  0x27   :  { %1773 = vmatprep.subr.bf16.mxu1 %v1873_v54  ;;  %v104_v54 = vld [vmem:[%s2395_s0 + $0x1c0] sm:$0xff] }
  0x28   :  { %1710 = vmatpush3.bf16.msra.mxu0 %v1872_v52  ;;  %v1502_v52 = vcombine.high %v97_v44, %v101_v45 }
  0x29   :  { %1774 = vmatpush3.bf16.msra.mxu1 %v1874_v55  ;;  %1711 = vmatprep.subr.bf16.mxu0 %v1875_v62  ;;  %v108_v55 = vld [vmem:[%s2395_s0 + $0x1e0] sm:$0xff]  ;;  %v50_v62 = vld [vmem:[%s2395_s0 + $0x10] sm:$0xff] }
  0x2a   :  { %1775 = vmatprep.subr.bf16.mxu1 %v1877_v0  ;;  %v51_v0 = vld [vmem:[%s2395_s0 + $0x18] sm:$0xff] }
  0x2b   :  { %985 = vmatmul.mubr.bf16.gmra.mrb[4].mxu0 %v1459_v51  ;;  %v1897_v51 = vld [vmem:[%s2394_s1 + $0x1f8] sm:$0xff]  }
  0x2c   :  { %1082 = vmatmul.mubr.bf16.gmra.mrb[4].mxu1 %v1461_v53  ;;  %992 = vmatprep.mubr.bf16.mxu0 %v1468_v60  ;;  %v1898_v53 = vld [vmem:[%s2394_s1 + $0x1b8] sm:$0xff]   ;;  %v1508_v60 = vcombine.high %v104_v54, %v108_v55 }
  0x2d   :  { %1089 = vmatprep.mubr.bf16.mxu1 %v1470_v61  ;;  %1712 = vmatpush3.bf16.msra.mxu0 %v1876_v63  ;;  %v1510_v61 = vcombine.high %v105_v56, %v109_v57  ;;  %v54_v63 = vld [vmem:[%s2395_s0 + $0x30] sm:$0xff]  ;;  %v107_v56 = vld [vmem:[%s2395_s0 + $0x1d8] sm:$0xff] }
  0x2e   :  { %1776 = vmatpush3.bf16.msra.mxu1 %v1878_v1  ;;  %1713 = vmatprep.subr.bf16.mxu0 %v1879_v10  ;;  %v55_v1 = vld [vmem:[%s2395_s0 + $0x38] sm:$0xff]  ;;  %v1456_v4 = vcombine.high %v50_v62, %v54_v63  ;;  %v1455_v10 = vcombine.low %v50_v62, %v54_v63 }
  0x2f   :  { %1777 = vmatprep.subr.bf16.mxu1 %v1881_v12  ;;  %v1458_v5 = vcombine.high %v51_v0, %v55_v1  ;;  %v111_v57 = vld [vmem:[%s2395_s0 + $0x1f8] sm:$0xff] }
  0x30   :  { %v1513_v63 = vcombine.low %v107_v56, %v111_v57 }
  0x31   :  { %1714 = vmatpush3.bf16.msra.mxu0 %v1880_v11  ;;  %v1457_v11 = vcombine.low %v51_v0, %v55_v1 }
  0x32   :  { %1778 = vmatpush3.bf16.msra.mxu1 %v1882_v13  ;;  %1715 = vmatprep.subr.bf16.mxu0 %v1883_v18 }
  0x33   :  { %993 = vmatmul.mubr.bf16.gmra.mrb[8].mxu0 %v1467_v2  ;;  %1779 = vmatprep.subr.bf16.mxu1 %v1885_v23  ;;  %v1507_v2 = vcombine.low %v104_v54, %v108_v55  ;;  %v78_v23 = vld [vmem:[%s2395_s0 + $0xf0] sm:$0xff] }
  0x34   :  { %1090 = vmatmul.mubr.bf16.gmra.mrb[8].mxu1 %v1469_v6  ;;  %1000 = vmatprep.mubr.bf16.mxu0 %v1476_v7  ;;  %v58_v6 = vld [vmem:[%s2395_s0 + $0x50] sm:$0xff] }
  0x35   :  { %1097 = vmatprep.mubr.bf16.mxu1 %v1478_v9  ;;  %1716 = vmatpush3.bf16.msra.mxu0 %v1884_v20  ;;  %v62_v7 = vld [vmem:[%s2395_s0 + $0x70] sm:$0xff]  ;;  %v63_v9 = vld [vmem:[%s2395_s0 + $0x78] sm:$0xff]  ;;  %v1472_v20 = vcombine.high %v66_v14, %v70_v15 }
  0x36   :  { %1780 = vmatpush3.bf16.msra.mxu1 %v1886_v25  ;;  %1717 = vmatprep.subr.bf16.mxu0 %v1887_v28  ;;  %v1464_v12 = vcombine.high %v58_v6, %v62_v7  ;;  %v1466_v13 = vcombine.high %v59_v8, %v63_v9  ;;  %v1463_v18 = vcombine.low %v58_v6, %v62_v7  ;;  %v79_v25 = vld [vmem:[%s2395_s0 + $0xf8] sm:$0xff]  ;;  %v106_v54 = vld [vmem:[%s2395_s0 + $0x1d0] sm:$0xff] }
  0x37   :  { %1781 = vmatprep.subr.bf16.mxu1 %v1889_v32  ;;  %v83_v32 = vld [vmem:[%s2395_s0 + $0x118] sm:$0xff]  ;;  %v110_v55 = vld [vmem:[%s2395_s0 + $0x1f0] sm:$0xff] }
  0x38   :  { %v1511_v62 = vcombine.low %v106_v54, %v110_v55 }
  0x39   :  { %1718 = vmatpush3.bf16.msra.mxu0 %v1888_v31  ;;  %v86_v31 = vld [vmem:[%s2395_s0 + $0x130] sm:$0xff] }
  0x3a   :  { %1782 = vmatpush3.bf16.msra.mxu1 %v1890_v33  ;;  %1719 = vmatprep.subr.bf16.mxu0 %v1891_v38  ;;  %v87_v33 = vld [vmem:[%s2395_s0 + $0x138] sm:$0xff]  ;;  %v90_v38 = vld [vmem:[%s2395_s0 + $0x150] sm:$0xff]  ;;  %v1487_v42 = vcombine.low %v82_v30, %v86_v31 }
  0x3b   :  { %1001 = vmatmul.mubr.bf16.gmra.mrb[12].mxu0 %v1475_v19  ;;  %1783 = vmatprep.subr.bf16.mxu1 %v1893_v40  ;;  %v1465_v19 = vcombine.low %v59_v8, %v63_v9  ;;  %v91_v40 = vld [vmem:[%s2395_s0 + $0x158] sm:$0xff] }
  0x3c   :  { %1098 = vmatmul.mubr.bf16.gmra.mrb[12].mxu1 %v1477_v21  ;;  %1008 = vmatprep.mubr.bf16.mxu0 %v1484_v22  ;;  %v1474_v21 = vcombine.high %v67_v16, %v71_v17  ;;  %v74_v22 = vld [vmem:[%s2395_s0 + $0xd0] sm:$0xff]  ;;  %v1498_v45 = vcombine.high %v91_v40, %v95_v41 }
  0x3d   :  { %1105 = vmatprep.mubr.bf16.mxu1 %v1486_v24  ;;  %1720 = vmatpush3.bf16.msra.mxu0 %v1892_v39  ;;  %v75_v24 = vld [vmem:[%s2395_s0 + $0xd8] sm:$0xff]  ;;  %v1480_v28 = vcombine.high %v74_v22, %v78_v23  ;;  %v94_v39 = vld [vmem:[%s2395_s0 + $0x170] sm:$0xff] }
  0x3e   :  { %1784 = vmatpush3.bf16.msra.mxu1 %v1894_v43  ;;  %1721 = vmatprep.subr.bf16.mxu0 %v1895_v46  ;;  %v1482_v29 = vcombine.high %v75_v24, %v79_v25  ;;  %v1489_v43 = vcombine.low %v83_v32, %v87_v33  ;;  %v1496_v44 = vcombine.high %v90_v38, %v94_v39  ;;  %v98_v46 = vld [vmem:[%s2395_s0 + $0x190] sm:$0xff] }
  0x3f   :  { %1785 = vmatprep.subr.bf16.mxu1 %v1897_v51  ;;  %v1497_v51 = vcombine.low %v91_v40, %v95_v41 }
  0x41   :  { %1722 = vmatpush3.bf16.msra.mxu0 %v1896_v48  ;;  %v99_v48 = vld [vmem:[%s2395_s0 + $0x198] sm:$0xff] }
  0x42   :  { %1786 = vmatpush3.bf16.msra.mxu1 %v1898_v53 }
  0x43   :  { %1009 = vmatmul.mubr.bf16.gmra.mrb[16].mxu0 %v1483_v34  ;;  %v1479_v34 = vcombine.low %v74_v22, %v78_v23 }
  0x44   :  { %1106 = vmatmul.mubr.bf16.gmra.mrb[16].mxu1 %v1485_v35  ;;  %1016 = vmatprep.mubr.bf16.mxu0 %v1492_v36  ;;  %v1481_v35 = vcombine.low %v75_v24, %v79_v25  ;;  %v1488_v36 = vcombine.high %v82_v30, %v86_v31 }
  0x45   :  { %1113 = vmatprep.mubr.bf16.mxu1 %v1494_v37  ;;  %v1490_v37 = vcombine.high %v83_v32, %v87_v33 }
  0x4b   :  { %1017 = vmatmul.mubr.bf16.gmra.mrb[20].mxu0 %v1491_v47  ;;  %v102_v47 = vld [vmem:[%s2395_s0 + $0x1b0] sm:$0xff] }
  0x4c   :  { %1114 = vmatmul.mubr.bf16.gmra.mrb[20].mxu1 %v1493_v49  ;;  %1024 = vmatprep.mubr.bf16.mxu0 %v1500_v50  ;;  %v103_v49 = vld [vmem:[%s2395_s0 + $0x1b8] sm:$0xff]  ;;  %v1495_v50 = vcombine.low %v90_v38, %v94_v39 }
  0x4d   :  { %1121 = vmatprep.mubr.bf16.mxu1 %v1502_v52  ;;  %v1504_v52 = vcombine.high %v98_v46, %v102_v47  ;;  %v1506_v53 = vcombine.high %v99_v48, %v103_v49 }
  0x53   :  { %1025 = vmatmul.mubr.bf16.gmra.mrb[24].mxu0 %v1499_v58  ;;  %v1503_v58 = vcombine.low %v98_v46, %v102_v47 }
  0x54   :  { %1122 = vmatmul.mubr.bf16.gmra.mrb[24].mxu1 %v1501_v59  ;;  %1032 = vmatprep.mubr.bf16.mxu0 %v1508_v60  ;;  %v1505_v59 = vcombine.low %v99_v48, %v103_v49  ;;  %v1512_v60 = vcombine.high %v106_v54, %v110_v55 }
  0x55   :  { %1129 = vmatprep.mubr.bf16.mxu1 %v1510_v61  ;;  %v1514_v61 = vcombine.high %v107_v56, %v111_v57 }
  0x5b   :  { %1033 = vmatmul.mubr.bf16.gmra.mrb[28].mxu0 %v1507_v2 }
  0x5c   :  { %1130 = vmatmul.mubr.bf16.gmra.mrb[28].mxu1 %v1509_v3  ;;  %1170 = vmatprep.mubr.bf16.mxu0 %v1456_v4 }
  0x5d   :  { %1267 = vmatprep.mubr.bf16.mxu1 %v1458_v5 }
  0x63   :  { %1171 = vmatmul.mubr.bf16.vlgmr.msra.gmra.mrb[32].mxu0 %v1455_v10 }
  0x64   :  { %1268 = vmatmul.mubr.bf16.vlgmr.msra.gmra.mrb[32].mxu1 %v1457_v11  ;;  %1178 = vmatprep.mubr.bf16.mxu0 %v1464_v12 }
  0x65   :  { %1275 = vmatprep.mubr.bf16.mxu1 %v1466_v13 }
  0x6b   :  { %1179 = vmatmul.mubr.bf16.gmra.mrb[36].mxu0 %v1463_v18 }
  0x6c   :  { %1276 = vmatmul.mubr.bf16.gmra.mrb[36].mxu1 %v1465_v19  ;;  %1186 = vmatprep.mubr.bf16.mxu0 %v1472_v20 }
  0x6d   :  { %1283 = vmatprep.mubr.bf16.mxu1 %v1474_v21 }
  0x73   :  { %1187 = vmatmul.mubr.bf16.gmra.mrb[40].mxu0 %v1471_v26 }
  0x74   :  { %1284 = vmatmul.mubr.bf16.gmra.mrb[40].mxu1 %v1473_v27  ;;  %1194 = vmatprep.mubr.bf16.mxu0 %v1480_v28 }
  0x75   :  { %1291 = vmatprep.mubr.bf16.mxu1 %v1482_v29 }
  0x7b   :  { %1195 = vmatmul.mubr.bf16.gmra.mrb[44].mxu0 %v1479_v34 }
  0x7c   :  { %1292 = vmatmul.mubr.bf16.gmra.mrb[44].mxu1 %v1481_v35  ;;  %1202 = vmatprep.mubr.bf16.mxu0 %v1488_v36 }
  0x7d   :  { %1299 = vmatprep.mubr.bf16.mxu1 %v1490_v37 }
  0x83   :  { %1203 = vmatmul.mubr.bf16.gmra.mrb[48].mxu0 %v1487_v42 }
  0x84   :  { %1300 = vmatmul.mubr.bf16.gmra.mrb[48].mxu1 %v1489_v43  ;;  %1210 = vmatprep.mubr.bf16.mxu0 %v1496_v44 }
  0x85   :  { %1307 = vmatprep.mubr.bf16.mxu1 %v1498_v45 }
  0x8b   :  { %1211 = vmatmul.mubr.bf16.gmra.mrb[52].mxu0 %v1495_v50 }
  0x8c   :  { %1308 = vmatmul.mubr.bf16.gmra.mrb[52].mxu1 %v1497_v51  ;;  %1218 = vmatprep.mubr.bf16.mxu0 %v1504_v52 }
  0x8d   :  { %1315 = vmatprep.mubr.bf16.mxu1 %v1506_v53 }
  0x93   :  { %1219 = vmatmul.mubr.bf16.gmra.mrb[56].mxu0 %v1503_v58 }
  0x94   :  { %1316 = vmatmul.mubr.bf16.gmra.mrb[56].mxu1 %v1505_v59  ;;  %1226 = vmatprep.mubr.bf16.mxu0 %v1512_v60 }
  0x95   :  { %1323 = vmatprep.mubr.bf16.mxu1 %v1514_v61 }
  0x9b   :  { %1227 = vmatmul.mubr.bf16.gmra.mrb[60].mxu0 %v1511_v62 }
  0x9c   :  { %1324 = vmatmul.mubr.bf16.gmra.mrb[60].mxu1 %v1513_v63 }
  0xf6   :  { %v1595_v0 = vpop.f32.mrb[0].mxu0 }
  0xf7   :  { %v1659_v1 = vpop.f32.mrb[0].mxu1  ;;  %v1596_v2 = vpop.f32.mrb[1].mxu0 }
  0xf8   :  { %v1597_v3 = vadd.f32 %v1596_v2, %v1595_v0  ;;  %v1660_v4 = vpop.f32.mrb[1].mxu1  ;;  %v1598_v5 = vpop.f32.mrb[2].mxu0 }
  0xf9   :  { %v1661_v6 = vadd.f32 %v1660_v4, %v1659_v1  ;;  %v1662_v7 = vpop.f32.mrb[2].mxu1  ;;  %v1599_v8 = vpop.f32.mrb[3].mxu0 }
  0xfa   :  { %v1600_v9 = vadd.f32 %v1599_v8, %v1598_v5  ;;  %v1663_v10 = vpop.f32.mrb[3].mxu1 }
  0xfb   :  { %v2298_v11 = vadd.f32 %v1661_v6, %v1597_v3  ;;  %v1664_v12 = vadd.f32 %v1663_v10, %v1662_v7 }
  0xfd   :  { %v2300_v13 = vadd.f32 %v1664_v12, %v1600_v9 }
  0xfe   :  { %v1601_v14 = vpop.f32.mrb[4].mxu0 }
  0xff   :  { %v1665_v15 = vpop.f32.mrb[4].mxu1  ;;  %v1602_v16 = vpop.f32.mrb[5].mxu0 }
 0x100   :  { %v1603_v17 = vadd.f32 %v1602_v16, %v1601_v14  ;;  %v1666_v18 = vpop.f32.mrb[5].mxu1  ;;  %v1604_v19 = vpop.f32.mrb[6].mxu0 }
 0x101   :  { %v1667_v20 = vadd.f32 %v1666_v18, %v1665_v15  ;;  %v1668_v21 = vpop.f32.mrb[6].mxu1  ;;  %v1605_v22 = vpop.f32.mrb[7].mxu0 }
 0x102   :  { %v1606_v23 = vadd.f32 %v1605_v22, %v1604_v19  ;;  %v1669_v24 = vpop.f32.mrb[7].mxu1 }
 0x103   :  { %v2302_v25 = vadd.f32 %v1667_v20, %v1603_v17  ;;  %v1670_v26 = vadd.f32 %v1669_v24, %v1668_v21 }
 0x105   :  { %v2304_v27 = vadd.f32 %v1670_v26, %v1606_v23 }
 0x106   :  { %v1607_v28 = vpop.f32.mrb[8].mxu0 }
 0x107   :  { %v1671_v29 = vpop.f32.mrb[8].mxu1  ;;  %v1608_v30 = vpop.f32.mrb[9].mxu0 }
 0x108   :  { %v1609_v31 = vadd.f32 %v1608_v30, %v1607_v28  ;;  %v1672_v32 = vpop.f32.mrb[9].mxu1  ;;  %v1610_v33 = vpop.f32.mrb[10].mxu0 }
 0x109   :  { %v1673_v34 = vadd.f32 %v1672_v32, %v1671_v29  ;;  %v1674_v35 = vpop.f32.mrb[10].mxu1  ;;  %v1611_v36 = vpop.f32.mrb[11].mxu0 }
 0x10a   :  { %v1612_v37 = vadd.f32 %v1611_v36, %v1610_v33  ;;  %v1675_v38 = vpop.f32.mrb[11].mxu1 }
 0x10b   :  { %v2306_v39 = vadd.f32 %v1673_v34, %v1609_v31  ;;  %v1676_v40 = vadd.f32 %v1675_v38, %v1674_v35 }
 0x10d   :  { %v2308_v41 = vadd.f32 %v1676_v40, %v1612_v37 }
 0x10e   :  { %v1613_v42 = vpop.f32.mrb[12].mxu0 }
 0x10f   :  { %v1677_v43 = vpop.f32.mrb[12].mxu1  ;;  %v1614_v44 = vpop.f32.mrb[13].mxu0 }
 0x110   :  { %v1615_v45 = vadd.f32 %v1614_v44, %v1613_v42  ;;  %v1678_v46 = vpop.f32.mrb[13].mxu1  ;;  %v1616_v47 = vpop.f32.mrb[14].mxu0 }
 0x111   :  { %v1679_v48 = vadd.f32 %v1678_v46, %v1677_v43  ;;  %v1680_v49 = vpop.f32.mrb[14].mxu1  ;;  %v1617_v50 = vpop.f32.mrb[15].mxu0 }
 0x112   :  { %v1618_v51 = vadd.f32 %v1617_v50, %v1616_v47  ;;  %v1681_v52 = vpop.f32.mrb[15].mxu1 }
 0x113   :  { %v2310_v53 = vadd.f32 %v1679_v48, %v1615_v45  ;;  %v1682_v54 = vadd.f32 %v1681_v52, %v1680_v49 }
 0x115   :  { %v2312_v55 = vadd.f32 %v1682_v54, %v1618_v51 }
 0x116   :  { %v1619_v56 = vpop.f32.mrb[16].mxu0 }
 0x117   :  { %v1683_v57 = vpop.f32.mrb[16].mxu1  ;;  %v1620_v58 = vpop.f32.mrb[17].mxu0 }
 0x118   :  { %v1621_v59 = vadd.f32 %v1620_v58, %v1619_v56  ;;  %v1684_v60 = vpop.f32.mrb[17].mxu1  ;;  %v1622_v61 = vpop.f32.mrb[18].mxu0 }
 0x119   :  { %v1685_v62 = vadd.f32 %v1684_v60, %v1683_v57  ;;  %v1686_v63 = vpop.f32.mrb[18].mxu1  ;;  %v1623_v0 = vpop.f32.mrb[19].mxu0 }
 0x11a   :  { %v1624_v1 = vadd.f32 %v1623_v0, %v1622_v61  ;;  %v1687_v2 = vpop.f32.mrb[19].mxu1 }
 0x11b   :  { %v2314_v3 = vadd.f32 %v1685_v62, %v1621_v59  ;;  %v1688_v4 = vadd.f32 %v1687_v2, %v1686_v63 }
 0x11d   :  { %v2316_v5 = vadd.f32 %v1688_v4, %v1624_v1 }
 0x11e   :  { %v1625_v6 = vpop.f32.mrb[20].mxu0 }
 0x11f   :  { %v1689_v7 = vpop.f32.mrb[20].mxu1  ;;  %v1626_v8 = vpop.f32.mrb[21].mxu0 }
 0x120   :  { %v1627_v9 = vadd.f32 %v1626_v8, %v1625_v6  ;;  %v1690_v10 = vpop.f32.mrb[21].mxu1  ;;  %v1628_v12 = vpop.f32.mrb[22].mxu0 }
 0x121   :  { %v1691_v14 = vadd.f32 %v1690_v10, %v1689_v7  ;;  %v1692_v15 = vpop.f32.mrb[22].mxu1  ;;  %v1629_v16 = vpop.f32.mrb[23].mxu0 }
 0x122   :  { %v1630_v17 = vadd.f32 %v1629_v16, %v1628_v12  ;;  %v1693_v18 = vpop.f32.mrb[23].mxu1 }
 0x123   :  { %v2318_v19 = vadd.f32 %v1691_v14, %v1627_v9  ;;  %v1694_v20 = vadd.f32 %v1693_v18, %v1692_v15 }
 0x125   :  { %v2320_v21 = vadd.f32 %v1694_v20, %v1630_v17 }
 0x126   :  { %v1631_v22 = vpop.f32.mrb[24].mxu0 }
 0x127   :  { %v1695_v23 = vpop.f32.mrb[24].mxu1  ;;  %v1632_v24 = vpop.f32.mrb[25].mxu0 }
 0x128   :  { %v1633_v26 = vadd.f32 %v1632_v24, %v1631_v22  ;;  %v1696_v28 = vpop.f32.mrb[25].mxu1  ;;  %v1634_v29 = vpop.f32.mrb[26].mxu0 }
 0x129   :  { %v1697_v30 = vadd.f32 %v1696_v28, %v1695_v23  ;;  %v1698_v31 = vpop.f32.mrb[26].mxu1  ;;  %v1635_v32 = vpop.f32.mrb[27].mxu0 }
 0x12a   :  { %v1636_v33 = vadd.f32 %v1635_v32, %v1634_v29  ;;  %v1699_v34 = vpop.f32.mrb[27].mxu1 }
 0x12b   :  { %v2322_v35 = vadd.f32 %v1697_v30, %v1633_v26  ;;  %v1700_v36 = vadd.f32 %v1699_v34, %v1698_v31 }
 0x12d   :  { %v2324_v37 = vadd.f32 %v1700_v36, %v1636_v33 }
 0x12e   :  { %v1637_v38 = vpop.f32.mrb[28].mxu0 }
 0x12f   :  { %v1701_v40 = vpop.f32.mrb[28].mxu1  ;;  %v1638_v42 = vpop.f32.mrb[29].mxu0 }
 0x130   :  { %v1639_v43 = vadd.f32 %v1638_v42, %v1637_v38  ;;  %v1702_v44 = vpop.f32.mrb[29].mxu1  ;;  %v1640_v45 = vpop.f32.mrb[30].mxu0 }
 0x131   :  { %v1703_v46 = vadd.f32 %v1702_v44, %v1701_v40  ;;  %v1704_v47 = vpop.f32.mrb[30].mxu1  ;;  %v1641_v48 = vpop.f32.mrb[31].mxu0 }
 0x132   :  { %v1642_v49 = vadd.f32 %v1641_v48, %v1640_v45  ;;  %v1705_v50 = vpop.f32.mrb[31].mxu1 }
 0x133   :  { %v2326_v51 = vadd.f32 %v1703_v46, %v1639_v43  ;;  %v1706_v52 = vadd.f32 %v1705_v50, %v1704_v47 }
 0x135   :  { %v2328_v54 = vadd.f32 %v1706_v52, %v1642_v49 }
 0x136   :  { %v1723_v56 = vpop.f32.mrb[32].mxu0 }
 0x137   :  { %v1787_v57 = vpop.f32.mrb[32].mxu1  ;;  %v1724_v58 = vpop.f32.mrb[33].mxu0 }
 0x138   :  { %v1725_v59 = vadd.f32 %v1724_v58, %v1723_v56  ;;  %v1788_v60 = vpop.f32.mrb[33].mxu1  ;;  %v1726_v61 = vpop.f32.mrb[34].mxu0 }
 0x139   :  { %v1789_v62 = vadd.f32 %v1788_v60, %v1787_v57  ;;  %v1790_v63 = vpop.f32.mrb[34].mxu1  ;;  %v1727_v0 = vpop.f32.mrb[35].mxu0 }
 0x13a   :  { %v1173_v1 = vadd.f32 %v1725_v59, %v2298_v11  ;;  %v1728_v2 = vadd.f32 %v1727_v0, %v1726_v61  ;;  %v1791_v4 = vpop.f32.mrb[35].mxu1 }
 0x13b   :  { %v1792_v6 = vadd.f32 %v1791_v4, %v1790_v63 }
 0x13c   :  { %v1270_v7 = vadd.f32 %v1789_v62, %v1173_v1  ;;  %v1176_v8 = vadd.f32 %v1728_v2, %v2300_v13 }
 0x13e   :  { %vm1383_vm0 = vcmp.ge.f32.partialorder %v1270_v7, 0.0  ;;  %v1399_v9 = vmul.f32 0.2, %v1270_v7  ;;  %v1273_v10 = vadd.f32 %v1792_v6, %v1176_v8  ;;  %v1729_v12 = vpop.f32.mrb[36].mxu0 }
 0x13f   :  { %v1793_v14 = vpop.f32.mrb[36].mxu1  ;;  %v1730_v15 = vpop.f32.mrb[37].mxu0 }
 0x140   :  { %v1415_v16 = vsel %vm1383_vm0, %v1270_v7, %v1399_v9  ;;  %vm1384_vm1 = vcmp.ge.f32.partialorder %v1273_v10, 0.0  ;;  %v1400_v17 = vmul.f32 0.2, %v1273_v10  ;;  %v1731_v18 = vadd.f32 %v1730_v15, %v1729_v12  ;;  %v1794_v20 = vpop.f32.mrb[37].mxu1  ;;  %v1732_v22 = vpop.f32.mrb[38].mxu0 }
 0x141   :  { %1431 = vst [vmem:[%s2396_s2] sm:$0xff] %v1415_v16  ;;  %v1795_v11 = vadd.f32 %v1794_v20, %v1793_v14  ;;  %v1796_v23 = vpop.f32.mrb[38].mxu1  ;;  %v1733_v24 = vpop.f32.mrb[39].mxu0 }
 0x142   :  { %v1416_v13 = vsel %vm1384_vm1, %v1273_v10, %v1400_v17  ;;  %v1181_v26 = vadd.f32 %v1731_v18, %v2302_v25  ;;  %v1734_v28 = vadd.f32 %v1733_v24, %v1732_v22  ;;  %v1797_v29 = vpop.f32.mrb[39].mxu1 }
 0x143   :  { %1432 = vst [vmem:[%s2396_s2 + $0x8] sm:$0xff] %v1416_v13  ;;  %v1798_v30 = vadd.f32 %v1797_v29, %v1796_v23 }
 0x144   :  { %v1278_v31 = vadd.f32 %v1795_v11, %v1181_v26  ;;  %v1184_v32 = vadd.f32 %v1734_v28, %v2304_v27 }
 0x146   :  { %vm1385_vm2 = vcmp.ge.f32.partialorder %v1278_v31, 0.0  ;;  %v1401_v33 = vmul.f32 0.2, %v1278_v31  ;;  %v1281_v34 = vadd.f32 %v1798_v30, %v1184_v32  ;;  %v1735_v36 = vpop.f32.mrb[40].mxu0 }
 0x147   :  { %v1799_v38 = vpop.f32.mrb[40].mxu1  ;;  %v1736_v40 = vpop.f32.mrb[41].mxu0 }
 0x148   :  { %v1417_v42 = vsel %vm1385_vm2, %v1278_v31, %v1401_v33  ;;  %vm1386_vm3 = vcmp.ge.f32.partialorder %v1281_v34, 0.0  ;;  %v1402_v43 = vmul.f32 0.2, %v1281_v34  ;;  %v1737_v25 = vadd.f32 %v1736_v40, %v1735_v36  ;;  %v1800_v44 = vpop.f32.mrb[41].mxu1  ;;  %v1738_v45 = vpop.f32.mrb[42].mxu0 }
 0x149   :  { %1433 = vst [vmem:[%s2396_s2 + $0x10] sm:$0xff] %v1417_v42  ;;  %v1801_v46 = vadd.f32 %v1800_v44, %v1799_v38  ;;  %v1802_v47 = vpop.f32.mrb[42].mxu1  ;;  %v1739_v48 = vpop.f32.mrb[43].mxu0 }
 0x14a   :  { %v1418_v27 = vsel %vm1386_vm3, %v1281_v34, %v1402_v43  ;;  %v1189_v49 = vadd.f32 %v1737_v25, %v2306_v39  ;;  %v1740_v50 = vadd.f32 %v1739_v48, %v1738_v45  ;;  %v1803_v52 = vpop.f32.mrb[43].mxu1 }
 0x14b   :  { %1434 = vst [vmem:[%s2396_s2 + $0x18] sm:$0xff] %v1418_v27  ;;  %v1804_v56 = vadd.f32 %v1803_v52, %v1802_v47 }
 0x14c   :  { %v1286_v57 = vadd.f32 %v1801_v46, %v1189_v49  ;;  %v1192_v58 = vadd.f32 %v1740_v50, %v2308_v41 }
 0x14e   :  { %vm1387_vm4 = vcmp.ge.f32.partialorder %v1286_v57, 0.0  ;;  %v1403_v59 = vmul.f32 0.2, %v1286_v57  ;;  %v1289_v60 = vadd.f32 %v1804_v56, %v1192_v58  ;;  %v1741_v61 = vpop.f32.mrb[44].mxu0 }
 0x14f   :  { %v1805_v62 = vpop.f32.mrb[44].mxu1  ;;  %v1742_v63 = vpop.f32.mrb[45].mxu0 }
 0x150   :  { %v1419_v0 = vsel %vm1387_vm4, %v1286_v57, %v1403_v59  ;;  %vm1388_vm5 = vcmp.ge.f32.partialorder %v1289_v60, 0.0  ;;  %v1404_v1 = vmul.f32 0.2, %v1289_v60  ;;  %v1743_v39 = vadd.f32 %v1742_v63, %v1741_v61  ;;  %v1806_v2 = vpop.f32.mrb[45].mxu1  ;;  %v1744_v4 = vpop.f32.mrb[46].mxu0 }
 0x151   :  { %1435 = vst [vmem:[%s2396_s2 + $0x20] sm:$0xff] %v1419_v0  ;;  %v1807_v6 = vadd.f32 %v1806_v2, %v1805_v62  ;;  %v1808_v7 = vpop.f32.mrb[46].mxu1  ;;  %v1745_v8 = vpop.f32.mrb[47].mxu0 }
 0x152   :  { %v1420_v41 = vsel %vm1388_vm5, %v1289_v60, %v1404_v1  ;;  %v1197_v9 = vadd.f32 %v1743_v39, %v2310_v53  ;;  %v1746_v10 = vadd.f32 %v1745_v8, %v1744_v4  ;;  %v1809_v12 = vpop.f32.mrb[47].mxu1 }
 0x153   :  { %1436 = vst [vmem:[%s2396_s2 + $0x28] sm:$0xff] %v1420_v41  ;;  %v1810_v14 = vadd.f32 %v1809_v12, %v1808_v7 }
 0x154   :  { %v1294_v15 = vadd.f32 %v1807_v6, %v1197_v9  ;;  %v1200_v16 = vadd.f32 %v1746_v10, %v2312_v55 }
 0x156   :  { %vm1389_vm6 = vcmp.ge.f32.partialorder %v1294_v15, 0.0  ;;  %v1405_v17 = vmul.f32 0.2, %v1294_v15  ;;  %v1297_v18 = vadd.f32 %v1810_v14, %v1200_v16  ;;  %v1747_v20 = vpop.f32.mrb[48].mxu0 }
 0x157   :  { %v1811_v22 = vpop.f32.mrb[48].mxu1  ;;  %v1748_v11 = vpop.f32.mrb[49].mxu0 }
 0x158   :  { %v1421_v23 = vsel %vm1389_vm6, %v1294_v15, %v1405_v17  ;;  %vm1390_vm7 = vcmp.ge.f32.partialorder %v1297_v18, 0.0  ;;  %v1406_v24 = vmul.f32 0.2, %v1297_v18  ;;  %v1749_v53 = vadd.f32 %v1748_v11, %v1747_v20  ;;  %v1812_v13 = vpop.f32.mrb[49].mxu1  ;;  %v1750_v26 = vpop.f32.mrb[50].mxu0 }
 0x159   :  { %1437 = vst [vmem:[%s2396_s2 + $0x30] sm:$0xff] %v1421_v23  ;;  %v1813_v28 = vadd.f32 %v1812_v13, %v1811_v22  ;;  %v1814_v29 = vpop.f32.mrb[50].mxu1  ;;  %v1751_v30 = vpop.f32.mrb[51].mxu0 }
 0x15a   :  { %v1422_v55 = vsel %vm1390_vm7, %v1297_v18, %v1406_v24  ;;  %v1205_v31 = vadd.f32 %v1749_v53, %v2314_v3  ;;  %v1752_v32 = vadd.f32 %v1751_v30, %v1750_v26  ;;  %v1815_v33 = vpop.f32.mrb[51].mxu1 }
 0x15b   :  { %1438 = vst [vmem:[%s2396_s2 + $0x38] sm:$0xff] %v1422_v55  ;;  %v1816_v34 = vadd.f32 %v1815_v33, %v1814_v29 }
 0x15c   :  { %v1302_v36 = vadd.f32 %v1813_v28, %v1205_v31  ;;  %v1208_v38 = vadd.f32 %v1752_v32, %v2316_v5 }
 0x15e   :  { %vm1391_vm8 = vcmp.ge.f32.partialorder %v1302_v36, 0.0  ;;  %v1407_v40 = vmul.f32 0.2, %v1302_v36  ;;  %v1305_v42 = vadd.f32 %v1816_v34, %v1208_v38  ;;  %v1753_v43 = vpop.f32.mrb[52].mxu0 }
 0x15f   :  { %v1817_v25 = vpop.f32.mrb[52].mxu1  ;;  %v1754_v44 = vpop.f32.mrb[53].mxu0 }
 0x160   :  { %v1423_v45 = vsel %vm1391_vm8, %v1302_v36, %v1407_v40  ;;  %vm1392_vm9 = vcmp.ge.f32.partialorder %v1305_v42, 0.0  ;;  %v1408_v46 = vmul.f32 0.2, %v1305_v42  ;;  %v1755_v3 = vadd.f32 %v1754_v44, %v1753_v43  ;;  %v1818_v47 = vpop.f32.mrb[53].mxu1  ;;  %v1756_v48 = vpop.f32.mrb[54].mxu0 }
 0x161   :  { %1439 = vst [vmem:[%s2396_s2 + $0x40] sm:$0xff] %v1423_v45  ;;  %v1819_v27 = vadd.f32 %v1818_v47, %v1817_v25  ;;  %v1820_v49 = vpop.f32.mrb[54].mxu1  ;;  %v1757_v50 = vpop.f32.mrb[55].mxu0 }
 0x162   :  { %v1424_v5 = vsel %vm1392_vm9, %v1305_v42, %v1408_v46  ;;  %v1213_v52 = vadd.f32 %v1755_v3, %v2318_v19  ;;  %v1758_v56 = vadd.f32 %v1757_v50, %v1756_v48  ;;  %v1821_v57 = vpop.f32.mrb[55].mxu1 }
 0x163   :  { %1440 = vst [vmem:[%s2396_s2 + $0x48] sm:$0xff] %v1424_v5  ;;  %v1822_v58 = vadd.f32 %v1821_v57, %v1820_v49 }
 0x164   :  { %v1310_v59 = vadd.f32 %v1819_v27, %v1213_v52  ;;  %v1216_v60 = vadd.f32 %v1758_v56, %v2320_v21 }
 0x166   :  { %vm1393_vm10 = vcmp.ge.f32.partialorder %v1310_v59, 0.0  ;;  %v1409_v61 = vmul.f32 0.2, %v1310_v59  ;;  %v1313_v62 = vadd.f32 %v1822_v58, %v1216_v60  ;;  %v1759_v63 = vpop.f32.mrb[56].mxu0 }
 0x167   :  { %v1823_v0 = vpop.f32.mrb[56].mxu1  ;;  %v1760_v1 = vpop.f32.mrb[57].mxu0 }
 0x168   :  { %v1425_v39 = vsel %vm1393_vm10, %v1310_v59, %v1409_v61  ;;  %vm1394_vm11 = vcmp.ge.f32.partialorder %v1313_v62, 0.0  ;;  %v1410_v2 = vmul.f32 0.2, %v1313_v62  ;;  %v1761_v19 = vadd.f32 %v1760_v1, %v1759_v63  ;;  %v1824_v4 = vpop.f32.mrb[57].mxu1  ;;  %v1762_v6 = vpop.f32.mrb[58].mxu0 }
 0x169   :  { %1441 = vst [vmem:[%s2396_s2 + $0x50] sm:$0xff] %v1425_v39  ;;  %v1825_v7 = vadd.f32 %v1824_v4, %v1823_v0  ;;  %v1826_v8 = vpop.f32.mrb[58].mxu1  ;;  %v1763_v41 = vpop.f32.mrb[59].mxu0 }
 0x16a   :  { %v1426_v21 = vsel %vm1394_vm11, %v1313_v62, %v1410_v2  ;;  %v1221_v9 = vadd.f32 %v1761_v19, %v2322_v35  ;;  %v1764_v10 = vadd.f32 %v1763_v41, %v1762_v6  ;;  %v1827_v12 = vpop.f32.mrb[59].mxu1 }
 0x16b   :  { %1442 = vst [vmem:[%s2396_s2 + $0x58] sm:$0xff] %v1426_v21  ;;  %v1828_v14 = vadd.f32 %v1827_v12, %v1826_v8 }
 0x16c   :  { %v1318_v15 = vadd.f32 %v1825_v7, %v1221_v9  ;;  %v1224_v16 = vadd.f32 %v1764_v10, %v2324_v37 }
 0x16e   :  { %vm1395_vm12 = vcmp.ge.f32.partialorder %v1318_v15, 0.0  ;;  %v1411_v17 = vmul.f32 0.2, %v1318_v15  ;;  %v1321_v18 = vadd.f32 %v1828_v14, %v1224_v16  ;;  %v1765_v20 = vpop.f32.mrb[60].mxu0 }
 0x16f   :  { %v1829_v22 = vpop.f32.mrb[60].mxu1  ;;  %v1766_v11 = vpop.f32.mrb[61].mxu0 }
 0x170   :  { %v1427_v23 = vsel %vm1395_vm12, %v1318_v15, %v1411_v17  ;;  %vm1396_vm13 = vcmp.ge.f32.partialorder %v1321_v18, 0.0  ;;  %v1412_v24 = vmul.f32 0.2, %v1321_v18  ;;  %v1767_v35 = vadd.f32 %v1766_v11, %v1765_v20  ;;  %v1830_v53 = vpop.f32.mrb[61].mxu1  ;;  %v1768_v13 = vpop.f32.mrb[62].mxu0 }
 0x171   :  { %1443 = vst [vmem:[%s2396_s2 + $0x60] sm:$0xff] %v1427_v23  ;;  %v1831_v26 = vadd.f32 %v1830_v53, %v1829_v22  ;;  %v1832_v28 = vpop.f32.mrb[62].mxu1  ;;  %v1769_v29 = vpop.f32.mrb[63].mxu0 }
 0x172   :  { %v1428_v37 = vsel %vm1396_vm13, %v1321_v18, %v1412_v24  ;;  %v1229_v30 = vadd.f32 %v1767_v35, %v2326_v51  ;;  %v1770_v55 = vadd.f32 %v1769_v29, %v1768_v13  ;;  %v1833_v31 = vpop.f32.mrb[63].mxu1 }
 0x173   :  { %1444 = vst [vmem:[%s2396_s2 + $0x68] sm:$0xff] %v1428_v37  ;;  %v1834_v32 = vadd.f32 %v1833_v31, %v1832_v28 }
 0x174   :  { %v1326_v33 = vadd.f32 %v1831_v26, %v1229_v30  ;;  %v1232_v34 = vadd.f32 %v1770_v55, %v2328_v54 }
 0x176   :  { %vm1397_vm14 = vcmp.ge.f32.partialorder %v1326_v33, 0.0  ;;  %v1413_v36 = vmul.f32 0.2, %v1326_v33  ;;  %v1329_v38 = vadd.f32 %v1834_v32, %v1232_v34 }
 0x178   :  { %v1429_v40 = vsel %vm1397_vm14, %v1326_v33, %v1413_v36  ;;  %vm1398_vm15 = vcmp.ge.f32.partialorder %v1329_v38, 0.0  ;;  %v1414_v42 = vmul.f32 0.2, %v1329_v38 }
 0x179   :  { %1445 = vst [vmem:[%s2396_s2 + $0x70] sm:$0xff] %v1429_v40 }
 0x17a   :  { %v1430_v51 = vsel %vm1398_vm15, %v1329_v38, %v1414_v42 }
 0x17b   :  { %1446 = vst [vmem:[%s2396_s2 + $0x78] sm:$0xff] %v1430_v51 }

// kernel: custom-call.2
= control target key start
LH: loop header
LB: loop body
LE: loop exit
PB: predicated region body
PF: predicated region fallthrough
CT: control target
= control target key end

     0   :  { %s6_s0 = inlined_call_operand.vmem [shape: f32[256], index: 0, kind: output, shape index: {}]  }

// kernel: d_net_forward.7
= control target key start
LH: loop header
LB: loop body
LE: loop exit
PB: predicated region body
PF: predicated region fallthrough
CT: control target
= control target key end

     0   :  { %s2018_s9 = smov 0   ;;  %s2020_s10 = smov 0   ;;  %s2291_s0 = inlined_call_operand.vmem [shape: bf16[32,2048], index: 0, kind: input, shape index: {}]   ;;  %s2292_s1 = inlined_call_operand.vmem [shape: bf16[2048,256], index: 1, kind: input, shape index: {}]   ;;  %s2293_s2 = inlined_call_operand.vmem [shape: f32[32,256], index: 2, kind: output, shape index: {}]  }
   0x1   :  { %s2022_s11 = smov 0   ;;  %s2024_s12 = smov 0  }
   0x2   :  { %s2026_s13 = smov 0  }
   0x3 LB: > { %s24_s14 = sadd.s32 1, %s1996_s12  ;;  %p47_p1 = scmp.ne.s32.totalorder %s1988_s10, %s1984_s9  ;;  %s2000_s13 = sphi %s2026_s13, %s12_s13   ;;  %s1996_s12 = sphi %s2024_s12, %s2297_s12   ;;  %s1992_s11 = sphi %s2022_s11, %s2296_s11   ;;  %s1988_s10 = sphi %s2020_s10, %s2295_s10   ;;  %s1984_s9 = sphi %s2018_s9, %s2294_s9  }
   0x4   : > { %p25_p0 = scmp.ge.s32.totalorder %s24_s14, 2  ;;  %p48_p2 = scmp.eq.s32.totalorder %s2000_s13, 0 }
   0x5   : > { %s40_s16 = sadd.s32 1, %s1988_s10  ;;  %p1544_p5 = scmp.ge.s32.totalorder %s2000_s13, 2 }
   0x6   : > { %s2299_s14 = smov (%p25_p0, %s24_s14), 0  ;;  %p49_p3 = por %p48_p2, %p47_p1 }
   0x7   : > { %s36_s15 = ssub.s32 %s1996_s12, %s2299_s14  ;;  %129 = sbr.rel (%p1544_p5) target bundleno = 26 (0x1a), region = 16 }
   0x8   : > { %p38_p4 = scmp.eq.s32.totalorder %s36_s15, 0 }
   0xa   : > { %s2053_s17 = scalar_select %p38_p4, %s1988_s10, %s40_s16  }
   0xe   : > { %132 = sbr.rel (!%p49_p3) target bundleno = 26 (0x1a), region = 20  ;;  %s134_s18 = sand.u32 (%p49_p3), 1, %s1988_s10  }
   0xf   : > { %s1703_s19 = sshll.u32 (%p49_p3), %s1996_s12, 5  ;;  %s1545_s20 = sshll.u32 (%p49_p3), %s134_s18, 7 }
  0x10   : > { %s2061_s23 = scalar_lea.vmem (%p49_p3), %s2291_s0, %s1703_s19  ;;  %s136_s24 = scalar_lea.vmem (%p49_p3), [#allocation3], %s1545_s20 }
  0x11   : > { %v155_v0 = vld [vmem:[%s2061_s23] sm:$0xff] (%p49_p3)  ;;  %v157_v1 = vld [vmem:[%s2061_s23 + $0x8] sm:$0xff] (%p49_p3)  ;;  %v159_v2 = vld [vmem:[%s2061_s23 + $0x10] sm:$0xff] (%p49_p3) }
  0x12   : > { %156 = vst [vmem:[%s136_s24] sm:$0xff] (%p49_p3), %v155_v0  ;;  %158 = vst [vmem:[%s136_s24 + $0x8] sm:$0xff] (%p49_p3), %v157_v1  ;;  %v161_v3 = vld [vmem:[%s2061_s23 + $0x18] sm:$0xff] (%p49_p3)  ;;  %v163_v4 = vld [vmem:[%s2061_s23 + $0x40] sm:$0xff] (%p49_p3) }
  0x13   : > { %160 = vst [vmem:[%s136_s24 + $0x10] sm:$0xff] (%p49_p3), %v159_v2  ;;  %v165_v5 = vld [vmem:[%s2061_s23 + $0x48] sm:$0xff] (%p49_p3)  ;;  %162 = vst [vmem:[%s136_s24 + $0x18] sm:$0xff] (%p49_p3), %v161_v3  ;;  %v167_v6 = vld [vmem:[%s2061_s23 + $0x50] sm:$0xff] (%p49_p3) }
  0x14   : > { %164 = vst [vmem:[%s136_s24 + $0x20] sm:$0xff] (%p49_p3), %v163_v4  ;;  %166 = vst [vmem:[%s136_s24 + $0x28] sm:$0xff] (%p49_p3), %v165_v5  ;;  %v169_v7 = vld [vmem:[%s2061_s23 + $0x58] sm:$0xff] (%p49_p3)  ;;  %v171_v8 = vld [vmem:[%s2061_s23 + $0x80] sm:$0xff] (%p49_p3) }
  0x15   : > { %168 = vst [vmem:[%s136_s24 + $0x30] sm:$0xff] %v167_v6  ;;  %170 = vst [vmem:[%s136_s24 + $0x38] sm:$0xff] %v169_v7  ;;  %v173_v9 = vld [vmem:[%s2061_s23 + $0x88] sm:$0xff]  ;;  %v175_v10 = vld [vmem:[%s2061_s23 + $0x90] sm:$0xff] }
  0x16   : > { %172 = vst [vmem:[%s136_s24 + $0x40] sm:$0xff] %v171_v8  ;;  %v177_v11 = vld [vmem:[%s2061_s23 + $0x98] sm:$0xff]  ;;  %174 = vst [vmem:[%s136_s24 + $0x48] sm:$0xff] %v173_v9  ;;  %v179_v12 = vld [vmem:[%s2061_s23 + $0xc0] sm:$0xff] }
  0x17   : > { %176 = vst [vmem:[%s136_s24 + $0x50] sm:$0xff] %v175_v10  ;;  %178 = vst [vmem:[%s136_s24 + $0x58] sm:$0xff] %v177_v11  ;;  %v181_v13 = vld [vmem:[%s2061_s23 + $0xc8] sm:$0xff]  ;;  %v183_v14 = vld [vmem:[%s2061_s23 + $0xd0] sm:$0xff] }
  0x18   : > { %180 = vst [vmem:[%s136_s24 + $0x60] sm:$0xff] %v179_v12  ;;  %182 = vst [vmem:[%s136_s24 + $0x68] sm:$0xff] %v181_v13  ;;  %v185_v15 = vld [vmem:[%s2061_s23 + $0xd8] sm:$0xff] }
  0x19   : > { %184 = vst [vmem:[%s136_s24 + $0x70] sm:$0xff] %v183_v14  ;;  %186 = vst [vmem:[%s136_s24 + $0x78] sm:$0xff] %v185_v15 }
  0x1a PF: > { %p1548_p6 = scmp.ge.s32.totalorder %s2000_s13, 1  ;;  %p206_p7 = scmp.lt.s32.totalorder %s2000_s13, 3 }
  0x1c   : > { %p207_p8 = pnand %p1548_p6, %p206_p7 }
  0x1d   : > { %s213_s25 = sand.u32 (!%p207_p8), 1, %s1984_s9   ;;  %s1550_s26 = sshll.u32 (!%p207_p8), %s1992_s11, 7 }
  0x1e   : > { %210 = sbr.rel (%p207_p8) target bundleno = 413 (0x19d), region = 47  ;;  %s1549_s27 = sshll.u32 (!%p207_p8), %s213_s25, 7 }
  0x1f   : > { %p253_p9 = scmp.lt.s32.totalorder (!%p207_p8), %s1550_s26, 255  ;;  %s2088_s4 = scalar_lea.vmem (!%p207_p8), [#allocation3], %s1549_s27 }
  0x20   : > { %p1553_p10 = scmp.ne.s32.totalorder (!%p207_p8), %s1992_s11, 0 }
  0x25   : > { %s2301_s26 = smov (!%p253_p9, %s1550_s26), 255  ;;  %278 = sbr.rel (%p1553_p10) target bundleno = 44 (0x2c), region = 55 }
  0x26   : > { %s1704_s28 = sshll.u32 %s2301_s26, 3  ;;  %v2002_v16 = vmov (!%p1553_p10), 0.0  }
  0x27   : > { %s2086_s3 = scalar_lea.vmem %s2292_s1, %s1704_s28  ;;  %279 = vst [vmem:[#allocation2] sm:$0xff] (!%p1553_p10), %v2002_v16  ;;  %280 = vst [vmem:[#allocation2 + $0x8] sm:$0xff] (!%p1553_p10), %v2002_v16 }
  0x28   : > { %281 = vst [vmem:[#allocation2 + $0x10] sm:$0xff] (!%p1553_p10), %v2002_v16  ;;  %282 = vst [vmem:[#allocation2 + $0x18] sm:$0xff] (!%p1553_p10), %v2002_v16 }
  0x29   : > { %283 = vst [vmem:[#allocation2 + $0x20] sm:$0xff] (!%p1553_p10), %v2002_v16  ;;  %284 = vst [vmem:[#allocation2 + $0x28] sm:$0xff] (!%p1553_p10), %v2002_v16 }
  0x2a   : > { %285 = vst [vmem:[#allocation2 + $0x30] sm:$0xff] (!%p1553_p10), %v2002_v16  ;;  %286 = vst [vmem:[#allocation2 + $0x38] sm:$0xff] (!%p1553_p10), %v2002_v16 }
  0x2c PF: > { %v1770_v17 = vld [vmem:[%s2086_s3 + $0x4] ss:$8 sps:$4 sm:$0xff]   ;;  %v1774_v19 = vld [vmem:[%s2086_s3] ss:$8 sps:$4 sm:$0xff]   ;;  %v1776_v21 = vld [vmem:[%s2086_s3 + $0x14] ss:$8 sps:$4 sm:$0xff]  }
  0x2d   : > { %v1772_v18 = vld [vmem:[%s2086_s3 + $0x204] ss:$8 sps:$4 sm:$0xff]   ;;  %1159 = vmatprep.subr.bf16.mxu1 %v1770_v17  ;;  %v1775_v20 = vld [vmem:[%s2086_s3 + $0x200] ss:$8 sps:$4 sm:$0xff]   ;;  %v1778_v22 = vld [vmem:[%s2086_s3 + $0x214] ss:$8 sps:$4 sm:$0xff]  }
  0x2e   : > { %1265 = vmatprep.subr.bf16.mxu0 %v1772_v18  ;;  %1160 = vmatpush1.bf16.msra.mxu1 %v1774_v19  ;;  %v1780_v23 = vld [vmem:[%s2086_s3 + $0x10] ss:$8 sps:$4 sm:$0xff]   ;;  %v1782_v25 = vld [vmem:[%s2086_s3 + $0x24] ss:$8 sps:$4 sm:$0xff]   ;;  %v1786_v27 = vld [vmem:[%s2086_s3 + $0x20] ss:$8 sps:$4 sm:$0xff]  }
  0x2f   : > { %1266 = vmatpush1.bf16.msra.mxu0 %v1775_v20  ;;  %1161 = vmatprep.subr.bf16.mxu1 %v1776_v21  ;;  %v1781_v24 = vld [vmem:[%s2086_s3 + $0x210] ss:$8 sps:$4 sm:$0xff]   ;;  %v1784_v26 = vld [vmem:[%s2086_s3 + $0x224] ss:$8 sps:$4 sm:$0xff]   ;;  %v1787_v28 = vld [vmem:[%s2086_s3 + $0x220] ss:$8 sps:$4 sm:$0xff]  }
  0x30   : > { %1267 = vmatprep.subr.bf16.mxu0 %v1778_v22  ;;  %v1788_v29 = vld [vmem:[%s2086_s3 + $0x34] ss:$8 sps:$4 sm:$0xff]   ;;  %v1792_v31 = vld [vmem:[%s2086_s3 + $0x30] ss:$8 sps:$4 sm:$0xff]   ;;  %v1794_v33 = vld [vmem:[%s2086_s3 + $0x44] ss:$8 sps:$4 sm:$0xff]  }
  0x31   : > { %v1790_v30 = vld [vmem:[%s2086_s3 + $0x234] ss:$8 sps:$4 sm:$0xff]   ;;  %v1793_v32 = vld [vmem:[%s2086_s3 + $0x230] ss:$8 sps:$4 sm:$0xff]   ;;  %v1796_v34 = vld [vmem:[%s2086_s3 + $0x244] ss:$8 sps:$4 sm:$0xff]  }
  0x32   : > { %1162 = vmatpush1.bf16.msra.mxu1 %v1780_v23  ;;  %v1798_v35 = vld [vmem:[%s2086_s3 + $0x40] ss:$8 sps:$4 sm:$0xff]   ;;  %v1800_v37 = vld [vmem:[%s2086_s3 + $0x54] ss:$8 sps:$4 sm:$0xff]   ;;  %v1804_v39 = vld [vmem:[%s2086_s3 + $0x50] ss:$8 sps:$4 sm:$0xff]  }
  0x33   : > { %1268 = vmatpush1.bf16.msra.mxu0 %v1781_v24  ;;  %1163 = vmatprep.subr.bf16.mxu1 %v1782_v25  ;;  %v1799_v36 = vld [vmem:[%s2086_s3 + $0x240] ss:$8 sps:$4 sm:$0xff]   ;;  %v1802_v38 = vld [vmem:[%s2086_s3 + $0x254] ss:$8 sps:$4 sm:$0xff]   ;;  %v1805_v40 = vld [vmem:[%s2086_s3 + $0x250] ss:$8 sps:$4 sm:$0xff]  }
  0x34   : > { %1269 = vmatprep.subr.bf16.mxu0 %v1784_v26  ;;  %v1806_v41 = vld [vmem:[%s2086_s3 + $0x64] ss:$8 sps:$4 sm:$0xff]   ;;  %v1810_v43 = vld [vmem:[%s2086_s3 + $0x60] ss:$8 sps:$4 sm:$0xff]   ;;  %v1812_v45 = vld [vmem:[%s2086_s3 + $0x74] ss:$8 sps:$4 sm:$0xff]  }
  0x35   : > { %v1808_v42 = vld [vmem:[%s2086_s3 + $0x264] ss:$8 sps:$4 sm:$0xff]   ;;  %v1811_v44 = vld [vmem:[%s2086_s3 + $0x260] ss:$8 sps:$4 sm:$0xff]   ;;  %v1814_v46 = vld [vmem:[%s2086_s3 + $0x274] ss:$8 sps:$4 sm:$0xff]  }
  0x36   : > { %1164 = vmatpush1.bf16.msra.mxu1 %v1786_v27  ;;  %v1816_v47 = vld [vmem:[%s2086_s3 + $0x70] ss:$8 sps:$4 sm:$0xff]   ;;  %v1818_v49 = vld [vmem:[%s2086_s3 + $0x84] ss:$8 sps:$4 sm:$0xff]   ;;  %v1822_v51 = vld [vmem:[%s2086_s3 + $0x80] ss:$8 sps:$4 sm:$0xff]  }
  0x37   : > { %1270 = vmatpush1.bf16.msra.mxu0 %v1787_v28  ;;  %1165 = vmatprep.subr.bf16.mxu1 %v1788_v29  ;;  %v1817_v48 = vld [vmem:[%s2086_s3 + $0x270] ss:$8 sps:$4 sm:$0xff]   ;;  %v1820_v50 = vld [vmem:[%s2086_s3 + $0x284] ss:$8 sps:$4 sm:$0xff]   ;;  %v1823_v52 = vld [vmem:[%s2086_s3 + $0x280] ss:$8 sps:$4 sm:$0xff]  }
  0x38   : > { %1271 = vmatprep.subr.bf16.mxu0 %v1790_v30  ;;  %v1824_v53 = vld [vmem:[%s2086_s3 + $0x94] ss:$8 sps:$4 sm:$0xff]   ;;  %v1828_v55 = vld [vmem:[%s2086_s3 + $0x90] ss:$8 sps:$4 sm:$0xff]   ;;  %v1830_v57 = vld [vmem:[%s2086_s3 + $0xa4] ss:$8 sps:$4 sm:$0xff]  }
  0x39   : > { %v1826_v54 = vld [vmem:[%s2086_s3 + $0x294] ss:$8 sps:$4 sm:$0xff]   ;;  %v1829_v56 = vld [vmem:[%s2086_s3 + $0x290] ss:$8 sps:$4 sm:$0xff]   ;;  %v1832_v58 = vld [vmem:[%s2086_s3 + $0x2a4] ss:$8 sps:$4 sm:$0xff]  }
  0x3a   : > { %1166 = vmatpush1.bf16.msra.mxu1 %v1792_v31  ;;  %v1834_v59 = vld [vmem:[%s2086_s3 + $0xa0] ss:$8 sps:$4 sm:$0xff]   ;;  %v1836_v61 = vld [vmem:[%s2086_s3 + $0xb4] ss:$8 sps:$4 sm:$0xff]   ;;  %v1840_v63 = vld [vmem:[%s2086_s3 + $0xb0] ss:$8 sps:$4 sm:$0xff]  }
  0x3b   : > { %1272 = vmatpush1.bf16.msra.mxu0 %v1793_v32  ;;  %1167 = vmatprep.subr.bf16.mxu1 %v1794_v33  ;;  %v1835_v60 = vld [vmem:[%s2086_s3 + $0x2a0] ss:$8 sps:$4 sm:$0xff]   ;;  %v1838_v62 = vld [vmem:[%s2086_s3 + $0x2b4] ss:$8 sps:$4 sm:$0xff]   ;;  %v1841_v0 = vld [vmem:[%s2086_s3 + $0x2b0] ss:$8 sps:$4 sm:$0xff]  }
  0x3c   : > { %1273 = vmatprep.subr.bf16.mxu0 %v1796_v34  ;;  %v295_v1 = vld [vmem:[%s2088_s4] sm:$0xff]  ;;  %v297_v6 = vld [vmem:[%s2088_s4 + $0x10] sm:$0xff]  ;;  %p1698_p11 = scmp.ne.s32.totalorder %s1992_s11, 1 }
  0x3d   : > { %v299_v2 = vld [vmem:[%s2088_s4 + $0x20] sm:$0xff]  ;;  %v301_v7 = vld [vmem:[%s2088_s4 + $0x30] sm:$0xff] }
  0x3e   : > { %1168 = vmatpush1.bf16.msra.mxu1 %v1798_v35  ;;  %v1842_v3 = vld [vmem:[%s2086_s3 + $0xc4] ss:$8 sps:$4 sm:$0xff]   ;;  %v1555_v5 = vcombine.high %v295_v1, %v299_v2  ;;  %v1559_v8 = vcombine.high %v297_v6, %v301_v7  ;;  %v1846_v9 = vld [vmem:[%s2086_s3 + $0xc0] ss:$8 sps:$4 sm:$0xff]   ;;  %v1848_v11 = vld [vmem:[%s2086_s3 + $0xd4] ss:$8 sps:$4 sm:$0xff]   ;;  %v1554_v25 = vcombine.low %v295_v1, %v299_v2  ;;  %v1558_v27 = vcombine.low %v297_v6, %v301_v7 }
  0x3f   : > { %1274 = vmatpush1.bf16.msra.mxu0 %v1799_v36  ;;  %1169 = vmatprep.subr.bf16.mxu1 %v1800_v37  ;;  %v1844_v4 = vld [vmem:[%s2086_s3 + $0x2c4] ss:$8 sps:$4 sm:$0xff]   ;;  %v1847_v10 = vld [vmem:[%s2086_s3 + $0x2c0] ss:$8 sps:$4 sm:$0xff]   ;;  %v1850_v12 = vld [vmem:[%s2086_s3 + $0x2d4] ss:$8 sps:$4 sm:$0xff]  }
  0x40   : > { %1275 = vmatprep.subr.bf16.mxu0 %v1802_v38  ;;  %1191 = vmatprep.mubr.bf16.mxu1 %v1555_v5  ;;  %v1852_v13 = vld [vmem:[%s2086_s3 + $0xd0] ss:$8 sps:$4 sm:$0xff]   ;;  %v1854_v15 = vld [vmem:[%s2086_s3 + $0xe4] ss:$8 sps:$4 sm:$0xff]   ;;  %v1858_v17 = vld [vmem:[%s2086_s3 + $0xe0] ss:$8 sps:$4 sm:$0xff]  }
  0x41   : > { %1297 = vmatprep.mubr.bf16.mxu0 %v1559_v8  ;;  %v1853_v14 = vld [vmem:[%s2086_s3 + $0x2d0] ss:$8 sps:$4 sm:$0xff]   ;;  %v1856_v16 = vld [vmem:[%s2086_s3 + $0x2e4] ss:$8 sps:$4 sm:$0xff]   ;;  %v1859_v18 = vld [vmem:[%s2086_s3 + $0x2e0] ss:$8 sps:$4 sm:$0xff]  }
  0x42   : > { %1170 = vmatpush1.bf16.msra.mxu1 %v1804_v39  ;;  %v1860_v19 = vld [vmem:[%s2086_s3 + $0xf4] ss:$8 sps:$4 sm:$0xff]   ;;  %v1864_v21 = vld [vmem:[%s2086_s3 + $0xf0] ss:$8 sps:$4 sm:$0xff]   ;;  %v1868_v23 = vld [vmem:[%s2086_s3 + $0x104] ss:$8 sps:$4 sm:$0xff]  }
  0x43   : > { %1276 = vmatpush1.bf16.msra.mxu0 %v1805_v40  ;;  %1171 = vmatprep.subr.bf16.mxu1 %v1806_v41  ;;  %v1862_v20 = vld [vmem:[%s2086_s3 + $0x2f4] ss:$8 sps:$4 sm:$0xff]   ;;  %v1865_v22 = vld [vmem:[%s2086_s3 + $0x2f0] ss:$8 sps:$4 sm:$0xff]   ;;  %v1871_v24 = vld [vmem:[%s2086_s3 + $0x304] ss:$8 sps:$4 sm:$0xff]  }
  0x44   : > { %1277 = vmatprep.subr.bf16.mxu0 %v1808_v42  ;;  %v1866_v26 = vld [vmem:[%s2086_s3 + $0x100] ss:$8 sps:$4 sm:$0xff]   ;;  %v1874_v29 = vld [vmem:[%s2086_s3 + $0x114] ss:$8 sps:$4 sm:$0xff]   ;;  %v1872_v31 = vld [vmem:[%s2086_s3 + $0x110] ss:$8 sps:$4 sm:$0xff]  }
  0x45   : > { %v1869_v28 = vld [vmem:[%s2086_s3 + $0x300] ss:$8 sps:$4 sm:$0xff]   ;;  %v1877_v30 = vld [vmem:[%s2086_s3 + $0x314] ss:$8 sps:$4 sm:$0xff]   ;;  %v1875_v32 = vld [vmem:[%s2086_s3 + $0x310] ss:$8 sps:$4 sm:$0xff]  }
  0x46   : > { %1172 = vmatpush1.bf16.msra.mxu1 %v1810_v43  ;;  %v1880_v33 = vld [vmem:[%s2086_s3 + $0x124] ss:$8 sps:$4 sm:$0xff]   ;;  %v1878_v35 = vld [vmem:[%s2086_s3 + $0x120] ss:$8 sps:$4 sm:$0xff]   ;;  %v1886_v37 = vld [vmem:[%s2086_s3 + $0x134] ss:$8 sps:$4 sm:$0xff]  }
  0x47   : > { %1278 = vmatpush1.bf16.msra.mxu0 %v1811_v44  ;;  %1173 = vmatprep.subr.bf16.mxu1 %v1812_v45  ;;  %v1883_v34 = vld [vmem:[%s2086_s3 + $0x324] ss:$8 sps:$4 sm:$0xff]   ;;  %v1881_v36 = vld [vmem:[%s2086_s3 + $0x320] ss:$8 sps:$4 sm:$0xff]   ;;  %v1889_v38 = vld [vmem:[%s2086_s3 + $0x334] ss:$8 sps:$4 sm:$0xff]  }
  0x48   : > { %1279 = vmatprep.subr.bf16.mxu0 %v1814_v46  ;;  %v1884_v39 = vld [vmem:[%s2086_s3 + $0x130] ss:$8 sps:$4 sm:$0xff]   ;;  %v1892_v41 = vld [vmem:[%s2086_s3 + $0x144] ss:$8 sps:$4 sm:$0xff]   ;;  %v1890_v43 = vld [vmem:[%s2086_s3 + $0x140] ss:$8 sps:$4 sm:$0xff]  }
  0x49   : > { %v1887_v40 = vld [vmem:[%s2086_s3 + $0x330] ss:$8 sps:$4 sm:$0xff]   ;;  %v1895_v42 = vld [vmem:[%s2086_s3 + $0x344] ss:$8 sps:$4 sm:$0xff]   ;;  %v1893_v44 = vld [vmem:[%s2086_s3 + $0x340] ss:$8 sps:$4 sm:$0xff]  }
  0x4a   : > { %1174 = vmatpush1.bf16.msra.mxu1 %v1816_v47  ;;  %v1898_v45 = vld [vmem:[%s2086_s3 + $0x154] ss:$8 sps:$4 sm:$0xff]   ;;  %v303_v47 = vld [vmem:[%s2088_s4 + $0x40] sm:$0xff]  ;;  %v1908_v5 = vld [vmem:[%s2086_s3 + $0x170] ss:$8 sps:$4 sm:$0xff]  }
  0x4b   : > { %1280 = vmatpush1.bf16.msra.mxu0 %v1817_v48  ;;  %1175 = vmatprep.subr.bf16.mxu1 %v1818_v49  ;;  %v1901_v46 = vld [vmem:[%s2086_s3 + $0x354] ss:$8 sps:$4 sm:$0xff]   ;;  %v307_v48 = vld [vmem:[%s2088_s4 + $0x60] sm:$0xff]  ;;  %v1911_v6 = vld [vmem:[%s2086_s3 + $0x370] ss:$8 sps:$4 sm:$0xff]  }
  0x4c   : > { %1281 = vmatprep.subr.bf16.mxu0 %v1820_v50  ;;  %v1563_v49 = vcombine.high %v303_v47, %v307_v48  ;;  %v305_v50 = vld [vmem:[%s2088_s4 + $0x50] sm:$0xff]  ;;  %v1916_v7 = vld [vmem:[%s2086_s3 + $0x184] ss:$8 sps:$4 sm:$0xff]  }
  0x4d   : > { %v1913_v1 = vld [vmem:[%s2086_s3 + $0x374] ss:$8 sps:$4 sm:$0xff]   ;;  %v1919_v8 = vld [vmem:[%s2086_s3 + $0x384] ss:$8 sps:$4 sm:$0xff]  }
  0x4e   : > { %1176 = vmatpush1.bf16.msra.mxu1 %v1822_v51  ;;  %v309_v51 = vld [vmem:[%s2088_s4 + $0x70] sm:$0xff] }
  0x4f   : > { %1282 = vmatpush1.bf16.msra.mxu0 %v1823_v52  ;;  %1177 = vmatprep.subr.bf16.mxu1 %v1824_v53  ;;  %v1896_v52 = vld [vmem:[%s2086_s3 + $0x150] ss:$8 sps:$4 sm:$0xff]  }
  0x50   : > { %1283 = vmatprep.subr.bf16.mxu0 %v1826_v54  ;;  %v1899_v53 = vld [vmem:[%s2086_s3 + $0x350] ss:$8 sps:$4 sm:$0xff]   ;;  %v1567_v54 = vcombine.high %v305_v50, %v309_v51 }
  0x52   : > { %1178 = vmatpush1.bf16.msra.mxu1 %v1828_v55  ;;  %v1562_v55 = vcombine.low %v303_v47, %v307_v48 }
  0x53   : > { %1284 = vmatpush1.bf16.msra.mxu0 %v1829_v56  ;;  %1179 = vmatprep.subr.bf16.mxu1 %v1830_v57  ;;  %v1566_v56 = vcombine.low %v305_v50, %v309_v51  ;;  %v1904_v57 = vld [vmem:[%s2086_s3 + $0x164] ss:$8 sps:$4 sm:$0xff]  }
  0x54   : > { %1285 = vmatprep.subr.bf16.mxu0 %v1832_v58  ;;  %v1907_v58 = vld [vmem:[%s2086_s3 + $0x364] ss:$8 sps:$4 sm:$0xff]  }
  0x55   : > { %v287_v50 = vld [vmem:[#allocation2] sm:$0xff] }
  0x56   : > { %1180 = vmatpush1.bf16.msra.mxu1 %v1834_v59  ;;  %v1902_v59 = vld [vmem:[%s2086_s3 + $0x160] ss:$8 sps:$4 sm:$0xff]  }
  0x57   : > { %1286 = vmatpush1.bf16.msra.mxu0 %v1835_v60  ;;  %1181 = vmatprep.subr.bf16.mxu1 %v1836_v61  ;;  %v1905_v60 = vld [vmem:[%s2086_s3 + $0x360] ss:$8 sps:$4 sm:$0xff]  }
  0x58   : > { %1287 = vmatprep.subr.bf16.mxu0 %v1838_v62  ;;  %v2192_v61 = vld [vmem:[%s2088_s4 + $0x8] sm:$0xff] }
  0x59   : > { %v2195_v62 = vld [vmem:[%s2088_s4 + $0x28] sm:$0xff] }
  0x5a   : > { %1182 = vmatpush1.bf16.msra.mxu1 %v1840_v63  ;;  %v2198_v63 = vld [vmem:[%s2088_s4 + $0x18] sm:$0xff]  ;;  %v1557_v2 = vcombine.high %v2192_v61, %v2195_v62 }
  0x5b   : > { %1288 = vmatpush1.bf16.msra.mxu0 %v1841_v0  ;;  %1183 = vmatprep.subr.bf16.mxu1 %v1842_v3  ;;  %v1910_v0 = vld [vmem:[%s2086_s3 + $0x174] ss:$8 sps:$4 sm:$0xff]  }
  0x5c   : > { %1289 = vmatprep.subr.bf16.mxu0 %v1844_v4  ;;  %v2205_v3 = vld [vmem:[%s2088_s4 + $0x38] sm:$0xff] }
  0x5d   : > { %v1561_v4 = vcombine.high %v2198_v63, %v2205_v3 }
  0x5e   : > { %1184 = vmatpush1.bf16.msra.mxu1 %v1846_v9  ;;  %v1914_v9 = vld [vmem:[%s2086_s3 + $0x180] ss:$8 sps:$4 sm:$0xff]  }
  0x5f   : > { %1290 = vmatpush1.bf16.msra.mxu0 %v1847_v10  ;;  %1185 = vmatprep.subr.bf16.mxu1 %v1848_v11  ;;  %v1917_v10 = vld [vmem:[%s2086_s3 + $0x380] ss:$8 sps:$4 sm:$0xff]   ;;  %v1922_v11 = vld [vmem:[%s2086_s3 + $0x194] ss:$8 sps:$4 sm:$0xff]  }
  0x60   : > { %1291 = vmatprep.subr.bf16.mxu0 %v1850_v12  ;;  %v1925_v12 = vld [vmem:[%s2086_s3 + $0x394] ss:$8 sps:$4 sm:$0xff]  }
  0x62   : > { %1186 = vmatpush1.bf16.msra.mxu1 %v1852_v13  ;;  %v1920_v13 = vld [vmem:[%s2086_s3 + $0x190] ss:$8 sps:$4 sm:$0xff]  }
  0x63   : > { %1292 = vmatpush1.bf16.msra.mxu0 %v1853_v14  ;;  %1187 = vmatprep.subr.bf16.mxu1 %v1854_v15  ;;  %v1923_v14 = vld [vmem:[%s2086_s3 + $0x390] ss:$8 sps:$4 sm:$0xff]   ;;  %v1928_v15 = vld [vmem:[%s2086_s3 + $0x1a4] ss:$8 sps:$4 sm:$0xff]  }
  0x64   : > { %1293 = vmatprep.subr.bf16.mxu0 %v1856_v16  ;;  %v1931_v16 = vld [vmem:[%s2086_s3 + $0x3a4] ss:$8 sps:$4 sm:$0xff]  }
  0x66   : > { %1188 = vmatpush1.bf16.msra.mxu1 %v1858_v17  ;;  %v1926_v17 = vld [vmem:[%s2086_s3 + $0x1a0] ss:$8 sps:$4 sm:$0xff]  }
  0x67   : > { %1294 = vmatpush1.bf16.msra.mxu0 %v1859_v18  ;;  %1189 = vmatprep.subr.bf16.mxu1 %v1860_v19  ;;  %v1929_v18 = vld [vmem:[%s2086_s3 + $0x3a0] ss:$8 sps:$4 sm:$0xff]   ;;  %v1934_v19 = vld [vmem:[%s2086_s3 + $0x1b4] ss:$8 sps:$4 sm:$0xff]  }
  0x68   : > { %1295 = vmatprep.subr.bf16.mxu0 %v1862_v20  ;;  %v1937_v20 = vld [vmem:[%s2086_s3 + $0x3b4] ss:$8 sps:$4 sm:$0xff]  }
  0x6a   : > { %1190 = vmatpush1.bf16.msra.mxu1 %v1864_v21  ;;  %v1932_v21 = vld [vmem:[%s2086_s3 + $0x1b0] ss:$8 sps:$4 sm:$0xff]  }
  0x6b   : > { %1296 = vmatpush1.bf16.msra.mxu0 %v1865_v22  ;;  %1212 = vmatprep.subr.bf16.mxu1 %v1868_v23  ;;  %v1935_v22 = vld [vmem:[%s2086_s3 + $0x3b0] ss:$8 sps:$4 sm:$0xff]   ;;  %v1940_v23 = vld [vmem:[%s2086_s3 + $0x1c4] ss:$8 sps:$4 sm:$0xff]  }
  0x6c   : > { %1318 = vmatprep.subr.bf16.mxu0 %v1871_v24  ;;  %v1943_v24 = vld [vmem:[%s2086_s3 + $0x3c4] ss:$8 sps:$4 sm:$0xff]  }
  0x6d   : > { %1192 = vmatmul.mubr.bf16.vlgmr.msra.gmra.mrb[0].mxu1 %v1554_v25  ;;  %v1938_v25 = vld [vmem:[%s2086_s3 + $0x1c0] ss:$8 sps:$4 sm:$0xff]  }
  0x6e   : > { %1298 = vmatmul.mubr.bf16.vlgmr.msra.gmra.mrb[0].mxu0 %v1558_v27  ;;  %1213 = vmatpush1.bf16.msra.mxu1 %v1866_v26  ;;  %v1941_v26 = vld [vmem:[%s2086_s3 + $0x3c0] ss:$8 sps:$4 sm:$0xff]   ;;  %v1946_v27 = vld [vmem:[%s2086_s3 + $0x1d4] ss:$8 sps:$4 sm:$0xff]  }
  0x6f   : > { %1319 = vmatpush1.bf16.msra.mxu0 %v1869_v28  ;;  %1214 = vmatprep.subr.bf16.mxu1 %v1874_v29  ;;  %v1949_v28 = vld [vmem:[%s2086_s3 + $0x3d4] ss:$8 sps:$4 sm:$0xff]   ;;  %v1944_v29 = vld [vmem:[%s2086_s3 + $0x1d0] ss:$8 sps:$4 sm:$0xff]  }
  0x70   : > { %1320 = vmatprep.subr.bf16.mxu0 %v1877_v30  ;;  %1201 = vmatprep.mubr.bf16.mxu1 %v1563_v49  ;;  %v1947_v30 = vld [vmem:[%s2086_s3 + $0x3d0] ss:$8 sps:$4 sm:$0xff]  }
  0x71   : > { %1307 = vmatprep.mubr.bf16.mxu0 %v1567_v54  ;;  %v288_v54 = vld [vmem:[#allocation2 + $0x8] sm:$0xff] }
  0x72   : > { %1215 = vmatpush1.bf16.msra.mxu1 %v1872_v31  ;;  %v1952_v31 = vld [vmem:[%s2086_s3 + $0x1e4] ss:$8 sps:$4 sm:$0xff]  }
  0x73   : > { %1321 = vmatpush1.bf16.msra.mxu0 %v1875_v32  ;;  %1216 = vmatprep.subr.bf16.mxu1 %v1880_v33  ;;  %v1955_v32 = vld [vmem:[%s2086_s3 + $0x3e4] ss:$8 sps:$4 sm:$0xff]   ;;  %v1950_v33 = vld [vmem:[%s2086_s3 + $0x1e0] ss:$8 sps:$4 sm:$0xff]  }
  0x74   : > { %1322 = vmatprep.subr.bf16.mxu0 %v1883_v34  ;;  %v1953_v34 = vld [vmem:[%s2086_s3 + $0x3e0] ss:$8 sps:$4 sm:$0xff]  }
  0x75   : > { %1202 = vmatmul.mubr.bf16.gmra.mrb[4].mxu1 %v1562_v55 }
  0x76   : > { %1217 = vmatpush1.bf16.msra.mxu1 %v1878_v35  ;;  %1308 = vmatmul.mubr.bf16.gmra.mrb[4].mxu0 %v1566_v56  ;;  %v1958_v35 = vld [vmem:[%s2086_s3 + $0x1f4] ss:$8 sps:$4 sm:$0xff]  }
  0x77   : > { %1323 = vmatpush1.bf16.msra.mxu0 %v1881_v36  ;;  %1218 = vmatprep.subr.bf16.mxu1 %v1886_v37  ;;  %v1961_v36 = vld [vmem:[%s2086_s3 + $0x3f4] ss:$8 sps:$4 sm:$0xff]   ;;  %v1956_v37 = vld [vmem:[%s2086_s3 + $0x1f0] ss:$8 sps:$4 sm:$0xff]  }
  0x78   : > { %1324 = vmatprep.subr.bf16.mxu0 %v1889_v38  ;;  %1244 = vmatprep.mubr.bf16.mxu1 %v1557_v2  ;;  %v1959_v38 = vld [vmem:[%s2086_s3 + $0x3f0] ss:$8 sps:$4 sm:$0xff]  }
  0x79   : > { %1350 = vmatprep.mubr.bf16.mxu0 %v1561_v4 }
  0x7a   : > { %1219 = vmatpush1.bf16.msra.mxu1 %v1884_v39  ;;  %v304_v39 = vld [vmem:[%s2088_s4 + $0x48] sm:$0xff] }
  0x7b   : > { %1325 = vmatpush1.bf16.msra.mxu0 %v1887_v40  ;;  %1220 = vmatprep.subr.bf16.mxu1 %v1892_v41  ;;  %v308_v40 = vld [vmem:[%s2088_s4 + $0x68] sm:$0xff]  ;;  %v306_v41 = vld [vmem:[%s2088_s4 + $0x58] sm:$0xff] }
  0x7c   : > { %1326 = vmatprep.subr.bf16.mxu0 %v1895_v42  ;;  %v310_v42 = vld [vmem:[%s2088_s4 + $0x78] sm:$0xff]  ;;  %v1564_v47 = vcombine.low %v304_v39, %v308_v40 }
  0x7d   : > { %v1568_v48 = vcombine.low %v306_v41, %v310_v42 }
  0x7e   : > { %1221 = vmatpush1.bf16.msra.mxu1 %v1890_v43  ;;  %v1556_v43 = vcombine.low %v2192_v61, %v2195_v62 }
  0x7f   : > { %1327 = vmatpush1.bf16.msra.mxu0 %v1893_v44  ;;  %1222 = vmatprep.subr.bf16.mxu1 %v1898_v45  ;;  %v1560_v44 = vcombine.low %v2198_v63, %v2205_v3  ;;  %v1565_v45 = vcombine.high %v304_v39, %v308_v40  ;;  %v290_v63 = vld [vmem:[#allocation2 + $0x18] sm:$0xff] }
  0x80   : > { %1328 = vmatprep.subr.bf16.mxu0 %v1901_v46  ;;  %v1569_v46 = vcombine.high %v306_v41, %v310_v42 }
  0x82   : > { %1223 = vmatpush1.bf16.msra.mxu1 %v1896_v52 }
  0x83   : > { %1329 = vmatpush1.bf16.msra.mxu0 %v1899_v53  ;;  %1224 = vmatprep.subr.bf16.mxu1 %v1904_v57 }
  0x84   : > { %1330 = vmatprep.subr.bf16.mxu0 %v1907_v58  ;;  %v289_v58 = vld [vmem:[#allocation2 + $0x10] sm:$0xff] }
  0x86   : > { %1225 = vmatpush1.bf16.msra.mxu1 %v1902_v59 }
  0x87   : > { %1331 = vmatpush1.bf16.msra.mxu0 %v1905_v60  ;;  %1226 = vmatprep.subr.bf16.mxu1 %v1910_v0 }
  0x88   : > { %1332 = vmatprep.subr.bf16.mxu0 %v1913_v1 }
  0x8a   : > { %1227 = vmatpush1.bf16.msra.mxu1 %v1908_v5 }
  0x8b   : > { %1333 = vmatpush1.bf16.msra.mxu0 %v1911_v6  ;;  %1228 = vmatprep.subr.bf16.mxu1 %v1916_v7  ;;  %v291_v6 = vld [vmem:[#allocation2 + $0x20] sm:$0xff] }
  0x8c   : > { %1334 = vmatprep.subr.bf16.mxu0 %v1919_v8 }
  0x8e   : > { %1229 = vmatpush1.bf16.msra.mxu1 %v1914_v9 }
  0x8f   : > { %1335 = vmatpush1.bf16.msra.mxu0 %v1917_v10  ;;  %1230 = vmatprep.subr.bf16.mxu1 %v1922_v11  ;;  %v292_v10 = vld [vmem:[#allocation2 + $0x28] sm:$0xff] }
  0x90   : > { %1336 = vmatprep.subr.bf16.mxu0 %v1925_v12 }
  0x92   : > { %1231 = vmatpush1.bf16.msra.mxu1 %v1920_v13 }
  0x93   : > { %1337 = vmatpush1.bf16.msra.mxu0 %v1923_v14  ;;  %1232 = vmatprep.subr.bf16.mxu1 %v1928_v15  ;;  %v293_v14 = vld [vmem:[#allocation2 + $0x30] sm:$0xff] }
  0x94   : > { %1338 = vmatprep.subr.bf16.mxu0 %v1931_v16 }
  0x96   : > { %1233 = vmatpush1.bf16.msra.mxu1 %v1926_v17 }
  0x97   : > { %1339 = vmatpush1.bf16.msra.mxu0 %v1929_v18  ;;  %1234 = vmatprep.subr.bf16.mxu1 %v1934_v19  ;;  %v294_v19 = vld [vmem:[#allocation2 + $0x38] sm:$0xff] }
  0x98   : > { %1340 = vmatprep.subr.bf16.mxu0 %v1937_v20 }
  0x9a   : > { %1235 = vmatpush1.bf16.msra.mxu1 %v1932_v21 }
  0x9b   : > { %1341 = vmatpush1.bf16.msra.mxu0 %v1935_v22  ;;  %1236 = vmatprep.subr.bf16.mxu1 %v1940_v23 }
  0x9c   : > { %1342 = vmatprep.subr.bf16.mxu0 %v1943_v24 }
  0x9e   : > { %1237 = vmatpush1.bf16.msra.mxu1 %v1938_v25 }
  0x9f   : > { %1343 = vmatpush1.bf16.msra.mxu0 %v1941_v26  ;;  %1238 = vmatprep.subr.bf16.mxu1 %v1946_v27 }
  0xa0   : > { %1344 = vmatprep.subr.bf16.mxu0 %v1949_v28 }
  0xa2   : > { %1239 = vmatpush1.bf16.msra.mxu1 %v1944_v29 }
  0xa3   : > { %1345 = vmatpush1.bf16.msra.mxu0 %v1947_v30  ;;  %1240 = vmatprep.subr.bf16.mxu1 %v1952_v31 }
  0xa4   : > { %1346 = vmatprep.subr.bf16.mxu0 %v1955_v32 }
  0xa6   : > { %1241 = vmatpush1.bf16.msra.mxu1 %v1950_v33 }
  0xa7   : > { %1347 = vmatpush1.bf16.msra.mxu0 %v1953_v34  ;;  %1242 = vmatprep.subr.bf16.mxu1 %v1958_v35 }
  0xa8   : > { %1348 = vmatprep.subr.bf16.mxu0 %v1961_v36 }
  0xaa   : > { %1243 = vmatpush1.bf16.msra.mxu1 %v1956_v37 }
  0xab   : > { %1349 = vmatpush1.bf16.msra.mxu0 %v1959_v38 }
  0xad   : > { %1245 = vmatmul.mubr.bf16.vlgmr.msra.gmra.mrb[0].mxu1 %v1556_v43 }
  0xae   : > { %1351 = vmatmul.mubr.bf16.vlgmr.msra.gmra.mrb[0].mxu0 %v1560_v44  ;;  %1254 = vmatprep.mubr.bf16.mxu1 %v1565_v45 }
  0xaf   : > { %1360 = vmatprep.mubr.bf16.mxu0 %v1569_v46 }
  0xb5   : > { %1255 = vmatmul.mubr.bf16.gmra.mrb[4].mxu1 %v1564_v47 }
  0xb6   : > { %1361 = vmatmul.mubr.bf16.gmra.mrb[4].mxu0 %v1568_v48 }
 0x180   : > { %v1246_v49 = vpop.f32.mrb[0].mxu1 }
 0x181   : > { %v1352_v51 = vpop.f32.mrb[0].mxu0  ;;  %v1248_v53 = vpop.f32.mrb[1].mxu1 }
 0x182   : > { %v1705_v52 = vadd.f32 %v1352_v51, %v1246_v49  ;;  %v1354_v55 = vpop.f32.mrb[1].mxu0  ;;  %v1250_v57 = vpop.f32.mrb[2].mxu1 }
 0x183   : > { %v1706_v56 = vadd.f32 %v1354_v55, %v1248_v53  ;;  %v1356_v59 = vpop.f32.mrb[2].mxu0  ;;  %v1252_v62 = vpop.f32.mrb[3].mxu1 }
 0x184   : > { %v1371_v60 = vadd.f32 %v1705_v52, %v287_v50  ;;  %v1707_v61 = vadd.f32 %v1356_v59, %v1250_v57  ;;  %v1358_v0 = vpop.f32.mrb[3].mxu0 }
 0x185   : > { %v1372_v1 = vadd.f32 %v1706_v56, %v288_v54  ;;  %v1708_v2 = vadd.f32 %v1358_v0, %v1252_v62 }
 0x186   : > { %1379 = vst [vmem:[#allocation2] sm:$0xff] %v1371_v60  ;;  %v1373_v3 = vadd.f32 %v1707_v61, %v289_v58 }
 0x187   : > { %1380 = vst [vmem:[#allocation2 + $0x8] sm:$0xff] %v1372_v1  ;;  %v1374_v4 = vadd.f32 %v1708_v2, %v290_v63 }
 0x188   : > { %1381 = vst [vmem:[#allocation2 + $0x10] sm:$0xff] %v1373_v3  ;;  %v1256_v5 = vpop.f32.mrb[4].mxu1 }
 0x189   : > { %1382 = vst [vmem:[#allocation2 + $0x18] sm:$0xff] %v1374_v4  ;;  %v1362_v7 = vpop.f32.mrb[4].mxu0  ;;  %v1258_v9 = vpop.f32.mrb[5].mxu1 }
 0x18a   : > { %v1709_v8 = vadd.f32 %v1362_v7, %v1256_v5  ;;  %v1364_v11 = vpop.f32.mrb[5].mxu0  ;;  %v1260_v13 = vpop.f32.mrb[6].mxu1 }
 0x18b   : > { %v1710_v12 = vadd.f32 %v1364_v11, %v1258_v9  ;;  %v1366_v15 = vpop.f32.mrb[6].mxu0  ;;  %v1262_v18 = vpop.f32.mrb[7].mxu1  ;;  %1390 = sbr.rel (%p1698_p11) target bundleno = 413 (0x19d), region = 59 }
 0x18c   : > { %v1375_v16 = vadd.f32 %v1709_v8, %v291_v6  ;;  %v1711_v17 = vadd.f32 %v1366_v15, %v1260_v13  ;;  %v1368_v20 = vpop.f32.mrb[7].mxu0 }
 0x18d   : > { %v1376_v21 = vadd.f32 %v1710_v12, %v292_v10  ;;  %v1712_v22 = vadd.f32 %v1368_v20, %v1262_v18  ;;  %v1391_v25 = vld [vmem:[#allocation2] sm:$0xff] (!%p1698_p11) }
 0x18e   : > { %1383 = vst [vmem:[#allocation2 + $0x20] sm:$0xff] %v1375_v16  ;;  %v1377_v23 = vadd.f32 %v1711_v17, %v293_v14  ;;  %v1392_v26 = vld [vmem:[#allocation2 + $0x8] sm:$0xff] (!%p1698_p11)  ;;  %vm1399_vm0 = vcmp.ge.f32.partialorder (!%p1698_p11), %v1391_v25, 0.0  ;;  %v1407_v28 = vmul.f32 (!%p1698_p11), 0.2, %v1391_v25 }
 0x18f   : > { %1384 = vst [vmem:[#allocation2 + $0x28] sm:$0xff] %v1376_v21  ;;  %v1378_v24 = vadd.f32 %v1712_v22, %v294_v19  ;;  %v1393_v27 = vld [vmem:[#allocation2 + $0x10] sm:$0xff] (!%p1698_p11)  ;;  %vm1400_vm1 = vcmp.ge.f32.partialorder (!%p1698_p11), %v1392_v26, 0.0  ;;  %v1408_v29 = vmul.f32 (!%p1698_p11), 0.2, %v1392_v26 }
 0x190   : > { %1385 = vst [vmem:[#allocation2 + $0x30] sm:$0xff] %v1377_v23  ;;  %vm1401_vm2 = vcmp.ge.f32.partialorder (!%p1698_p11), %v1393_v27, 0.0  ;;  %v1409_v30 = vmul.f32 (!%p1698_p11), 0.2, %v1393_v27  ;;  %v1394_v31 = vld [vmem:[#allocation2 + $0x18] sm:$0xff] (!%p1698_p11)  ;;  %v1415_v34 = vsel (!%p1698_p11), %vm1399_vm0, %v1391_v25, %v1407_v28 }
 0x191   : > { %1386 = vst [vmem:[#allocation2 + $0x38] sm:$0xff] %v1378_v24  ;;  %v1416_v35 = vsel (!%p1698_p11), %vm1400_vm1, %v1392_v26, %v1408_v29  ;;  %vm1402_vm3 = vcmp.ge.f32.partialorder (!%p1698_p11), %v1394_v31, 0.0  ;;  %v1410_v36 = vmul.f32 (!%p1698_p11), 0.2, %v1394_v31  ;;  %1423 = vst [vmem:[%s2293_s2] sm:$0xff] (!%p1698_p11), %v1415_v34 }
 0x192   : > { %1424 = vst [vmem:[%s2293_s2 + $0x8] sm:$0xff] %v1416_v35  ;;  %v1417_v39 = vsel %vm1401_vm2, %v1393_v27, %v1409_v30 }
 0x193   : > { %1425 = vst [vmem:[%s2293_s2 + $0x10] sm:$0xff] %v1417_v39  ;;  %v1418_v41 = vsel %vm1402_vm3, %v1394_v31, %v1410_v36 }
 0x194   : > { %1426 = vst [vmem:[%s2293_s2 + $0x18] sm:$0xff] %v1418_v41 }
 0x195   : > { %v1395_v32 = vld [vmem:[#allocation2 + $0x20] sm:$0xff] }
 0x196   : > { %v1396_v33 = vld [vmem:[#allocation2 + $0x28] sm:$0xff]  ;;  %vm1403_vm4 = vcmp.ge.f32.partialorder %v1395_v32, 0.0  ;;  %v1411_v40 = vmul.f32 0.2, %v1395_v32 }
 0x197   : > { %v1397_v37 = vld [vmem:[#allocation2 + $0x30] sm:$0xff]  ;;  %vm1404_vm5 = vcmp.ge.f32.partialorder %v1396_v33, 0.0  ;;  %v1412_v42 = vmul.f32 0.2, %v1396_v33 }
 0x198   : > { %v1398_v38 = vld [vmem:[#allocation2 + $0x38] sm:$0xff]  ;;  %vm1405_vm6 = vcmp.ge.f32.partialorder %v1397_v37, 0.0  ;;  %v1413_v43 = vmul.f32 0.2, %v1397_v37  ;;  %v1419_v44 = vsel %vm1403_vm4, %v1395_v32, %v1411_v40 }
 0x199   : > { %vm1406_vm7 = vcmp.ge.f32.partialorder %v1398_v38, 0.0  ;;  %v1414_v45 = vmul.f32 0.2, %v1398_v38  ;;  %1427 = vst [vmem:[%s2293_s2 + $0x20] sm:$0xff] %v1419_v44  ;;  %v1420_v46 = vsel %vm1404_vm5, %v1396_v33, %v1412_v42 }
 0x19a   : > { %v1421_v47 = vsel %vm1405_vm6, %v1397_v37, %v1413_v43  ;;  %1428 = vst [vmem:[%s2293_s2 + $0x28] sm:$0xff] %v1420_v46 }
 0x19b   : > { %1429 = vst [vmem:[%s2293_s2 + $0x30] sm:$0xff] %v1421_v47  ;;  %v1422_v48 = vsel %vm1406_vm7, %v1398_v38, %v1414_v45 }
 0x19c   : > { %1430 = vst [vmem:[%s2293_s2 + $0x38] sm:$0xff] %v1422_v48 }
 0x19d PF: > { %s12_s13 = sadd.s32 1, %s2000_s13   ;;  %s2294_s9 = smov %s1988_s10 }
 0x19e   : > { %p9_p12 = scmp.ge.s32.totalorder %s12_s13, 4   ;;  %s2295_s10 = smov %s2053_s17 }
 0x19f   : > { %s2296_s11 = smov %s1996_s12  ;;  %s2297_s12 = smov %s2299_s14 }
 0x1a0   :  { %11 = sbr.rel (!%p9_p12) target bundleno = 3 (0x3), region = 97 }

// kernel: custom-call.3
= control target key start
LH: loop header
LB: loop body
LE: loop exit
PB: predicated region body
PF: predicated region fallthrough
CT: control target
= control target key end

     0   :  { %s6_s0 = inlined_call_operand.vmem [shape: f32[512], index: 0, kind: output, shape index: {}]  }

// kernel: d_net_forward.8
= control target key start
LH: loop header
LB: loop body
LE: loop exit
PB: predicated region body
PF: predicated region fallthrough
CT: control target
= control target key end

     0   :  { %s3322_s9 = smov 0   ;;  %s3324_s10 = smov 0   ;;  %s3721_s0 = inlined_call_operand.vmem [shape: bf16[24,4096], index: 0, kind: input, shape index: {}]   ;;  %s3722_s1 = inlined_call_operand.vmem [shape: bf16[4096,512], index: 1, kind: input, shape index: {}]   ;;  %s3723_s2 = inlined_call_operand.vmem [shape: f32[24,512], index: 2, kind: output, shape index: {}]  }
   0x1   :  { %s3326_s11 = smov 0   ;;  %s3328_s12 = smov 0  }
   0x2   :  { %s3330_s13 = smov 0  }
   0x3 LB: > { %s24_s14 = sadd.s32 1, %s3300_s12  ;;  %p47_p1 = scmp.ne.s32.totalorder %s3292_s10, %s3288_s9  ;;  %s3304_s13 = sphi %s3330_s13, %s12_s13   ;;  %s3300_s12 = sphi %s3328_s12, %s3727_s12   ;;  %s3296_s11 = sphi %s3326_s11, %s3726_s11   ;;  %s3292_s10 = sphi %s3324_s10, %s3725_s10   ;;  %s3288_s9 = sphi %s3322_s9, %s3724_s9  }
   0x4   : > { %p25_p0 = scmp.ge.s32.totalorder %s24_s14, 4  ;;  %p48_p2 = scmp.eq.s32.totalorder %s3304_s13, 0 }
   0x5   : > { %s40_s16 = sadd.s32 1, %s3292_s10  ;;  %p2520_p5 = scmp.ge.s32.totalorder %s3304_s13, 4 }
   0x6   : > { %s3729_s14 = smov (%p25_p0, %s24_s14), 0  ;;  %p49_p3 = por %p48_p2, %p47_p1 }
   0x7   : > { %s36_s15 = ssub.s32 %s3300_s12, %s3729_s14  ;;  %129 = sbr.rel (%p2520_p5) target bundleno = 25 (0x19), region = 16 }
   0x8   : > { %p38_p4 = scmp.eq.s32.totalorder %s36_s15, 0 }
   0xa   : > { %s3357_s17 = scalar_select %p38_p4, %s3292_s10, %s40_s16  }
   0xe   : > { %132 = sbr.rel (!%p49_p3) target bundleno = 25 (0x19), region = 20  ;;  %s134_s18 = sand.u32 (%p49_p3), 1, %s3292_s10  }
   0xf   : > { %s2805_s19 = sshll.u32 (%p49_p3), %s3300_s12, 5  ;;  %s2831_s20 = smul.u32 (%p49_p3), 96, %s134_s18 }
  0x10   : > { %s142_s23 = scalar_lea.vmem (%p49_p3), %s3721_s0, %s2805_s19 }
  0x11   : > { %v155_v0 = vld [vmem:[%s142_s23] sm:$0xff] (%p49_p3)  ;;  %v157_v1 = vld [vmem:[%s142_s23 + $0x8] sm:$0xff] (%p49_p3)  ;;  %v159_v2 = vld [vmem:[%s142_s23 + $0x10] sm:$0xff] (%p49_p3)  ;;  %s136_s24 = scalar_lea.vmem (%p49_p3), [#allocation3], %s2831_s20 }
  0x12   : > { %v161_v3 = vld [vmem:[%s142_s23 + $0x18] sm:$0xff] (%p49_p3)  ;;  %v163_v4 = vld [vmem:[%s142_s23 + $0x80] sm:$0xff] (%p49_p3)  ;;  %v165_v5 = vld [vmem:[%s142_s23 + $0x88] sm:$0xff] (%p49_p3)  ;;  %156 = vst [vmem:[%s136_s24] sm:$0xff] (%p49_p3), %v155_v0 }
  0x13   : > { %158 = vst [vmem:[%s136_s24 + $0x8] sm:$0xff] (%p49_p3), %v157_v1  ;;  %160 = vst [vmem:[%s136_s24 + $0x10] sm:$0xff] (%p49_p3), %v159_v2  ;;  %v167_v6 = vld [vmem:[%s142_s23 + $0x90] sm:$0xff] (%p49_p3)  ;;  %v169_v7 = vld [vmem:[%s142_s23 + $0x98] sm:$0xff] (%p49_p3) }
  0x14   : > { %162 = vst [vmem:[%s136_s24 + $0x18] sm:$0xff] (%p49_p3), %v161_v3  ;;  %164 = vst [vmem:[%s136_s24 + $0x20] sm:$0xff] (%p49_p3), %v163_v4  ;;  %v171_v8 = vld [vmem:[%s142_s23 + $0x100] sm:$0xff] (%p49_p3)  ;;  %v173_v9 = vld [vmem:[%s142_s23 + $0x108] sm:$0xff] (%p49_p3) }
  0x15   : > { %166 = vst [vmem:[%s136_s24 + $0x28] sm:$0xff] %v165_v5  ;;  %168 = vst [vmem:[%s136_s24 + $0x30] sm:$0xff] %v167_v6  ;;  %v175_v10 = vld [vmem:[%s142_s23 + $0x110] sm:$0xff]  ;;  %v177_v11 = vld [vmem:[%s142_s23 + $0x118] sm:$0xff] }
  0x16   : > { %170 = vst [vmem:[%s136_s24 + $0x38] sm:$0xff] %v169_v7  ;;  %172 = vst [vmem:[%s136_s24 + $0x40] sm:$0xff] %v171_v8 }
  0x17   : > { %174 = vst [vmem:[%s136_s24 + $0x48] sm:$0xff] %v173_v9  ;;  %176 = vst [vmem:[%s136_s24 + $0x50] sm:$0xff] %v175_v10 }
  0x18   : > { %178 = vst [vmem:[%s136_s24 + $0x58] sm:$0xff] %v177_v11 }
  0x19 PF: > { %p2523_p6 = scmp.ge.s32.totalorder %s3304_s13, 1  ;;  %p198_p7 = scmp.lt.s32.totalorder %s3304_s13, 5 }
  0x1b   : > { %p199_p8 = pnand %p2523_p6, %p198_p7 }
  0x1c   : > { %s205_s25 = sand.u32 (!%p199_p8), 1, %s3288_s9   ;;  %s2524_s26 = sshll.u32 (!%p199_p8), %s3296_s11, 7 }
  0x1d   : > { %202 = sbr.rel (%p199_p8) target bundleno = 539 (0x21b), region = 47  ;;  %p245_p9 = scmp.lt.s32.totalorder (!%p199_p8), %s2524_s26, 511 }
  0x1e   : > { %s2832_s27 = smul.u32 (!%p199_p8), 96, %s205_s25  ;;  %p2527_p10 = scmp.ne.s32.totalorder (!%p199_p8), %s3296_s11, 0 }
  0x20   : > { %s3374_s4 = scalar_lea.vmem (!%p199_p8), [#allocation3], %s2832_s27 }
  0x24   : > { %s3731_s26 = smov (!%p245_p9, %s2524_s26), 511  ;;  %270 = sbr.rel (%p2527_p10) target bundleno = 44 (0x2c), region = 55 }
  0x25   : > { %s2806_s28 = sshll.u32 %s3731_s26, 4  ;;  %v3306_v12 = vmov (!%p2527_p10), 0.0  }
  0x26   : > { %s3372_s3 = scalar_lea.vmem %s3722_s1, %s2806_s28  ;;  %271 = vst [vmem:[#allocation2] sm:$0xff] (!%p2527_p10), %v3306_v12  ;;  %272 = vst [vmem:[#allocation2 + $0x8] sm:$0xff] (!%p2527_p10), %v3306_v12 }
  0x27   : > { %273 = vst [vmem:[#allocation2 + $0x10] sm:$0xff] (!%p2527_p10), %v3306_v12  ;;  %274 = vst [vmem:[#allocation2 + $0x18] sm:$0xff] (!%p2527_p10), %v3306_v12 }
  0x28   : > { %275 = vst [vmem:[#allocation2 + $0x20] sm:$0xff] (!%p2527_p10), %v3306_v12  ;;  %276 = vst [vmem:[#allocation2 + $0x28] sm:$0xff] (!%p2527_p10), %v3306_v12 }
  0x29   : > { %277 = vst [vmem:[#allocation2 + $0x30] sm:$0xff] (!%p2527_p10), %v3306_v12  ;;  %278 = vst [vmem:[#allocation2 + $0x38] sm:$0xff] (!%p2527_p10), %v3306_v12 }
  0x2a   : > { %279 = vst [vmem:[#allocation2 + $0x40] sm:$0xff] (!%p2527_p10), %v3306_v12  ;;  %280 = vst [vmem:[#allocation2 + $0x48] sm:$0xff] (!%p2527_p10), %v3306_v12 }
  0x2b   : > { %281 = vst [vmem:[#allocation2 + $0x50] sm:$0xff] %v3306_v12  ;;  %282 = vst [vmem:[#allocation2 + $0x58] sm:$0xff] %v3306_v12 }
  0x2c PF: > { %v2874_v13 = vld [vmem:[%s3372_s3 + $0x4] ss:$16 sps:$4 sm:$0xff]   ;;  %v2876_v14 = vld [vmem:[%s3372_s3 + $0xc] ss:$16 sps:$4 sm:$0xff]   ;;  %v2878_v15 = vld [vmem:[%s3372_s3] ss:$16 sps:$4 sm:$0xff]  }
  0x2d   : > { %1911 = vmatprep.subr.bf16.mxu0 %v2874_v13  ;;  %v2879_v16 = vld [vmem:[%s3372_s3 + $0x8] ss:$16 sps:$4 sm:$0xff]   ;;  %2115 = vmatprep.subr.bf16.mxu1 %v2876_v14  ;;  %v2880_v17 = vld [vmem:[%s3372_s3 + $0x24] ss:$16 sps:$4 sm:$0xff]   ;;  %v2882_v18 = vld [vmem:[%s3372_s3 + $0x2c] ss:$16 sps:$4 sm:$0xff]  }
  0x2e   : > { %1912 = vmatpush1.bf16.msra.mxu0 %v2878_v15  ;;  %2116 = vmatpush1.bf16.msra.mxu1 %v2879_v16  ;;  %v2884_v19 = vld [vmem:[%s3372_s3 + $0x20] ss:$16 sps:$4 sm:$0xff]   ;;  %v2885_v20 = vld [vmem:[%s3372_s3 + $0x28] ss:$16 sps:$4 sm:$0xff]   ;;  %v2886_v21 = vld [vmem:[%s3372_s3 + $0x44] ss:$16 sps:$4 sm:$0xff]  }
  0x2f   : > { %1913 = vmatprep.subr.bf16.mxu0 %v2880_v17  ;;  %2117 = vmatprep.subr.bf16.mxu1 %v2882_v18  ;;  %v2888_v22 = vld [vmem:[%s3372_s3 + $0x4c] ss:$16 sps:$4 sm:$0xff]   ;;  %v2890_v23 = vld [vmem:[%s3372_s3 + $0x40] ss:$16 sps:$4 sm:$0xff]   ;;  %v2891_v24 = vld [vmem:[%s3372_s3 + $0x48] ss:$16 sps:$4 sm:$0xff]  }
  0x30   : > { %v2892_v25 = vld [vmem:[%s3372_s3 + $0x64] ss:$16 sps:$4 sm:$0xff]   ;;  %v2894_v26 = vld [vmem:[%s3372_s3 + $0x6c] ss:$16 sps:$4 sm:$0xff]   ;;  %v2896_v27 = vld [vmem:[%s3372_s3 + $0x60] ss:$16 sps:$4 sm:$0xff]  }
  0x31   : > { %v2897_v28 = vld [vmem:[%s3372_s3 + $0x68] ss:$16 sps:$4 sm:$0xff]   ;;  %v2898_v29 = vld [vmem:[%s3372_s3 + $0x84] ss:$16 sps:$4 sm:$0xff]   ;;  %v2900_v30 = vld [vmem:[%s3372_s3 + $0x8c] ss:$16 sps:$4 sm:$0xff]  }
  0x32   : > { %1914 = vmatpush1.bf16.msra.mxu0 %v2884_v19  ;;  %2118 = vmatpush1.bf16.msra.mxu1 %v2885_v20  ;;  %v2902_v31 = vld [vmem:[%s3372_s3 + $0x80] ss:$16 sps:$4 sm:$0xff]   ;;  %v2903_v32 = vld [vmem:[%s3372_s3 + $0x88] ss:$16 sps:$4 sm:$0xff]   ;;  %v2904_v33 = vld [vmem:[%s3372_s3 + $0xa4] ss:$16 sps:$4 sm:$0xff]  }
  0x33   : > { %1915 = vmatprep.subr.bf16.mxu0 %v2886_v21  ;;  %2119 = vmatprep.subr.bf16.mxu1 %v2888_v22  ;;  %v2906_v34 = vld [vmem:[%s3372_s3 + $0xac] ss:$16 sps:$4 sm:$0xff]   ;;  %v2908_v35 = vld [vmem:[%s3372_s3 + $0xa0] ss:$16 sps:$4 sm:$0xff]   ;;  %v2909_v36 = vld [vmem:[%s3372_s3 + $0xa8] ss:$16 sps:$4 sm:$0xff]  }
  0x34   : > { %v2910_v37 = vld [vmem:[%s3372_s3 + $0xc4] ss:$16 sps:$4 sm:$0xff]   ;;  %v2912_v38 = vld [vmem:[%s3372_s3 + $0xcc] ss:$16 sps:$4 sm:$0xff]   ;;  %v2914_v39 = vld [vmem:[%s3372_s3 + $0xc0] ss:$16 sps:$4 sm:$0xff]  }
  0x35   : > { %v2915_v40 = vld [vmem:[%s3372_s3 + $0xc8] ss:$16 sps:$4 sm:$0xff]   ;;  %v2916_v41 = vld [vmem:[%s3372_s3 + $0xe4] ss:$16 sps:$4 sm:$0xff]   ;;  %v2918_v42 = vld [vmem:[%s3372_s3 + $0xec] ss:$16 sps:$4 sm:$0xff]  }
  0x36   : > { %1916 = vmatpush1.bf16.msra.mxu0 %v2890_v23  ;;  %2120 = vmatpush1.bf16.msra.mxu1 %v2891_v24  ;;  %v2920_v43 = vld [vmem:[%s3372_s3 + $0xe0] ss:$16 sps:$4 sm:$0xff]   ;;  %v2921_v44 = vld [vmem:[%s3372_s3 + $0xe8] ss:$16 sps:$4 sm:$0xff]   ;;  %v2922_v45 = vld [vmem:[%s3372_s3 + $0x104] ss:$16 sps:$4 sm:$0xff]  }
  0x37   : > { %1917 = vmatprep.subr.bf16.mxu0 %v2892_v25  ;;  %2121 = vmatprep.subr.bf16.mxu1 %v2894_v26  ;;  %v2924_v46 = vld [vmem:[%s3372_s3 + $0x10c] ss:$16 sps:$4 sm:$0xff]   ;;  %v2926_v47 = vld [vmem:[%s3372_s3 + $0x100] ss:$16 sps:$4 sm:$0xff]   ;;  %v2927_v48 = vld [vmem:[%s3372_s3 + $0x108] ss:$16 sps:$4 sm:$0xff]  }
  0x38   : > { %v2928_v49 = vld [vmem:[%s3372_s3 + $0x124] ss:$16 sps:$4 sm:$0xff]   ;;  %v2930_v50 = vld [vmem:[%s3372_s3 + $0x12c] ss:$16 sps:$4 sm:$0xff]   ;;  %v2932_v51 = vld [vmem:[%s3372_s3 + $0x120] ss:$16 sps:$4 sm:$0xff]  }
  0x39   : > { %v2933_v52 = vld [vmem:[%s3372_s3 + $0x128] ss:$16 sps:$4 sm:$0xff]   ;;  %v2934_v53 = vld [vmem:[%s3372_s3 + $0x144] ss:$16 sps:$4 sm:$0xff]   ;;  %v2936_v54 = vld [vmem:[%s3372_s3 + $0x14c] ss:$16 sps:$4 sm:$0xff]  }
  0x3a   : > { %1918 = vmatpush1.bf16.msra.mxu0 %v2896_v27  ;;  %2122 = vmatpush1.bf16.msra.mxu1 %v2897_v28  ;;  %v2938_v55 = vld [vmem:[%s3372_s3 + $0x140] ss:$16 sps:$4 sm:$0xff]   ;;  %v2939_v56 = vld [vmem:[%s3372_s3 + $0x148] ss:$16 sps:$4 sm:$0xff]   ;;  %v2940_v57 = vld [vmem:[%s3372_s3 + $0x164] ss:$16 sps:$4 sm:$0xff]  }
  0x3b   : > { %1919 = vmatprep.subr.bf16.mxu0 %v2898_v29  ;;  %2123 = vmatprep.subr.bf16.mxu1 %v2900_v30  ;;  %v2942_v58 = vld [vmem:[%s3372_s3 + $0x16c] ss:$16 sps:$4 sm:$0xff]   ;;  %v295_v59 = vld [vmem:[%s3374_s4] sm:$0xff]  ;;  %v2945_v62 = vld [vmem:[%s3372_s3 + $0x168] ss:$16 sps:$4 sm:$0xff]   ;;  %p2800_p11 = scmp.ne.s32.totalorder %s3296_s11, 3 }
  0x3c   : > { %v299_v60 = vld [vmem:[%s3374_s4 + $0x20] sm:$0xff]  ;;  %v2948_v1 = vld [vmem:[%s3372_s3 + $0x18c] ss:$16 sps:$4 sm:$0xff]   ;;  %v2951_v3 = vld [vmem:[%s3372_s3 + $0x188] ss:$16 sps:$4 sm:$0xff]  }
  0x3d   : > { %v2944_v61 = vld [vmem:[%s3372_s3 + $0x160] ss:$16 sps:$4 sm:$0xff]   ;;  %v2529_v63 = vcombine.high %v295_v59, %v299_v60  ;;  %v2946_v0 = vld [vmem:[%s3372_s3 + $0x184] ss:$16 sps:$4 sm:$0xff]   ;;  %v2954_v5 = vld [vmem:[%s3372_s3 + $0x1ac] ss:$16 sps:$4 sm:$0xff]   ;;  %v2528_v18 = vcombine.low %v295_v59, %v299_v60 }
  0x3e   : > { %1920 = vmatpush1.bf16.msra.mxu0 %v2902_v31  ;;  %2124 = vmatpush1.bf16.msra.mxu1 %v2903_v32  ;;  %v2950_v2 = vld [vmem:[%s3372_s3 + $0x180] ss:$16 sps:$4 sm:$0xff]   ;;  %v2952_v4 = vld [vmem:[%s3372_s3 + $0x1a4] ss:$16 sps:$4 sm:$0xff]   ;;  %v2957_v7 = vld [vmem:[%s3372_s3 + $0x1a8] ss:$16 sps:$4 sm:$0xff]  }
  0x3f   : > { %1921 = vmatprep.subr.bf16.mxu0 %v2904_v33  ;;  %2125 = vmatprep.subr.bf16.mxu1 %v2906_v34  ;;  %v2956_v6 = vld [vmem:[%s3372_s3 + $0x1a0] ss:$16 sps:$4 sm:$0xff]   ;;  %v2958_v8 = vld [vmem:[%s3372_s3 + $0x1c4] ss:$16 sps:$4 sm:$0xff]   ;;  %v2960_v9 = vld [vmem:[%s3372_s3 + $0x1cc] ss:$16 sps:$4 sm:$0xff]  }
  0x40   : > { %1943 = vmatprep.mubr.bf16.mxu0 %v2529_v63  ;;  %2147 = vmatprep.mubr.bf16.mxu1 %v2529_v63  ;;  %v2962_v10 = vld [vmem:[%s3372_s3 + $0x1c0] ss:$16 sps:$4 sm:$0xff]   ;;  %v2963_v11 = vld [vmem:[%s3372_s3 + $0x1c8] ss:$16 sps:$4 sm:$0xff]   ;;  %v2964_v12 = vld [vmem:[%s3372_s3 + $0x1e4] ss:$16 sps:$4 sm:$0xff]  }
  0x41   : > { %v2966_v13 = vld [vmem:[%s3372_s3 + $0x1ec] ss:$16 sps:$4 sm:$0xff]   ;;  %v2968_v14 = vld [vmem:[%s3372_s3 + $0x1e0] ss:$16 sps:$4 sm:$0xff]   ;;  %v2969_v15 = vld [vmem:[%s3372_s3 + $0x1e8] ss:$16 sps:$4 sm:$0xff]  }
  0x42   : > { %1922 = vmatpush1.bf16.msra.mxu0 %v2908_v35  ;;  %2126 = vmatpush1.bf16.msra.mxu1 %v2909_v36  ;;  %v2972_v16 = vld [vmem:[%s3372_s3 + $0x204] ss:$16 sps:$4 sm:$0xff]   ;;  %v2975_v17 = vld [vmem:[%s3372_s3 + $0x20c] ss:$16 sps:$4 sm:$0xff]   ;;  %v2970_v19 = vld [vmem:[%s3372_s3 + $0x200] ss:$16 sps:$4 sm:$0xff]  }
  0x43   : > { %1923 = vmatprep.subr.bf16.mxu0 %v2910_v37  ;;  %2127 = vmatprep.subr.bf16.mxu1 %v2912_v38  ;;  %v2973_v20 = vld [vmem:[%s3372_s3 + $0x208] ss:$16 sps:$4 sm:$0xff]   ;;  %v2978_v21 = vld [vmem:[%s3372_s3 + $0x224] ss:$16 sps:$4 sm:$0xff]   ;;  %v2981_v22 = vld [vmem:[%s3372_s3 + $0x22c] ss:$16 sps:$4 sm:$0xff]  }
  0x44   : > { %v2976_v23 = vld [vmem:[%s3372_s3 + $0x220] ss:$16 sps:$4 sm:$0xff]   ;;  %v2979_v24 = vld [vmem:[%s3372_s3 + $0x228] ss:$16 sps:$4 sm:$0xff]   ;;  %v2984_v25 = vld [vmem:[%s3372_s3 + $0x244] ss:$16 sps:$4 sm:$0xff]  }
  0x45   : > { %v2987_v26 = vld [vmem:[%s3372_s3 + $0x24c] ss:$16 sps:$4 sm:$0xff]   ;;  %v2982_v27 = vld [vmem:[%s3372_s3 + $0x240] ss:$16 sps:$4 sm:$0xff]   ;;  %v2985_v28 = vld [vmem:[%s3372_s3 + $0x248] ss:$16 sps:$4 sm:$0xff]  }
  0x46   : > { %1924 = vmatpush1.bf16.msra.mxu0 %v2914_v39  ;;  %2128 = vmatpush1.bf16.msra.mxu1 %v2915_v40  ;;  %v2990_v29 = vld [vmem:[%s3372_s3 + $0x264] ss:$16 sps:$4 sm:$0xff]   ;;  %v2993_v30 = vld [vmem:[%s3372_s3 + $0x26c] ss:$16 sps:$4 sm:$0xff]   ;;  %v2988_v31 = vld [vmem:[%s3372_s3 + $0x260] ss:$16 sps:$4 sm:$0xff]  }
  0x47   : > { %1925 = vmatprep.subr.bf16.mxu0 %v2916_v41  ;;  %2129 = vmatprep.subr.bf16.mxu1 %v2918_v42  ;;  %v2991_v32 = vld [vmem:[%s3372_s3 + $0x268] ss:$16 sps:$4 sm:$0xff]   ;;  %v2996_v33 = vld [vmem:[%s3372_s3 + $0x284] ss:$16 sps:$4 sm:$0xff]   ;;  %v2999_v34 = vld [vmem:[%s3372_s3 + $0x28c] ss:$16 sps:$4 sm:$0xff]  }
  0x48   : > { %v2994_v35 = vld [vmem:[%s3372_s3 + $0x280] ss:$16 sps:$4 sm:$0xff]   ;;  %v2997_v36 = vld [vmem:[%s3372_s3 + $0x288] ss:$16 sps:$4 sm:$0xff]   ;;  %v3002_v37 = vld [vmem:[%s3372_s3 + $0x2a4] ss:$16 sps:$4 sm:$0xff]  }
  0x49   : > { %v303_v38 = vld [vmem:[%s3374_s4 + $0x40] sm:$0xff]  ;;  %v3005_v39 = vld [vmem:[%s3372_s3 + $0x2ac] ss:$16 sps:$4 sm:$0xff]  }
  0x4a   : > { %1926 = vmatpush1.bf16.msra.mxu0 %v2920_v43  ;;  %2130 = vmatpush1.bf16.msra.mxu1 %v2921_v44  ;;  %v2537_v40 = vcombine.high %v303_v38, %v303_v38  ;;  %v2536_v41 = vcombine.low %v303_v38, %v303_v38  ;;  %v3000_v42 = vld [vmem:[%s3372_s3 + $0x2a0] ss:$16 sps:$4 sm:$0xff]   ;;  %v3003_v43 = vld [vmem:[%s3372_s3 + $0x2a8] ss:$16 sps:$4 sm:$0xff]   ;;  %v3008_v44 = vld [vmem:[%s3372_s3 + $0x2c4] ss:$16 sps:$4 sm:$0xff]  }
  0x4b   : > { %1927 = vmatprep.subr.bf16.mxu0 %v2922_v45  ;;  %2131 = vmatprep.subr.bf16.mxu1 %v2924_v46  ;;  %v3011_v45 = vld [vmem:[%s3372_s3 + $0x2cc] ss:$16 sps:$4 sm:$0xff]   ;;  %v3026_v59 = vld [vmem:[%s3372_s3 + $0x324] ss:$16 sps:$4 sm:$0xff]  }
  0x4c   : > { %v3471_v46 = vld [vmem:[%s3374_s4 + $0x8] sm:$0xff]  ;;  %v3032_v63 = vld [vmem:[%s3372_s3 + $0x344] ss:$16 sps:$4 sm:$0xff]  }
  0x4d   : > { %v3029_v60 = vld [vmem:[%s3372_s3 + $0x32c] ss:$16 sps:$4 sm:$0xff]   ;;  %v3531_v38 = vld [vmem:[%s3374_s4 + $0x10] sm:$0xff] }
  0x4e   : > { %1928 = vmatpush1.bf16.msra.mxu0 %v2926_v47  ;;  %2132 = vmatpush1.bf16.msra.mxu1 %v2927_v48  ;;  %v3474_v47 = vld [vmem:[%s3374_s4 + $0x28] sm:$0xff]  ;;  %v3006_v48 = vld [vmem:[%s3372_s3 + $0x2c0] ss:$16 sps:$4 sm:$0xff]  }
  0x4f   : > { %1929 = vmatprep.subr.bf16.mxu0 %v2928_v49  ;;  %2133 = vmatprep.subr.bf16.mxu1 %v2930_v50  ;;  %v2531_v49 = vcombine.high %v3471_v46, %v3474_v47  ;;  %v3009_v50 = vld [vmem:[%s3372_s3 + $0x2c8] ss:$16 sps:$4 sm:$0xff]  }
  0x52   : > { %1930 = vmatpush1.bf16.msra.mxu0 %v2932_v51  ;;  %2134 = vmatpush1.bf16.msra.mxu1 %v2933_v52  ;;  %v3014_v51 = vld [vmem:[%s3372_s3 + $0x2e4] ss:$16 sps:$4 sm:$0xff]   ;;  %v3017_v52 = vld [vmem:[%s3372_s3 + $0x2ec] ss:$16 sps:$4 sm:$0xff]  }
  0x53   : > { %1931 = vmatprep.subr.bf16.mxu0 %v2934_v53  ;;  %2135 = vmatprep.subr.bf16.mxu1 %v2936_v54  ;;  %v3012_v53 = vld [vmem:[%s3372_s3 + $0x2e0] ss:$16 sps:$4 sm:$0xff]   ;;  %v3015_v54 = vld [vmem:[%s3372_s3 + $0x2e8] ss:$16 sps:$4 sm:$0xff]  }
  0x56   : > { %1932 = vmatpush1.bf16.msra.mxu0 %v2938_v55  ;;  %2136 = vmatpush1.bf16.msra.mxu1 %v2939_v56  ;;  %v3020_v55 = vld [vmem:[%s3372_s3 + $0x304] ss:$16 sps:$4 sm:$0xff]   ;;  %v3023_v56 = vld [vmem:[%s3372_s3 + $0x30c] ss:$16 sps:$4 sm:$0xff]  }
  0x57   : > { %1933 = vmatprep.subr.bf16.mxu0 %v2940_v57  ;;  %2137 = vmatprep.subr.bf16.mxu1 %v2942_v58  ;;  %v3018_v57 = vld [vmem:[%s3372_s3 + $0x300] ss:$16 sps:$4 sm:$0xff]   ;;  %v3021_v58 = vld [vmem:[%s3372_s3 + $0x308] ss:$16 sps:$4 sm:$0xff]  }
  0x5a   : > { %1934 = vmatpush1.bf16.msra.mxu0 %v2944_v61  ;;  %2138 = vmatpush1.bf16.msra.mxu1 %v2945_v62  ;;  %v3024_v61 = vld [vmem:[%s3372_s3 + $0x320] ss:$16 sps:$4 sm:$0xff]   ;;  %v3027_v62 = vld [vmem:[%s3372_s3 + $0x328] ss:$16 sps:$4 sm:$0xff]  }
  0x5b   : > { %1935 = vmatprep.subr.bf16.mxu0 %v2946_v0  ;;  %2139 = vmatprep.subr.bf16.mxu1 %v2948_v1  ;;  %v3035_v0 = vld [vmem:[%s3372_s3 + $0x34c] ss:$16 sps:$4 sm:$0xff]   ;;  %v3030_v1 = vld [vmem:[%s3372_s3 + $0x340] ss:$16 sps:$4 sm:$0xff]  }
  0x5e   : > { %1936 = vmatpush1.bf16.msra.mxu0 %v2950_v2  ;;  %2140 = vmatpush1.bf16.msra.mxu1 %v2951_v3  ;;  %v3033_v2 = vld [vmem:[%s3372_s3 + $0x348] ss:$16 sps:$4 sm:$0xff]   ;;  %v3038_v3 = vld [vmem:[%s3372_s3 + $0x364] ss:$16 sps:$4 sm:$0xff]  }
  0x5f   : > { %1937 = vmatprep.subr.bf16.mxu0 %v2952_v4  ;;  %2141 = vmatprep.subr.bf16.mxu1 %v2954_v5  ;;  %v3041_v4 = vld [vmem:[%s3372_s3 + $0x36c] ss:$16 sps:$4 sm:$0xff]   ;;  %v3036_v5 = vld [vmem:[%s3372_s3 + $0x360] ss:$16 sps:$4 sm:$0xff]  }
  0x62   : > { %1938 = vmatpush1.bf16.msra.mxu0 %v2956_v6  ;;  %2142 = vmatpush1.bf16.msra.mxu1 %v2957_v7  ;;  %v3039_v6 = vld [vmem:[%s3372_s3 + $0x368] ss:$16 sps:$4 sm:$0xff]   ;;  %v3044_v7 = vld [vmem:[%s3372_s3 + $0x384] ss:$16 sps:$4 sm:$0xff]  }
  0x63   : > { %1939 = vmatprep.subr.bf16.mxu0 %v2958_v8  ;;  %2143 = vmatprep.subr.bf16.mxu1 %v2960_v9  ;;  %v3047_v8 = vld [vmem:[%s3372_s3 + $0x38c] ss:$16 sps:$4 sm:$0xff]   ;;  %v3042_v9 = vld [vmem:[%s3372_s3 + $0x380] ss:$16 sps:$4 sm:$0xff]  }
  0x66   : > { %1940 = vmatpush1.bf16.msra.mxu0 %v2962_v10  ;;  %2144 = vmatpush1.bf16.msra.mxu1 %v2963_v11  ;;  %v3045_v10 = vld [vmem:[%s3372_s3 + $0x388] ss:$16 sps:$4 sm:$0xff]   ;;  %v3050_v11 = vld [vmem:[%s3372_s3 + $0x3a4] ss:$16 sps:$4 sm:$0xff]  }
  0x67   : > { %1941 = vmatprep.subr.bf16.mxu0 %v2964_v12  ;;  %2145 = vmatprep.subr.bf16.mxu1 %v2966_v13  ;;  %v3053_v12 = vld [vmem:[%s3372_s3 + $0x3ac] ss:$16 sps:$4 sm:$0xff]   ;;  %v3048_v13 = vld [vmem:[%s3372_s3 + $0x3a0] ss:$16 sps:$4 sm:$0xff]  }
  0x6a   : > { %1942 = vmatpush1.bf16.msra.mxu0 %v2968_v14  ;;  %2146 = vmatpush1.bf16.msra.mxu1 %v2969_v15  ;;  %v3051_v14 = vld [vmem:[%s3372_s3 + $0x3a8] ss:$16 sps:$4 sm:$0xff]   ;;  %v3058_v15 = vld [vmem:[%s3372_s3 + $0x3c4] ss:$16 sps:$4 sm:$0xff]  }
  0x6b   : > { %1962 = vmatprep.subr.bf16.mxu0 %v2972_v16  ;;  %2166 = vmatprep.subr.bf16.mxu1 %v2975_v17  ;;  %v3061_v16 = vld [vmem:[%s3372_s3 + $0x3cc] ss:$16 sps:$4 sm:$0xff]   ;;  %v3056_v17 = vld [vmem:[%s3372_s3 + $0x3c0] ss:$16 sps:$4 sm:$0xff]  }
  0x6d   : > { %1944 = vmatmul.mubr.bf16.vlgmr.msra.gmra.mrb[0].mxu0 %v2528_v18  ;;  %2148 = vmatmul.mubr.bf16.vlgmr.msra.gmra.mrb[0].mxu1 %v2528_v18  ;;  %v3059_v18 = vld [vmem:[%s3372_s3 + $0x3c8] ss:$16 sps:$4 sm:$0xff]  }
  0x6e   : > { %1963 = vmatpush1.bf16.msra.mxu0 %v2970_v19  ;;  %2167 = vmatpush1.bf16.msra.mxu1 %v2973_v20  ;;  %v3064_v19 = vld [vmem:[%s3372_s3 + $0x3e4] ss:$16 sps:$4 sm:$0xff]   ;;  %v3067_v20 = vld [vmem:[%s3372_s3 + $0x3ec] ss:$16 sps:$4 sm:$0xff]  }
  0x6f   : > { %1964 = vmatprep.subr.bf16.mxu0 %v2978_v21  ;;  %2168 = vmatprep.subr.bf16.mxu1 %v2981_v22  ;;  %v3062_v21 = vld [vmem:[%s3372_s3 + $0x3e0] ss:$16 sps:$4 sm:$0xff]   ;;  %v3065_v22 = vld [vmem:[%s3372_s3 + $0x3e8] ss:$16 sps:$4 sm:$0xff]  }
  0x70   : > { %1953 = vmatprep.mubr.bf16.mxu0 %v2537_v40  ;;  %2157 = vmatprep.mubr.bf16.mxu1 %v2537_v40  ;;  %v3085_v40 = vld [vmem:[%s3372_s3 + $0x448] ss:$16 sps:$4 sm:$0xff]  }
  0x72   : > { %1965 = vmatpush1.bf16.msra.mxu0 %v2976_v23  ;;  %2169 = vmatpush1.bf16.msra.mxu1 %v2979_v24  ;;  %v3070_v23 = vld [vmem:[%s3372_s3 + $0x404] ss:$16 sps:$4 sm:$0xff]   ;;  %v3073_v24 = vld [vmem:[%s3372_s3 + $0x40c] ss:$16 sps:$4 sm:$0xff]  }
  0x73   : > { %1966 = vmatprep.subr.bf16.mxu0 %v2984_v25  ;;  %2170 = vmatprep.subr.bf16.mxu1 %v2987_v26  ;;  %v2530_v25 = vcombine.low %v3471_v46, %v3474_v47  ;;  %v304_v26 = vld [vmem:[%s3374_s4 + $0x48] sm:$0xff]  ;;  %v3096_v46 = vld [vmem:[%s3372_s3 + $0x484] ss:$16 sps:$4 sm:$0xff]  }
  0x74   : > { %v3099_v47 = vld [vmem:[%s3372_s3 + $0x48c] ss:$16 sps:$4 sm:$0xff]  }
  0x75   : > { %1954 = vmatmul.mubr.bf16.gmra.mrb[4].mxu0 %v2536_v41  ;;  %2158 = vmatmul.mubr.bf16.gmra.mrb[4].mxu1 %v2536_v41  ;;  %v3090_v41 = vld [vmem:[%s3372_s3 + $0x464] ss:$16 sps:$4 sm:$0xff]  }
  0x76   : > { %1967 = vmatpush1.bf16.msra.mxu0 %v2982_v27  ;;  %2171 = vmatpush1.bf16.msra.mxu1 %v2985_v28  ;;  %v3068_v27 = vld [vmem:[%s3372_s3 + $0x400] ss:$16 sps:$4 sm:$0xff]   ;;  %v3071_v28 = vld [vmem:[%s3372_s3 + $0x408] ss:$16 sps:$4 sm:$0xff]  }
  0x77   : > { %1968 = vmatprep.subr.bf16.mxu0 %v2990_v29  ;;  %2172 = vmatprep.subr.bf16.mxu1 %v2993_v30  ;;  %v3076_v29 = vld [vmem:[%s3372_s3 + $0x424] ss:$16 sps:$4 sm:$0xff]   ;;  %v3079_v30 = vld [vmem:[%s3372_s3 + $0x42c] ss:$16 sps:$4 sm:$0xff]  }
  0x78   : > { %1994 = vmatprep.mubr.bf16.mxu0 %v2531_v49  ;;  %2198 = vmatprep.mubr.bf16.mxu1 %v2531_v49  ;;  %v3097_v49 = vld [vmem:[%s3372_s3 + $0x488] ss:$16 sps:$4 sm:$0xff]  }
  0x7a   : > { %1969 = vmatpush1.bf16.msra.mxu0 %v2988_v31  ;;  %2173 = vmatpush1.bf16.msra.mxu1 %v2991_v32  ;;  %v2539_v31 = vcombine.high %v304_v26, %v304_v26  ;;  %v3074_v32 = vld [vmem:[%s3372_s3 + $0x420] ss:$16 sps:$4 sm:$0xff]  }
  0x7b   : > { %1970 = vmatprep.subr.bf16.mxu0 %v2996_v33  ;;  %2174 = vmatprep.subr.bf16.mxu1 %v2999_v34  ;;  %v3077_v33 = vld [vmem:[%s3372_s3 + $0x428] ss:$16 sps:$4 sm:$0xff]   ;;  %v3084_v34 = vld [vmem:[%s3372_s3 + $0x444] ss:$16 sps:$4 sm:$0xff]  }
  0x7e   : > { %1971 = vmatpush1.bf16.msra.mxu0 %v2994_v35  ;;  %2175 = vmatpush1.bf16.msra.mxu1 %v2997_v36  ;;  %v3087_v35 = vld [vmem:[%s3372_s3 + $0x44c] ss:$16 sps:$4 sm:$0xff]   ;;  %v3082_v36 = vld [vmem:[%s3372_s3 + $0x440] ss:$16 sps:$4 sm:$0xff]  }
  0x7f   : > { %1972 = vmatprep.subr.bf16.mxu0 %v3002_v37  ;;  %2176 = vmatprep.subr.bf16.mxu1 %v3005_v39  ;;  %v2538_v37 = vcombine.low %v304_v26, %v304_v26  ;;  %v3534_v39 = vld [vmem:[%s3374_s4 + $0x30] sm:$0xff] }
  0x80   : > { %v3162_v26 = vld [vmem:[%s3372_s3 + $0x5e4] ss:$16 sps:$4 sm:$0xff]  }
  0x82   : > { %1973 = vmatpush1.bf16.msra.mxu0 %v3000_v42  ;;  %2177 = vmatpush1.bf16.msra.mxu1 %v3003_v43  ;;  %v3093_v42 = vld [vmem:[%s3372_s3 + $0x46c] ss:$16 sps:$4 sm:$0xff]   ;;  %v2533_v43 = vcombine.high %v3531_v38, %v3534_v39 }
  0x83   : > { %1974 = vmatprep.subr.bf16.mxu0 %v3008_v44  ;;  %2178 = vmatprep.subr.bf16.mxu1 %v3011_v45  ;;  %v3088_v44 = vld [vmem:[%s3372_s3 + $0x460] ss:$16 sps:$4 sm:$0xff]   ;;  %v3091_v45 = vld [vmem:[%s3372_s3 + $0x468] ss:$16 sps:$4 sm:$0xff]  }
  0x86   : > { %1975 = vmatpush1.bf16.msra.mxu0 %v3006_v48  ;;  %2179 = vmatpush1.bf16.msra.mxu1 %v3009_v50  ;;  %v3094_v48 = vld [vmem:[%s3372_s3 + $0x480] ss:$16 sps:$4 sm:$0xff]   ;;  %v3102_v50 = vld [vmem:[%s3372_s3 + $0x4a4] ss:$16 sps:$4 sm:$0xff]  }
  0x87   : > { %1976 = vmatprep.subr.bf16.mxu0 %v3014_v51  ;;  %2180 = vmatprep.subr.bf16.mxu1 %v3017_v52  ;;  %v3105_v51 = vld [vmem:[%s3372_s3 + $0x4ac] ss:$16 sps:$4 sm:$0xff]   ;;  %v3100_v52 = vld [vmem:[%s3372_s3 + $0x4a0] ss:$16 sps:$4 sm:$0xff]  }
  0x8a   : > { %1977 = vmatpush1.bf16.msra.mxu0 %v3012_v53  ;;  %2181 = vmatpush1.bf16.msra.mxu1 %v3015_v54  ;;  %v3103_v53 = vld [vmem:[%s3372_s3 + $0x4a8] ss:$16 sps:$4 sm:$0xff]   ;;  %v3108_v54 = vld [vmem:[%s3372_s3 + $0x4c4] ss:$16 sps:$4 sm:$0xff]  }
  0x8b   : > { %1978 = vmatprep.subr.bf16.mxu0 %v3020_v55  ;;  %2182 = vmatprep.subr.bf16.mxu1 %v3023_v56  ;;  %v3111_v55 = vld [vmem:[%s3372_s3 + $0x4cc] ss:$16 sps:$4 sm:$0xff]   ;;  %v3106_v56 = vld [vmem:[%s3372_s3 + $0x4c0] ss:$16 sps:$4 sm:$0xff]  }
  0x8e   : > { %1979 = vmatpush1.bf16.msra.mxu0 %v3018_v57  ;;  %2183 = vmatpush1.bf16.msra.mxu1 %v3021_v58  ;;  %v3109_v57 = vld [vmem:[%s3372_s3 + $0x4c8] ss:$16 sps:$4 sm:$0xff]   ;;  %v3114_v58 = vld [vmem:[%s3372_s3 + $0x4e4] ss:$16 sps:$4 sm:$0xff]  }
  0x8f   : > { %1980 = vmatprep.subr.bf16.mxu0 %v3026_v59  ;;  %2184 = vmatprep.subr.bf16.mxu1 %v3029_v60  ;;  %v3117_v59 = vld [vmem:[%s3372_s3 + $0x4ec] ss:$16 sps:$4 sm:$0xff]   ;;  %v3112_v60 = vld [vmem:[%s3372_s3 + $0x4e0] ss:$16 sps:$4 sm:$0xff]  }
  0x92   : > { %1981 = vmatpush1.bf16.msra.mxu0 %v3024_v61  ;;  %2185 = vmatpush1.bf16.msra.mxu1 %v3027_v62  ;;  %v3115_v61 = vld [vmem:[%s3372_s3 + $0x4e8] ss:$16 sps:$4 sm:$0xff]   ;;  %v3120_v62 = vld [vmem:[%s3372_s3 + $0x504] ss:$16 sps:$4 sm:$0xff]  }
  0x93   : > { %1982 = vmatprep.subr.bf16.mxu0 %v3032_v63  ;;  %2186 = vmatprep.subr.bf16.mxu1 %v3035_v0  ;;  %v3123_v63 = vld [vmem:[%s3372_s3 + $0x50c] ss:$16 sps:$4 sm:$0xff]   ;;  %v3118_v0 = vld [vmem:[%s3372_s3 + $0x500] ss:$16 sps:$4 sm:$0xff]  }
  0x96   : > { %1983 = vmatpush1.bf16.msra.mxu0 %v3030_v1  ;;  %2187 = vmatpush1.bf16.msra.mxu1 %v3033_v2  ;;  %v3121_v1 = vld [vmem:[%s3372_s3 + $0x508] ss:$16 sps:$4 sm:$0xff]   ;;  %v3126_v2 = vld [vmem:[%s3372_s3 + $0x524] ss:$16 sps:$4 sm:$0xff]  }
  0x97   : > { %1984 = vmatprep.subr.bf16.mxu0 %v3038_v3  ;;  %2188 = vmatprep.subr.bf16.mxu1 %v3041_v4  ;;  %v3129_v3 = vld [vmem:[%s3372_s3 + $0x52c] ss:$16 sps:$4 sm:$0xff]   ;;  %v3124_v4 = vld [vmem:[%s3372_s3 + $0x520] ss:$16 sps:$4 sm:$0xff]  }
  0x9a   : > { %1985 = vmatpush1.bf16.msra.mxu0 %v3036_v5  ;;  %2189 = vmatpush1.bf16.msra.mxu1 %v3039_v6  ;;  %v3127_v5 = vld [vmem:[%s3372_s3 + $0x528] ss:$16 sps:$4 sm:$0xff]   ;;  %v3132_v6 = vld [vmem:[%s3372_s3 + $0x544] ss:$16 sps:$4 sm:$0xff]  }
  0x9b   : > { %1986 = vmatprep.subr.bf16.mxu0 %v3044_v7  ;;  %2190 = vmatprep.subr.bf16.mxu1 %v3047_v8  ;;  %v3135_v7 = vld [vmem:[%s3372_s3 + $0x54c] ss:$16 sps:$4 sm:$0xff]   ;;  %v3130_v8 = vld [vmem:[%s3372_s3 + $0x540] ss:$16 sps:$4 sm:$0xff]  }
  0x9e   : > { %1987 = vmatpush1.bf16.msra.mxu0 %v3042_v9  ;;  %2191 = vmatpush1.bf16.msra.mxu1 %v3045_v10  ;;  %v3133_v9 = vld [vmem:[%s3372_s3 + $0x548] ss:$16 sps:$4 sm:$0xff]   ;;  %v3138_v10 = vld [vmem:[%s3372_s3 + $0x564] ss:$16 sps:$4 sm:$0xff]  }
  0x9f   : > { %1988 = vmatprep.subr.bf16.mxu0 %v3050_v11  ;;  %2192 = vmatprep.subr.bf16.mxu1 %v3053_v12  ;;  %v3141_v11 = vld [vmem:[%s3372_s3 + $0x56c] ss:$16 sps:$4 sm:$0xff]   ;;  %v3136_v12 = vld [vmem:[%s3372_s3 + $0x560] ss:$16 sps:$4 sm:$0xff]  }
  0xa2   : > { %1989 = vmatpush1.bf16.msra.mxu0 %v3048_v13  ;;  %2193 = vmatpush1.bf16.msra.mxu1 %v3051_v14  ;;  %v3139_v13 = vld [vmem:[%s3372_s3 + $0x568] ss:$16 sps:$4 sm:$0xff]   ;;  %v3144_v14 = vld [vmem:[%s3372_s3 + $0x584] ss:$16 sps:$4 sm:$0xff]  }
  0xa3   : > { %1990 = vmatprep.subr.bf16.mxu0 %v3058_v15  ;;  %2194 = vmatprep.subr.bf16.mxu1 %v3061_v16  ;;  %v3147_v15 = vld [vmem:[%s3372_s3 + $0x58c] ss:$16 sps:$4 sm:$0xff]   ;;  %v3142_v16 = vld [vmem:[%s3372_s3 + $0x580] ss:$16 sps:$4 sm:$0xff]  }
  0xa6   : > { %1991 = vmatpush1.bf16.msra.mxu0 %v3056_v17  ;;  %2195 = vmatpush1.bf16.msra.mxu1 %v3059_v18  ;;  %v3145_v17 = vld [vmem:[%s3372_s3 + $0x588] ss:$16 sps:$4 sm:$0xff]   ;;  %v3150_v18 = vld [vmem:[%s3372_s3 + $0x5a4] ss:$16 sps:$4 sm:$0xff]  }
  0xa7   : > { %1992 = vmatprep.subr.bf16.mxu0 %v3064_v19  ;;  %2196 = vmatprep.subr.bf16.mxu1 %v3067_v20  ;;  %v3153_v19 = vld [vmem:[%s3372_s3 + $0x5ac] ss:$16 sps:$4 sm:$0xff]   ;;  %v3148_v20 = vld [vmem:[%s3372_s3 + $0x5a0] ss:$16 sps:$4 sm:$0xff]  }
  0xaa   : > { %1993 = vmatpush1.bf16.msra.mxu0 %v3062_v21  ;;  %2197 = vmatpush1.bf16.msra.mxu1 %v3065_v22  ;;  %v3151_v21 = vld [vmem:[%s3372_s3 + $0x5a8] ss:$16 sps:$4 sm:$0xff]   ;;  %v3156_v22 = vld [vmem:[%s3372_s3 + $0x5c4] ss:$16 sps:$4 sm:$0xff]  }
  0xab   : > { %2013 = vmatprep.subr.bf16.mxu0 %v3070_v23  ;;  %2217 = vmatprep.subr.bf16.mxu1 %v3073_v24  ;;  %v3159_v23 = vld [vmem:[%s3372_s3 + $0x5cc] ss:$16 sps:$4 sm:$0xff]   ;;  %v3154_v24 = vld [vmem:[%s3372_s3 + $0x5c0] ss:$16 sps:$4 sm:$0xff]  }
  0xad   : > { %1995 = vmatmul.mubr.bf16.vlgmr.msra.gmra.mrb[0].mxu0 %v2530_v25  ;;  %2199 = vmatmul.mubr.bf16.vlgmr.msra.gmra.mrb[0].mxu1 %v2530_v25  ;;  %v3157_v25 = vld [vmem:[%s3372_s3 + $0x5c8] ss:$16 sps:$4 sm:$0xff]  }
  0xae   : > { %2014 = vmatpush1.bf16.msra.mxu0 %v3068_v27  ;;  %2218 = vmatpush1.bf16.msra.mxu1 %v3071_v28  ;;  %v3165_v27 = vld [vmem:[%s3372_s3 + $0x5ec] ss:$16 sps:$4 sm:$0xff]   ;;  %v3160_v28 = vld [vmem:[%s3372_s3 + $0x5e0] ss:$16 sps:$4 sm:$0xff]  }
  0xaf   : > { %2015 = vmatprep.subr.bf16.mxu0 %v3076_v29  ;;  %2219 = vmatprep.subr.bf16.mxu1 %v3079_v30  ;;  %v3163_v29 = vld [vmem:[%s3372_s3 + $0x5e8] ss:$16 sps:$4 sm:$0xff]   ;;  %v3168_v30 = vld [vmem:[%s3372_s3 + $0x604] ss:$16 sps:$4 sm:$0xff]  }
  0xb0   : > { %2004 = vmatprep.mubr.bf16.mxu0 %v2539_v31  ;;  %2208 = vmatprep.mubr.bf16.mxu1 %v2539_v31  ;;  %v3171_v31 = vld [vmem:[%s3372_s3 + $0x60c] ss:$16 sps:$4 sm:$0xff]  }
  0xb2   : > { %2016 = vmatpush1.bf16.msra.mxu0 %v3074_v32  ;;  %2220 = vmatpush1.bf16.msra.mxu1 %v3077_v33  ;;  %v2532_v32 = vcombine.low %v3531_v38, %v3534_v39  ;;  %v305_v33 = vld [vmem:[%s3374_s4 + $0x50] sm:$0xff]  ;;  %v3175_v39 = vld [vmem:[%s3372_s3 + $0x628] ss:$16 sps:$4 sm:$0xff]  }
  0xb3   : > { %2017 = vmatprep.subr.bf16.mxu0 %v3084_v34  ;;  %2221 = vmatprep.subr.bf16.mxu1 %v3087_v35  ;;  %v3166_v34 = vld [vmem:[%s3372_s3 + $0x600] ss:$16 sps:$4 sm:$0xff]   ;;  %v3169_v35 = vld [vmem:[%s3372_s3 + $0x608] ss:$16 sps:$4 sm:$0xff]  }
  0xb4   : > { %v3172_v38 = vld [vmem:[%s3372_s3 + $0x620] ss:$16 sps:$4 sm:$0xff]  }
  0xb5   : > { %2005 = vmatmul.mubr.bf16.gmra.mrb[8].mxu0 %v2538_v37  ;;  %2209 = vmatmul.mubr.bf16.gmra.mrb[8].mxu1 %v2538_v37  ;;  %v3177_v37 = vld [vmem:[%s3372_s3 + $0x62c] ss:$16 sps:$4 sm:$0xff]  }
  0xb6   : > { %2018 = vmatpush1.bf16.msra.mxu0 %v3082_v36  ;;  %2222 = vmatpush1.bf16.msra.mxu1 %v3085_v40  ;;  %v3174_v36 = vld [vmem:[%s3372_s3 + $0x624] ss:$16 sps:$4 sm:$0xff]   ;;  %v2541_v40 = vcombine.high %v305_v33, %v305_v33 }
  0xb7   : > { %2019 = vmatprep.subr.bf16.mxu0 %v3090_v41  ;;  %2223 = vmatprep.subr.bf16.mxu1 %v3093_v42  ;;  %v3182_v41 = vld [vmem:[%s3372_s3 + $0x644] ss:$16 sps:$4 sm:$0xff]   ;;  %v3185_v42 = vld [vmem:[%s3372_s3 + $0x64c] ss:$16 sps:$4 sm:$0xff]  }
  0xb8   : > { %2045 = vmatprep.mubr.bf16.mxu0 %v2533_v43  ;;  %2249 = vmatprep.mubr.bf16.mxu1 %v2533_v43  ;;  %v2540_v43 = vcombine.low %v305_v33, %v305_v33  ;;  %v3260_v33 = vld [vmem:[%s3372_s3 + $0x7e4] ss:$16 sps:$4 sm:$0xff]  }
  0xba   : > { %2020 = vmatpush1.bf16.msra.mxu0 %v3088_v44  ;;  %2224 = vmatpush1.bf16.msra.mxu1 %v3091_v45  ;;  %v3605_v44 = vld [vmem:[%s3374_s4 + $0x18] sm:$0xff] }
  0xbb   : > { %2021 = vmatprep.subr.bf16.mxu0 %v3096_v46  ;;  %2225 = vmatprep.subr.bf16.mxu1 %v3099_v47  ;;  %v3608_v45 = vld [vmem:[%s3374_s4 + $0x38] sm:$0xff]  ;;  %v3180_v46 = vld [vmem:[%s3372_s3 + $0x640] ss:$16 sps:$4 sm:$0xff]  }
  0xbc   : > { %v3183_v47 = vld [vmem:[%s3372_s3 + $0x648] ss:$16 sps:$4 sm:$0xff]  }
  0xbe   : > { %2022 = vmatpush1.bf16.msra.mxu0 %v3094_v48  ;;  %2226 = vmatpush1.bf16.msra.mxu1 %v3097_v49  ;;  %v3188_v48 = vld [vmem:[%s3372_s3 + $0x664] ss:$16 sps:$4 sm:$0xff]   ;;  %v3191_v49 = vld [vmem:[%s3372_s3 + $0x66c] ss:$16 sps:$4 sm:$0xff]  }
  0xbf   : > { %2023 = vmatprep.subr.bf16.mxu0 %v3102_v50  ;;  %2227 = vmatprep.subr.bf16.mxu1 %v3105_v51  ;;  %v2535_v50 = vcombine.high %v3605_v44, %v3608_v45  ;;  %v3186_v51 = vld [vmem:[%s3372_s3 + $0x660] ss:$16 sps:$4 sm:$0xff]  }
  0xc2   : > { %2024 = vmatpush1.bf16.msra.mxu0 %v3100_v52  ;;  %2228 = vmatpush1.bf16.msra.mxu1 %v3103_v53  ;;  %v3189_v52 = vld [vmem:[%s3372_s3 + $0x668] ss:$16 sps:$4 sm:$0xff]   ;;  %v3194_v53 = vld [vmem:[%s3372_s3 + $0x684] ss:$16 sps:$4 sm:$0xff]  }
  0xc3   : > { %2025 = vmatprep.subr.bf16.mxu0 %v3108_v54  ;;  %2229 = vmatprep.subr.bf16.mxu1 %v3111_v55  ;;  %v3197_v54 = vld [vmem:[%s3372_s3 + $0x68c] ss:$16 sps:$4 sm:$0xff]   ;;  %v3192_v55 = vld [vmem:[%s3372_s3 + $0x680] ss:$16 sps:$4 sm:$0xff]  }
  0xc6   : > { %2026 = vmatpush1.bf16.msra.mxu0 %v3106_v56  ;;  %2230 = vmatpush1.bf16.msra.mxu1 %v3109_v57  ;;  %v3195_v56 = vld [vmem:[%s3372_s3 + $0x688] ss:$16 sps:$4 sm:$0xff]   ;;  %v3200_v57 = vld [vmem:[%s3372_s3 + $0x6a4] ss:$16 sps:$4 sm:$0xff]  }
  0xc7   : > { %2027 = vmatprep.subr.bf16.mxu0 %v3114_v58  ;;  %2231 = vmatprep.subr.bf16.mxu1 %v3117_v59  ;;  %v3203_v58 = vld [vmem:[%s3372_s3 + $0x6ac] ss:$16 sps:$4 sm:$0xff]   ;;  %v3198_v59 = vld [vmem:[%s3372_s3 + $0x6a0] ss:$16 sps:$4 sm:$0xff]  }
  0xca   : > { %2028 = vmatpush1.bf16.msra.mxu0 %v3112_v60  ;;  %2232 = vmatpush1.bf16.msra.mxu1 %v3115_v61  ;;  %v3201_v60 = vld [vmem:[%s3372_s3 + $0x6a8] ss:$16 sps:$4 sm:$0xff]   ;;  %v3206_v61 = vld [vmem:[%s3372_s3 + $0x6c4] ss:$16 sps:$4 sm:$0xff]  }
  0xcb   : > { %2029 = vmatprep.subr.bf16.mxu0 %v3120_v62  ;;  %2233 = vmatprep.subr.bf16.mxu1 %v3123_v63  ;;  %v3209_v62 = vld [vmem:[%s3372_s3 + $0x6cc] ss:$16 sps:$4 sm:$0xff]   ;;  %v3204_v63 = vld [vmem:[%s3372_s3 + $0x6c0] ss:$16 sps:$4 sm:$0xff]  }
  0xce   : > { %2030 = vmatpush1.bf16.msra.mxu0 %v3118_v0  ;;  %2234 = vmatpush1.bf16.msra.mxu1 %v3121_v1  ;;  %v3207_v0 = vld [vmem:[%s3372_s3 + $0x6c8] ss:$16 sps:$4 sm:$0xff]   ;;  %v3212_v1 = vld [vmem:[%s3372_s3 + $0x6e4] ss:$16 sps:$4 sm:$0xff]  }
  0xcf   : > { %2031 = vmatprep.subr.bf16.mxu0 %v3126_v2  ;;  %2235 = vmatprep.subr.bf16.mxu1 %v3129_v3  ;;  %v3215_v2 = vld [vmem:[%s3372_s3 + $0x6ec] ss:$16 sps:$4 sm:$0xff]   ;;  %v3210_v3 = vld [vmem:[%s3372_s3 + $0x6e0] ss:$16 sps:$4 sm:$0xff]  }
  0xd2   : > { %2032 = vmatpush1.bf16.msra.mxu0 %v3124_v4  ;;  %2236 = vmatpush1.bf16.msra.mxu1 %v3127_v5  ;;  %v3213_v4 = vld [vmem:[%s3372_s3 + $0x6e8] ss:$16 sps:$4 sm:$0xff]   ;;  %v3218_v5 = vld [vmem:[%s3372_s3 + $0x704] ss:$16 sps:$4 sm:$0xff]  }
  0xd3   : > { %2033 = vmatprep.subr.bf16.mxu0 %v3132_v6  ;;  %2237 = vmatprep.subr.bf16.mxu1 %v3135_v7  ;;  %v3221_v6 = vld [vmem:[%s3372_s3 + $0x70c] ss:$16 sps:$4 sm:$0xff]   ;;  %v3216_v7 = vld [vmem:[%s3372_s3 + $0x700] ss:$16 sps:$4 sm:$0xff]  }
  0xd6   : > { %2034 = vmatpush1.bf16.msra.mxu0 %v3130_v8  ;;  %2238 = vmatpush1.bf16.msra.mxu1 %v3133_v9  ;;  %v3219_v8 = vld [vmem:[%s3372_s3 + $0x708] ss:$16 sps:$4 sm:$0xff]   ;;  %v3224_v9 = vld [vmem:[%s3372_s3 + $0x724] ss:$16 sps:$4 sm:$0xff]  }
  0xd7   : > { %2035 = vmatprep.subr.bf16.mxu0 %v3138_v10  ;;  %2239 = vmatprep.subr.bf16.mxu1 %v3141_v11  ;;  %v3227_v10 = vld [vmem:[%s3372_s3 + $0x72c] ss:$16 sps:$4 sm:$0xff]   ;;  %v3222_v11 = vld [vmem:[%s3372_s3 + $0x720] ss:$16 sps:$4 sm:$0xff]  }
  0xda   : > { %2036 = vmatpush1.bf16.msra.mxu0 %v3136_v12  ;;  %2240 = vmatpush1.bf16.msra.mxu1 %v3139_v13  ;;  %v3225_v12 = vld [vmem:[%s3372_s3 + $0x728] ss:$16 sps:$4 sm:$0xff]   ;;  %v3230_v13 = vld [vmem:[%s3372_s3 + $0x744] ss:$16 sps:$4 sm:$0xff]  }
  0xdb   : > { %2037 = vmatprep.subr.bf16.mxu0 %v3144_v14  ;;  %2241 = vmatprep.subr.bf16.mxu1 %v3147_v15  ;;  %v3233_v14 = vld [vmem:[%s3372_s3 + $0x74c] ss:$16 sps:$4 sm:$0xff]   ;;  %v3228_v15 = vld [vmem:[%s3372_s3 + $0x740] ss:$16 sps:$4 sm:$0xff]  }
  0xde   : > { %2038 = vmatpush1.bf16.msra.mxu0 %v3142_v16  ;;  %2242 = vmatpush1.bf16.msra.mxu1 %v3145_v17  ;;  %v3231_v16 = vld [vmem:[%s3372_s3 + $0x748] ss:$16 sps:$4 sm:$0xff]   ;;  %v3236_v17 = vld [vmem:[%s3372_s3 + $0x764] ss:$16 sps:$4 sm:$0xff]  }
  0xdf   : > { %2039 = vmatprep.subr.bf16.mxu0 %v3150_v18  ;;  %2243 = vmatprep.subr.bf16.mxu1 %v3153_v19  ;;  %v3239_v18 = vld [vmem:[%s3372_s3 + $0x76c] ss:$16 sps:$4 sm:$0xff]   ;;  %v3234_v19 = vld [vmem:[%s3372_s3 + $0x760] ss:$16 sps:$4 sm:$0xff]  }
  0xe2   : > { %2040 = vmatpush1.bf16.msra.mxu0 %v3148_v20  ;;  %2244 = vmatpush1.bf16.msra.mxu1 %v3151_v21  ;;  %v3237_v20 = vld [vmem:[%s3372_s3 + $0x768] ss:$16 sps:$4 sm:$0xff]   ;;  %v3242_v21 = vld [vmem:[%s3372_s3 + $0x784] ss:$16 sps:$4 sm:$0xff]  }
  0xe3   : > { %2041 = vmatprep.subr.bf16.mxu0 %v3156_v22  ;;  %2245 = vmatprep.subr.bf16.mxu1 %v3159_v23  ;;  %v3245_v22 = vld [vmem:[%s3372_s3 + $0x78c] ss:$16 sps:$4 sm:$0xff]   ;;  %v3240_v23 = vld [vmem:[%s3372_s3 + $0x780] ss:$16 sps:$4 sm:$0xff]  }
  0xe6   : > { %2042 = vmatpush1.bf16.msra.mxu0 %v3154_v24  ;;  %2246 = vmatpush1.bf16.msra.mxu1 %v3157_v25  ;;  %v3243_v24 = vld [vmem:[%s3372_s3 + $0x788] ss:$16 sps:$4 sm:$0xff]   ;;  %v3248_v25 = vld [vmem:[%s3372_s3 + $0x7a4] ss:$16 sps:$4 sm:$0xff]  }
  0xe7   : > { %2043 = vmatprep.subr.bf16.mxu0 %v3162_v26  ;;  %2247 = vmatprep.subr.bf16.mxu1 %v3165_v27  ;;  %v3251_v26 = vld [vmem:[%s3372_s3 + $0x7ac] ss:$16 sps:$4 sm:$0xff]   ;;  %v3246_v27 = vld [vmem:[%s3372_s3 + $0x7a0] ss:$16 sps:$4 sm:$0xff]  }
  0xea   : > { %2044 = vmatpush1.bf16.msra.mxu0 %v3160_v28  ;;  %2248 = vmatpush1.bf16.msra.mxu1 %v3163_v29  ;;  %v3249_v28 = vld [vmem:[%s3372_s3 + $0x7a8] ss:$16 sps:$4 sm:$0xff]   ;;  %v3254_v29 = vld [vmem:[%s3372_s3 + $0x7c4] ss:$16 sps:$4 sm:$0xff]  }
  0xeb   : > { %2064 = vmatprep.subr.bf16.mxu0 %v3168_v30  ;;  %2268 = vmatprep.subr.bf16.mxu1 %v3171_v31  ;;  %v3257_v30 = vld [vmem:[%s3372_s3 + $0x7cc] ss:$16 sps:$4 sm:$0xff]   ;;  %v3252_v31 = vld [vmem:[%s3372_s3 + $0x7c0] ss:$16 sps:$4 sm:$0xff]  }
  0xed   : > { %2046 = vmatmul.mubr.bf16.vlgmr.msra.gmra.mrb[0].mxu0 %v2532_v32  ;;  %2250 = vmatmul.mubr.bf16.vlgmr.msra.gmra.mrb[0].mxu1 %v2532_v32  ;;  %v3255_v32 = vld [vmem:[%s3372_s3 + $0x7c8] ss:$16 sps:$4 sm:$0xff]  }
  0xee   : > { %2065 = vmatpush1.bf16.msra.mxu0 %v3166_v34  ;;  %2269 = vmatpush1.bf16.msra.mxu1 %v3169_v35  ;;  %v3263_v34 = vld [vmem:[%s3372_s3 + $0x7ec] ss:$16 sps:$4 sm:$0xff]   ;;  %v3258_v35 = vld [vmem:[%s3372_s3 + $0x7e0] ss:$16 sps:$4 sm:$0xff]  }
  0xef   : > { %2066 = vmatprep.subr.bf16.mxu0 %v3174_v36  ;;  %2270 = vmatprep.subr.bf16.mxu1 %v3177_v37  ;;  %v3261_v36 = vld [vmem:[%s3372_s3 + $0x7e8] ss:$16 sps:$4 sm:$0xff]  }
  0xf0   : > { %2055 = vmatprep.mubr.bf16.mxu0 %v2541_v40  ;;  %2259 = vmatprep.mubr.bf16.mxu1 %v2541_v40  ;;  %v306_v37 = vld [vmem:[%s3374_s4 + $0x58] sm:$0xff]  ;;  %v2534_v40 = vcombine.low %v3605_v44, %v3608_v45 }
  0xf2   : > { %2067 = vmatpush1.bf16.msra.mxu0 %v3172_v38  ;;  %2271 = vmatpush1.bf16.msra.mxu1 %v3175_v39  ;;  %v2543_v38 = vcombine.high %v306_v37, %v306_v37  ;;  %v2542_v39 = vcombine.low %v306_v37, %v306_v37 }
  0xf3   : > { %2068 = vmatprep.subr.bf16.mxu0 %v3182_v41  ;;  %2272 = vmatprep.subr.bf16.mxu1 %v3185_v42 }
  0xf5   : > { %2056 = vmatmul.mubr.bf16.gmra.mrb[12].mxu0 %v2540_v43  ;;  %2260 = vmatmul.mubr.bf16.gmra.mrb[12].mxu1 %v2540_v43 }
  0xf6   : > { %2069 = vmatpush1.bf16.msra.mxu0 %v3180_v46  ;;  %2273 = vmatpush1.bf16.msra.mxu1 %v3183_v47 }
  0xf7   : > { %2070 = vmatprep.subr.bf16.mxu0 %v3188_v48  ;;  %2274 = vmatprep.subr.bf16.mxu1 %v3191_v49 }
  0xf8   : > { %2096 = vmatprep.mubr.bf16.mxu0 %v2535_v50  ;;  %2300 = vmatprep.mubr.bf16.mxu1 %v2535_v50 }
  0xfa   : > { %2071 = vmatpush1.bf16.msra.mxu0 %v3186_v51  ;;  %2275 = vmatpush1.bf16.msra.mxu1 %v3189_v52 }
  0xfb   : > { %2072 = vmatprep.subr.bf16.mxu0 %v3194_v53  ;;  %2276 = vmatprep.subr.bf16.mxu1 %v3197_v54 }
  0xfe   : > { %2073 = vmatpush1.bf16.msra.mxu0 %v3192_v55  ;;  %2277 = vmatpush1.bf16.msra.mxu1 %v3195_v56 }
  0xff   : > { %2074 = vmatprep.subr.bf16.mxu0 %v3200_v57  ;;  %2278 = vmatprep.subr.bf16.mxu1 %v3203_v58 }
 0x102   : > { %2075 = vmatpush1.bf16.msra.mxu0 %v3198_v59  ;;  %2279 = vmatpush1.bf16.msra.mxu1 %v3201_v60 }
 0x103   : > { %2076 = vmatprep.subr.bf16.mxu0 %v3206_v61  ;;  %2280 = vmatprep.subr.bf16.mxu1 %v3209_v62 }
 0x106   : > { %2077 = vmatpush1.bf16.msra.mxu0 %v3204_v63  ;;  %2281 = vmatpush1.bf16.msra.mxu1 %v3207_v0 }
 0x107   : > { %2078 = vmatprep.subr.bf16.mxu0 %v3212_v1  ;;  %2282 = vmatprep.subr.bf16.mxu1 %v3215_v2 }
 0x10a   : > { %2079 = vmatpush1.bf16.msra.mxu0 %v3210_v3  ;;  %2283 = vmatpush1.bf16.msra.mxu1 %v3213_v4 }
 0x10b   : > { %2080 = vmatprep.subr.bf16.mxu0 %v3218_v5  ;;  %2284 = vmatprep.subr.bf16.mxu1 %v3221_v6 }
 0x10e   : > { %2081 = vmatpush1.bf16.msra.mxu0 %v3216_v7  ;;  %2285 = vmatpush1.bf16.msra.mxu1 %v3219_v8 }
 0x10f   : > { %2082 = vmatprep.subr.bf16.mxu0 %v3224_v9  ;;  %2286 = vmatprep.subr.bf16.mxu1 %v3227_v10  ;;  %v283_v9 = vld [vmem:[#allocation2] sm:$0xff]  ;;  %v285_v10 = vld [vmem:[#allocation2 + $0x10] sm:$0xff] }
 0x112   : > { %2083 = vmatpush1.bf16.msra.mxu0 %v3222_v11  ;;  %2287 = vmatpush1.bf16.msra.mxu1 %v3225_v12  ;;  %v284_v11 = vld [vmem:[#allocation2 + $0x8] sm:$0xff]  ;;  %v286_v12 = vld [vmem:[#allocation2 + $0x18] sm:$0xff] }
 0x113   : > { %2084 = vmatprep.subr.bf16.mxu0 %v3230_v13  ;;  %2288 = vmatprep.subr.bf16.mxu1 %v3233_v14 }
 0x116   : > { %2085 = vmatpush1.bf16.msra.mxu0 %v3228_v15  ;;  %2289 = vmatpush1.bf16.msra.mxu1 %v3231_v16  ;;  %v287_v15 = vld [vmem:[#allocation2 + $0x20] sm:$0xff]  ;;  %v289_v16 = vld [vmem:[#allocation2 + $0x30] sm:$0xff] }
 0x117   : > { %2086 = vmatprep.subr.bf16.mxu0 %v3236_v17  ;;  %2290 = vmatprep.subr.bf16.mxu1 %v3239_v18 }
 0x11a   : > { %2087 = vmatpush1.bf16.msra.mxu0 %v3234_v19  ;;  %2291 = vmatpush1.bf16.msra.mxu1 %v3237_v20 }
 0x11b   : > { %2088 = vmatprep.subr.bf16.mxu0 %v3242_v21  ;;  %2292 = vmatprep.subr.bf16.mxu1 %v3245_v22  ;;  %v288_v21 = vld [vmem:[#allocation2 + $0x28] sm:$0xff]  ;;  %v290_v22 = vld [vmem:[#allocation2 + $0x38] sm:$0xff] }
 0x11e   : > { %2089 = vmatpush1.bf16.msra.mxu0 %v3240_v23  ;;  %2293 = vmatpush1.bf16.msra.mxu1 %v3243_v24 }
 0x11f   : > { %2090 = vmatprep.subr.bf16.mxu0 %v3248_v25  ;;  %2294 = vmatprep.subr.bf16.mxu1 %v3251_v26 }
 0x122   : > { %2091 = vmatpush1.bf16.msra.mxu0 %v3246_v27  ;;  %2295 = vmatpush1.bf16.msra.mxu1 %v3249_v28 }
 0x123   : > { %2092 = vmatprep.subr.bf16.mxu0 %v3254_v29  ;;  %2296 = vmatprep.subr.bf16.mxu1 %v3257_v30 }
 0x126   : > { %2093 = vmatpush1.bf16.msra.mxu0 %v3252_v31  ;;  %2297 = vmatpush1.bf16.msra.mxu1 %v3255_v32 }
 0x127   : > { %2094 = vmatprep.subr.bf16.mxu0 %v3260_v33  ;;  %2298 = vmatprep.subr.bf16.mxu1 %v3263_v34  ;;  %v291_v33 = vld [vmem:[#allocation2 + $0x40] sm:$0xff] }
 0x12a   : > { %2095 = vmatpush1.bf16.msra.mxu0 %v3258_v35  ;;  %2299 = vmatpush1.bf16.msra.mxu1 %v3261_v36  ;;  %v293_v35 = vld [vmem:[#allocation2 + $0x50] sm:$0xff] }
 0x12d   : > { %2097 = vmatmul.mubr.bf16.vlgmr.msra.gmra.mrb[0].mxu0 %v2534_v40  ;;  %2301 = vmatmul.mubr.bf16.vlgmr.msra.gmra.mrb[0].mxu1 %v2534_v40 }
 0x12e   : > { %2106 = vmatprep.mubr.bf16.mxu0 %v2543_v38  ;;  %2310 = vmatprep.mubr.bf16.mxu1 %v2543_v38  ;;  %v292_v38 = vld [vmem:[#allocation2 + $0x48] sm:$0xff] }
 0x135   : > { %2107 = vmatmul.mubr.bf16.gmra.mrb[16].mxu0 %v2542_v39  ;;  %2311 = vmatmul.mubr.bf16.gmra.mrb[16].mxu1 %v2542_v39 }
 0x148   : > { %v1955_v41 = vpop.f32.mrb[4].mxu0  ;;  %v2159_v42 = vpop.f32.mrb[4].mxu1 }
 0x149   : > { %v1957_v43 = vpop.f32.mrb[5].mxu0  ;;  %v2161_v46 = vpop.f32.mrb[5].mxu1 }
 0x14a   : > { %v1959_v47 = vpop.f32.mrb[6].mxu0  ;;  %v2163_v48 = vpop.f32.mrb[6].mxu1 }
 0x14b   : > { %v1960_v49 = vpop.f32.mrb[7].mxu0  ;;  %v2164_v50 = vpop.f32.mrb[7].mxu1 }
 0x188   : > { %v2006_v51 = vpop.f32.mrb[8].mxu0  ;;  %v2210_v44 = vpop.f32.mrb[8].mxu1 }
 0x189   : > { %v2007_v45 = vadd.f32 %v2006_v51, %v1955_v41  ;;  %v2211_v52 = vadd.f32 %v2210_v44, %v2159_v42  ;;  %v2008_v53 = vpop.f32.mrb[9].mxu0  ;;  %v2212_v54 = vpop.f32.mrb[9].mxu1  ;;  %v294_v41 = vld [vmem:[#allocation2 + $0x58] sm:$0xff] }
 0x18a   : > { %v2009_v55 = vadd.f32 %v2008_v53, %v1957_v43  ;;  %v2213_v56 = vadd.f32 %v2212_v54, %v2161_v46  ;;  %v2010_v57 = vpop.f32.mrb[10].mxu0  ;;  %v2214_v58 = vpop.f32.mrb[10].mxu1 }
 0x18b   : > { %v2011_v59 = vpop.f32.mrb[11].mxu0  ;;  %v2215_v60 = vpop.f32.mrb[11].mxu1 }
 0x1c8   : > { %v2057_v61 = vpop.f32.mrb[12].mxu0  ;;  %v2261_v62 = vpop.f32.mrb[12].mxu1 }
 0x1c9   : > { %v2058_v63 = vadd.f32 %v2057_v61, %v2007_v45  ;;  %v2262_v0 = vadd.f32 %v2261_v62, %v2211_v52  ;;  %v2059_v1 = vpop.f32.mrb[13].mxu0  ;;  %v2263_v2 = vpop.f32.mrb[13].mxu1 }
 0x1ca   : > { %v2060_v3 = vadd.f32 %v2059_v1, %v2009_v55  ;;  %v2264_v4 = vadd.f32 %v2263_v2, %v2213_v56  ;;  %v2061_v5 = vpop.f32.mrb[14].mxu0  ;;  %v2265_v6 = vpop.f32.mrb[14].mxu1 }
 0x1cb   : > { %v2062_v7 = vpop.f32.mrb[15].mxu0  ;;  %v2266_v8 = vpop.f32.mrb[15].mxu1 }
 0x200   : > { %v2098_v13 = vpop.f32.mrb[0].mxu0  ;;  %v2302_v14 = vpop.f32.mrb[0].mxu1 }
 0x201   : > { %v2319_v17 = vadd.f32 %v2098_v13, %v283_v9  ;;  %v2321_v18 = vadd.f32 %v2302_v14, %v285_v10  ;;  %v2100_v19 = vpop.f32.mrb[1].mxu0  ;;  %v2304_v20 = vpop.f32.mrb[1].mxu1 }
 0x202   : > { %v2320_v23 = vadd.f32 %v2100_v19, %v284_v11  ;;  %v2322_v24 = vadd.f32 %v2304_v20, %v286_v12  ;;  %v2102_v25 = vpop.f32.mrb[2].mxu0  ;;  %v2306_v26 = vpop.f32.mrb[2].mxu1 }
 0x203   : > { %2331 = vst [vmem:[#allocation2] sm:$0xff] %v2319_v17  ;;  %2333 = vst [vmem:[#allocation2 + $0x10] sm:$0xff] %v2321_v18  ;;  %v2323_v27 = vadd.f32 %v2102_v25, %v287_v15  ;;  %v2325_v28 = vadd.f32 %v2306_v26, %v289_v16  ;;  %v2104_v29 = vpop.f32.mrb[3].mxu0  ;;  %v2308_v30 = vpop.f32.mrb[3].mxu1 }
 0x204   : > { %2332 = vst [vmem:[#allocation2 + $0x8] sm:$0xff] %v2320_v23  ;;  %2334 = vst [vmem:[#allocation2 + $0x18] sm:$0xff] %v2322_v24  ;;  %v2324_v31 = vadd.f32 %v2104_v29, %v288_v21  ;;  %v2326_v32 = vadd.f32 %v2308_v30, %v290_v22 }
 0x205   : > { %2335 = vst [vmem:[#allocation2 + $0x20] sm:$0xff] %v2323_v27  ;;  %2337 = vst [vmem:[#allocation2 + $0x30] sm:$0xff] %v2325_v28 }
 0x206   : > { %2336 = vst [vmem:[#allocation2 + $0x28] sm:$0xff] %v2324_v31  ;;  %2338 = vst [vmem:[#allocation2 + $0x38] sm:$0xff] %v2326_v32 }
 0x208   : > { %v2108_v34 = vpop.f32.mrb[16].mxu0  ;;  %v2312_v36 = vpop.f32.mrb[16].mxu1  ;;  %2346 = sbr.rel (%p2800_p11) target bundleno = 539 (0x21b), region = 59 }
 0x209   : > { %v2109_v37 = vadd.f32 %v2108_v34, %v2058_v63  ;;  %v2313_v40 = vadd.f32 %v2312_v36, %v2262_v0  ;;  %v2110_v39 = vpop.f32.mrb[17].mxu0  ;;  %v2314_v42 = vpop.f32.mrb[17].mxu1 }
 0x20a   : > { %v2111_v43 = vadd.f32 %v2110_v39, %v2060_v3  ;;  %v2315_v46 = vadd.f32 %v2314_v42, %v2264_v4  ;;  %v2112_v47 = vpop.f32.mrb[18].mxu0  ;;  %v2316_v48 = vpop.f32.mrb[18].mxu1  ;;  %v2347_v53 = vld [vmem:[#allocation2] sm:$0xff] (!%p2800_p11)  ;;  %v2349_v55 = vld [vmem:[#allocation2 + $0x10] sm:$0xff] (!%p2800_p11) }
 0x20b   : > { %v2327_v49 = vadd.f32 %v2109_v37, %v291_v33  ;;  %v2329_v50 = vadd.f32 %v2313_v40, %v293_v35  ;;  %v2113_v51 = vpop.f32.mrb[19].mxu0  ;;  %v2317_v44 = vpop.f32.mrb[19].mxu1  ;;  %v2348_v54 = vld [vmem:[#allocation2 + $0x8] sm:$0xff] (!%p2800_p11)  ;;  %vm2359_vm0 = vcmp.ge.f32.partialorder (!%p2800_p11), %v2347_v53, 0.0  ;;  %v2371_v56 = vmul.f32 (!%p2800_p11), 0.2, %v2347_v53 }
 0x20c   : > { %v2328_v45 = vadd.f32 %v2111_v43, %v292_v38  ;;  %v2330_v52 = vadd.f32 %v2315_v46, %v294_v41  ;;  %vm2360_vm1 = vcmp.ge.f32.partialorder (!%p2800_p11), %v2348_v54, 0.0  ;;  %v2372_v57 = vmul.f32 (!%p2800_p11), 0.2, %v2348_v54  ;;  %v2350_v59 = vld [vmem:[#allocation2 + $0x18] sm:$0xff] (!%p2800_p11)  ;;  %v2351_v60 = vld [vmem:[#allocation2 + $0x20] sm:$0xff] (!%p2800_p11)  ;;  %v2353_v1 = vld [vmem:[#allocation2 + $0x30] sm:$0xff] (!%p2800_p11) }
 0x20d   : > { %2339 = vst [vmem:[#allocation2 + $0x40] sm:$0xff] %v2327_v49  ;;  %2341 = vst [vmem:[#allocation2 + $0x50] sm:$0xff] %v2329_v50  ;;  %vm2361_vm2 = vcmp.ge.f32.partialorder (!%p2800_p11), %v2349_v55, 0.0  ;;  %v2373_v58 = vmul.f32 (!%p2800_p11), 0.2, %v2349_v55  ;;  %v2352_v61 = vld [vmem:[#allocation2 + $0x28] sm:$0xff] (!%p2800_p11)  ;;  %v2383_v62 = vsel (!%p2800_p11), %vm2359_vm0, %v2347_v53, %v2371_v56 }
 0x20e   : > { %2340 = vst [vmem:[#allocation2 + $0x48] sm:$0xff] %v2328_v45  ;;  %2342 = vst [vmem:[#allocation2 + $0x58] sm:$0xff] %v2330_v52  ;;  %v2384_v63 = vsel (!%p2800_p11), %vm2360_vm1, %v2348_v54, %v2372_v57  ;;  %vm2362_vm3 = vcmp.ge.f32.partialorder (!%p2800_p11), %v2350_v59, 0.0  ;;  %v2374_v0 = vmul.f32 (!%p2800_p11), 0.2, %v2350_v59  ;;  %v2354_v2 = vld [vmem:[#allocation2 + $0x38] sm:$0xff] (!%p2800_p11) }
 0x20f   : > { %2395 = vst [vmem:[%s3723_s2] sm:$0xff] %v2383_v62  ;;  %2396 = vst [vmem:[%s3723_s2 + $0x8] sm:$0xff] %v2384_v63  ;;  %v2385_v4 = vsel %vm2361_vm2, %v2349_v55, %v2373_v58  ;;  %vm2363_vm4 = vcmp.ge.f32.partialorder %v2351_v60, 0.0  ;;  %v2375_v5 = vmul.f32 0.2, %v2351_v60  ;;  %vm2364_vm5 = vcmp.ge.f32.partialorder %v2352_v61, 0.0 }
 0x210   : > { %2397 = vst [vmem:[%s3723_s2 + $0x10] sm:$0xff] %v2385_v4  ;;  %v2386_v7 = vsel %vm2362_vm3, %v2350_v59, %v2374_v0  ;;  %v2376_v8 = vmul.f32 0.2, %v2352_v61  ;;  %vm2365_vm6 = vcmp.ge.f32.partialorder %v2353_v1, 0.0  ;;  %v2377_v9 = vmul.f32 0.2, %v2353_v1 }
 0x211   : > { %2398 = vst [vmem:[%s3723_s2 + $0x18] sm:$0xff] %v2386_v7  ;;  %v2387_v11 = vsel %vm2363_vm4, %v2351_v60, %v2375_v5  ;;  %vm2366_vm7 = vcmp.ge.f32.partialorder %v2354_v2, 0.0  ;;  %v2378_v12 = vmul.f32 0.2, %v2354_v2 }
 0x212   : > { %2399 = vst [vmem:[%s3723_s2 + $0x20] sm:$0xff] %v2387_v11  ;;  %v2388_v14 = vsel %vm2364_vm5, %v2352_v61, %v2376_v8  ;;  %v2389_v15 = vsel %vm2365_vm6, %v2353_v1, %v2377_v9 }
 0x213   : > { %2400 = vst [vmem:[%s3723_s2 + $0x28] sm:$0xff] %v2388_v14  ;;  %2401 = vst [vmem:[%s3723_s2 + $0x30] sm:$0xff] %v2389_v15  ;;  %v2390_v17 = vsel %vm2366_vm7, %v2354_v2, %v2378_v12 }
 0x214   : > { %v2355_v3 = vld [vmem:[#allocation2 + $0x40] sm:$0xff]  ;;  %v2357_v10 = vld [vmem:[#allocation2 + $0x50] sm:$0xff]  ;;  %2402 = vst [vmem:[%s3723_s2 + $0x38] sm:$0xff] %v2390_v17 }
 0x215   : > { %v2356_v6 = vld [vmem:[#allocation2 + $0x48] sm:$0xff]  ;;  %vm2367_vm8 = vcmp.ge.f32.partialorder %v2355_v3, 0.0  ;;  %v2358_v13 = vld [vmem:[#allocation2 + $0x58] sm:$0xff]  ;;  %v2379_v16 = vmul.f32 0.2, %v2355_v3  ;;  %vm2369_vm10 = vcmp.ge.f32.partialorder %v2357_v10, 0.0 }
 0x216   : > { %vm2368_vm9 = vcmp.ge.f32.partialorder %v2356_v6, 0.0  ;;  %v2380_v18 = vmul.f32 0.2, %v2356_v6  ;;  %v2381_v19 = vmul.f32 0.2, %v2357_v10  ;;  %vm2370_vm11 = vcmp.ge.f32.partialorder %v2358_v13, 0.0 }
 0x217   : > { %v2391_v20 = vsel %vm2367_vm8, %v2355_v3, %v2379_v16  ;;  %v2382_v21 = vmul.f32 0.2, %v2358_v13 }
 0x218   : > { %2403 = vst [vmem:[%s3723_s2 + $0x40] sm:$0xff] %v2391_v20  ;;  %v2392_v22 = vsel %vm2368_vm9, %v2356_v6, %v2380_v18  ;;  %v2393_v23 = vsel %vm2369_vm10, %v2357_v10, %v2381_v19 }
 0x219   : > { %2404 = vst [vmem:[%s3723_s2 + $0x48] sm:$0xff] %v2392_v22  ;;  %2405 = vst [vmem:[%s3723_s2 + $0x50] sm:$0xff] %v2393_v23  ;;  %v2394_v24 = vsel %vm2370_vm11, %v2358_v13, %v2382_v21 }
 0x21a   : > { %2406 = vst [vmem:[%s3723_s2 + $0x58] sm:$0xff] %v2394_v24 }
 0x21b PF: > { %s12_s13 = sadd.s32 1, %s3304_s13   ;;  %s3724_s9 = smov %s3292_s10 }
 0x21c   : > { %p9_p12 = scmp.ge.s32.totalorder %s12_s13, 6   ;;  %s3725_s10 = smov %s3357_s17 }
 0x21d   : > { %s3726_s11 = smov %s3300_s12  ;;  %s3727_s12 = smov %s3729_s14 }
 0x21e   :  { %11 = sbr.rel (!%p9_p12) target bundleno = 3 (0x3), region = 97 }

// kernel: d_net_forward.9
= control target key start
LH: loop header
LB: loop body
LE: loop exit
PB: predicated region body
PF: predicated region fallthrough
CT: control target
= control target key end

     0   :  { %s1442_s12 = smov 0   ;;  %s1444_s13 = smov 0   ;;  %s1559_s0 = inlined_call_operand.vmem [shape: bf16[8,8192], index: 0, kind: input, shape index: {}]   ;;  %s1560_s1 = inlined_call_operand.vmem [shape: bf16[8192,128], index: 1, kind: input, shape index: {}]   ;;  %s1561_s2 = inlined_call_operand.vmem [shape: f32[8,128], index: 2, kind: output, shape index: {0}]   ;;  %s1562_s3 = inlined_call_operand.vmem [shape: f32[8,128], index: 3, kind: output, shape index: {1}]  }
   0x1   :  { %s1446_s14 = smov 0  }
   0x2 LB: > { %s26_s15 = sadd.s32 1, %s1415_s13  ;;  %p1124_p0 = scmp.ge.s32.totalorder %s1419_s14, 1  ;;  %s1419_s14 = sphi %s1446_s14, %s14_s14   ;;  %s1415_s13 = sphi %s1444_s13, %s1564_s13   ;;  %s1411_s12 = sphi %s1442_s12, %s1563_s12  }
   0x3   : > { %p27_p1 = scmp.ge.s32.totalorder %s26_s15, 8  ;;  %p186_p2 = scmp.lt.s32.totalorder %s1419_s14, 9 }
   0x5   : > { %s1566_s15 = smov (%p27_p1, %s26_s15), 0  ;;  %p187_p3 = pnand %p1124_p0, %p186_p2 }
   0x6   : > { %s1125_s16 = sshll.u32 (!%p187_p3), %s1411_s12, 3  ;;  %s1127_s17 = sshll.u32 (!%p187_p3), %s1411_s12, 7 }
   0x7   : > { %190 = sbr.rel (%p187_p3) target bundleno = 346 (0x15a), region = 28  ;;  %p234_p4 = scmp.lt.s32.totalorder (!%p187_p3), %s1125_s16, 63 }
   0x8   : > { %p242_p5 = scmp.lt.s32.totalorder (!%p187_p3), %s1127_s17, 1023  ;;  %p1129_p6 = scmp.ne.s32.totalorder (!%p187_p3), %s1411_s12, 0 }
   0xe   : > { %s1568_s16 = smov (!%p234_p4, %s1125_s16), 63  ;;  %s1570_s17 = smov (!%p242_p5, %s1127_s17), 1023 }
   0xf   : > { %s1126_s18 = sshll.u32 %s1568_s16, 2  ;;  %s1128_s22 = sshll.u32 %s1570_s17, 2  ;;  %v1421_v0 = vmov (!%p1129_p6), 0.0  }
  0x10   : > { %s1467_s21 = scalar_lea.vmem %s1559_s0, %s1126_s18  ;;  %s1472_s25 = scalar_lea.vmem %s1560_s1, %s1128_s22  ;;  %269 = vst [vmem:[#allocation2] sm:$0xff] (!%p1129_p6), %v1421_v0 }
  0x11   : > { %268 = sbr.rel (%p1129_p6) target bundleno = 24 (0x18), region = 32 }
  0x18 PF: > { %v1321_v1 = vld [vmem:[%s1472_s25 + $0x40] sm:$0xff]   ;;  %v1325_v5 = vld [vmem:[%s1472_s25 + $0x48] sm:$0xff]   ;;  %v1329_v9 = vld [vmem:[%s1472_s25 + $0x50] sm:$0xff]   ;;  %p1202_p7 = scmp.ne.s32.totalorder %s1411_s12, 7 }
  0x19   : > { %v1322_v2 = vld [vmem:[%s1472_s25 + $0xc0] sm:$0xff]   ;;  %1208 = vmatprep.subr.bf16.mxu0 %v1321_v1  ;;  %v1326_v6 = vld [vmem:[%s1472_s25 + $0xc8] sm:$0xff]   ;;  %v1330_v10 = vld [vmem:[%s1472_s25 + $0xd0] sm:$0xff]  }
  0x1a   : > { %v1323_v3 = vld [vmem:[%s1472_s25] sm:$0xff]   ;;  %1230 = vmatprep.subr.bf16.mxu1 %v1322_v2  ;;  %v1327_v7 = vld [vmem:[%s1472_s25 + $0x8] sm:$0xff]   ;;  %v1331_v11 = vld [vmem:[%s1472_s25 + $0x10] sm:$0xff]  }
  0x1b   : > { %v1324_v4 = vld [vmem:[%s1472_s25 + $0x80] sm:$0xff]   ;;  %1209 = vmatpush3.bf16.msra.mxu0 %v1323_v3  ;;  %v1328_v8 = vld [vmem:[%s1472_s25 + $0x88] sm:$0xff]   ;;  %v1332_v12 = vld [vmem:[%s1472_s25 + $0x90] sm:$0xff]  }
  0x1c   : > { %1231 = vmatpush3.bf16.msra.mxu1 %v1324_v4  ;;  %1210 = vmatprep.subr.bf16.mxu0 %v1325_v5  ;;  %v1333_v13 = vld [vmem:[%s1472_s25 + $0x58] sm:$0xff]   ;;  %v1337_v17 = vld [vmem:[%s1472_s25 + $0x60] sm:$0xff]   ;;  %v1341_v21 = vld [vmem:[%s1472_s25 + $0x68] sm:$0xff]  }
  0x1d   : > { %1232 = vmatprep.subr.bf16.mxu1 %v1326_v6  ;;  %v1334_v14 = vld [vmem:[%s1472_s25 + $0xd8] sm:$0xff]   ;;  %v1338_v18 = vld [vmem:[%s1472_s25 + $0xe0] sm:$0xff]   ;;  %v1342_v22 = vld [vmem:[%s1472_s25 + $0xe8] sm:$0xff]  }
  0x1e   : > { %v1335_v15 = vld [vmem:[%s1472_s25 + $0x18] sm:$0xff]   ;;  %v1339_v19 = vld [vmem:[%s1472_s25 + $0x20] sm:$0xff]   ;;  %v1343_v23 = vld [vmem:[%s1472_s25 + $0x28] sm:$0xff]  }
  0x1f   : > { %1211 = vmatpush3.bf16.msra.mxu0 %v1327_v7  ;;  %v1336_v16 = vld [vmem:[%s1472_s25 + $0x98] sm:$0xff]   ;;  %v1340_v20 = vld [vmem:[%s1472_s25 + $0xa0] sm:$0xff]   ;;  %v1344_v24 = vld [vmem:[%s1472_s25 + $0xa8] sm:$0xff]  }
  0x20   : > { %1233 = vmatpush3.bf16.msra.mxu1 %v1328_v8  ;;  %1212 = vmatprep.subr.bf16.mxu0 %v1329_v9  ;;  %v1345_v25 = vld [vmem:[%s1472_s25 + $0x70] sm:$0xff]   ;;  %v1349_v29 = vld [vmem:[%s1472_s25 + $0x78] sm:$0xff]   ;;  %v271_v33 = vld [vmem:[%s1467_s21] sm:$0xff] }
  0x21   : > { %1234 = vmatprep.subr.bf16.mxu1 %v1330_v10  ;;  %v1346_v26 = vld [vmem:[%s1472_s25 + $0xf0] sm:$0xff]   ;;  %v1350_v30 = vld [vmem:[%s1472_s25 + $0xf8] sm:$0xff]   ;;  %v272_v34 = vld [vmem:[%s1467_s21 + $0x8] sm:$0xff]  ;;  %v1130_v35 = vcombine.low %v271_v33, %v271_v33  ;;  %v1131_v36 = vcombine.high %v271_v33, %v271_v33 }
  0x22   : > { %v1347_v27 = vld [vmem:[%s1472_s25 + $0x30] sm:$0xff]   ;;  %v1351_v31 = vld [vmem:[%s1472_s25 + $0x38] sm:$0xff]   ;;  %v1132_v37 = vcombine.low %v272_v34, %v272_v34  ;;  %v1133_v38 = vcombine.high %v272_v34, %v272_v34  ;;  %v1357_v39 = vld [vmem:[%s1472_s25 + $0x140] sm:$0xff]  }
  0x23   : > { %1213 = vmatpush3.bf16.msra.mxu0 %v1331_v11  ;;  %v1348_v28 = vld [vmem:[%s1472_s25 + $0xb0] sm:$0xff]   ;;  %v1352_v32 = vld [vmem:[%s1472_s25 + $0xb8] sm:$0xff]   ;;  %v1358_v40 = vld [vmem:[%s1472_s25 + $0x1c0] sm:$0xff]   ;;  %847 = vmatprep.mubr.bf16.mxu0 %v1131_v36 }
  0x24   : > { %1235 = vmatpush3.bf16.msra.mxu1 %v1332_v12  ;;  %1214 = vmatprep.subr.bf16.mxu0 %v1333_v13  ;;  %v1359_v41 = vld [vmem:[%s1472_s25 + $0x100] sm:$0xff]   ;;  %v1361_v43 = vld [vmem:[%s1472_s25 + $0x148] sm:$0xff]   ;;  %v1365_v47 = vld [vmem:[%s1472_s25 + $0x150] sm:$0xff]  }
  0x25   : > { %1236 = vmatprep.subr.bf16.mxu1 %v1334_v14  ;;  %887 = vmatprep.mubr.bf16.mxu1 %v1133_v38  ;;  %v1360_v42 = vld [vmem:[%s1472_s25 + $0x180] sm:$0xff]   ;;  %v1362_v44 = vld [vmem:[%s1472_s25 + $0x1c8] sm:$0xff]   ;;  %v1366_v48 = vld [vmem:[%s1472_s25 + $0x1d0] sm:$0xff]  }
  0x26   : > { %v1363_v45 = vld [vmem:[%s1472_s25 + $0x108] sm:$0xff]   ;;  %v1367_v49 = vld [vmem:[%s1472_s25 + $0x110] sm:$0xff]   ;;  %v1369_v51 = vld [vmem:[%s1472_s25 + $0x158] sm:$0xff]  }
  0x27   : > { %1215 = vmatpush3.bf16.msra.mxu0 %v1335_v15  ;;  %v1364_v46 = vld [vmem:[%s1472_s25 + $0x188] sm:$0xff]   ;;  %v1368_v50 = vld [vmem:[%s1472_s25 + $0x190] sm:$0xff]   ;;  %v1370_v52 = vld [vmem:[%s1472_s25 + $0x1d8] sm:$0xff]  }
  0x28   : > { %1237 = vmatpush3.bf16.msra.mxu1 %v1336_v16  ;;  %1216 = vmatprep.subr.bf16.mxu0 %v1337_v17  ;;  %v1371_v53 = vld [vmem:[%s1472_s25 + $0x118] sm:$0xff]   ;;  %v1373_v55 = vld [vmem:[%s1472_s25 + $0x160] sm:$0xff]   ;;  %v1377_v59 = vld [vmem:[%s1472_s25 + $0x168] sm:$0xff]  }
  0x29   : > { %1238 = vmatprep.subr.bf16.mxu1 %v1338_v18  ;;  %v1372_v54 = vld [vmem:[%s1472_s25 + $0x198] sm:$0xff]   ;;  %v1374_v56 = vld [vmem:[%s1472_s25 + $0x1e0] sm:$0xff]   ;;  %v1378_v60 = vld [vmem:[%s1472_s25 + $0x1e8] sm:$0xff]  }
  0x2a   : > { %v1375_v57 = vld [vmem:[%s1472_s25 + $0x120] sm:$0xff]   ;;  %v1379_v61 = vld [vmem:[%s1472_s25 + $0x128] sm:$0xff]   ;;  %v1381_v63 = vld [vmem:[%s1472_s25 + $0x170] sm:$0xff]  }
  0x2b   : > { %1217 = vmatpush3.bf16.msra.mxu0 %v1339_v19  ;;  %v1376_v58 = vld [vmem:[%s1472_s25 + $0x1a0] sm:$0xff]   ;;  %v1380_v62 = vld [vmem:[%s1472_s25 + $0x1a8] sm:$0xff]   ;;  %v1382_v0 = vld [vmem:[%s1472_s25 + $0x1f0] sm:$0xff]  }
  0x2c   : > { %1239 = vmatpush3.bf16.msra.mxu1 %v1340_v20  ;;  %1218 = vmatprep.subr.bf16.mxu0 %v1341_v21  ;;  %v1383_v1 = vld [vmem:[%s1472_s25 + $0x130] sm:$0xff]   ;;  %v1385_v3 = vld [vmem:[%s1472_s25 + $0x178] sm:$0xff]  }
  0x2d   : > { %1240 = vmatprep.subr.bf16.mxu1 %v1342_v22  ;;  %v1384_v2 = vld [vmem:[%s1472_s25 + $0x1b0] sm:$0xff]   ;;  %v1386_v4 = vld [vmem:[%s1472_s25 + $0x1f8] sm:$0xff]  }
  0x2e   : > { %v1387_v5 = vld [vmem:[%s1472_s25 + $0x138] sm:$0xff]   ;;  %v273_v7 = vld [vmem:[%s1467_s21 + $0x10] sm:$0xff] }
  0x2f   : > { %1219 = vmatpush3.bf16.msra.mxu0 %v1343_v23  ;;  %v1388_v6 = vld [vmem:[%s1472_s25 + $0x1b8] sm:$0xff]   ;;  %v1134_v8 = vcombine.low %v273_v7, %v273_v7  ;;  %v1135_v9 = vcombine.high %v273_v7, %v273_v7 }
  0x30   : > { %1241 = vmatpush3.bf16.msra.mxu1 %v1344_v24  ;;  %1220 = vmatprep.subr.bf16.mxu0 %v1345_v25  ;;  %v274_v10 = vld [vmem:[%s1467_s21 + $0x18] sm:$0xff] }
  0x31   : > { %1242 = vmatprep.subr.bf16.mxu1 %v1346_v26  ;;  %v1136_v11 = vcombine.low %v274_v10, %v274_v10  ;;  %v1137_v12 = vcombine.high %v274_v10, %v274_v10 }
  0x33   : > { %1221 = vmatpush3.bf16.msra.mxu0 %v1347_v27 }
  0x34   : > { %1243 = vmatpush3.bf16.msra.mxu1 %v1348_v28  ;;  %1222 = vmatprep.subr.bf16.mxu0 %v1349_v29 }
  0x35   : > { %1244 = vmatprep.subr.bf16.mxu1 %v1350_v30 }
  0x37   : > { %1223 = vmatpush3.bf16.msra.mxu0 %v1351_v31 }
  0x38   : > { %1245 = vmatpush3.bf16.msra.mxu1 %v1352_v32  ;;  %1252 = vmatprep.subr.bf16.mxu0 %v1357_v39 }
  0x39   : > { %1274 = vmatprep.subr.bf16.mxu1 %v1358_v40 }
  0x3a   : > { %848 = vmatmul.mubr.bf16.vlgmr.msra.gmra.mrb[0].mxu0 %v1130_v35  ;;  %v270_v35 = vld [vmem:[#allocation2] sm:$0xff] }
  0x3b   : > { %888 = vmatmul.mubr.bf16.vlgmr.msra.gmra.mrb[0].mxu1 %v1132_v37  ;;  %1253 = vmatpush3.bf16.msra.mxu0 %v1359_v41 }
  0x3c   : > { %1275 = vmatpush3.bf16.msra.mxu1 %v1360_v42  ;;  %1254 = vmatprep.subr.bf16.mxu0 %v1361_v43 }
  0x3d   : > { %1276 = vmatprep.subr.bf16.mxu1 %v1362_v44  ;;  %927 = vmatprep.mubr.bf16.mxu0 %v1135_v9 }
  0x3e   : > { %967 = vmatprep.mubr.bf16.mxu1 %v1137_v12 }
  0x3f   : > { %1255 = vmatpush3.bf16.msra.mxu0 %v1363_v45 }
  0x40   : > { %1277 = vmatpush3.bf16.msra.mxu1 %v1364_v46  ;;  %1256 = vmatprep.subr.bf16.mxu0 %v1365_v47 }
  0x41   : > { %1278 = vmatprep.subr.bf16.mxu1 %v1366_v48 }
  0x43   : > { %1257 = vmatpush3.bf16.msra.mxu0 %v1367_v49 }
  0x44   : > { %1279 = vmatpush3.bf16.msra.mxu1 %v1368_v50  ;;  %1258 = vmatprep.subr.bf16.mxu0 %v1369_v51 }
  0x45   : > { %1280 = vmatprep.subr.bf16.mxu1 %v1370_v52 }
  0x47   : > { %1259 = vmatpush3.bf16.msra.mxu0 %v1371_v53 }
  0x48   : > { %1281 = vmatpush3.bf16.msra.mxu1 %v1372_v54  ;;  %1260 = vmatprep.subr.bf16.mxu0 %v1373_v55 }
  0x49   : > { %1282 = vmatprep.subr.bf16.mxu1 %v1374_v56 }
  0x4b   : > { %1261 = vmatpush3.bf16.msra.mxu0 %v1375_v57 }
  0x4c   : > { %1283 = vmatpush3.bf16.msra.mxu1 %v1376_v58  ;;  %1262 = vmatprep.subr.bf16.mxu0 %v1377_v59 }
  0x4d   : > { %1284 = vmatprep.subr.bf16.mxu1 %v1378_v60 }
  0x4f   : > { %1263 = vmatpush3.bf16.msra.mxu0 %v1379_v61 }
  0x50   : > { %1285 = vmatpush3.bf16.msra.mxu1 %v1380_v62  ;;  %1264 = vmatprep.subr.bf16.mxu0 %v1381_v63 }
  0x51   : > { %1286 = vmatprep.subr.bf16.mxu1 %v1382_v0 }
  0x53   : > { %1265 = vmatpush3.bf16.msra.mxu0 %v1383_v1 }
  0x54   : > { %1287 = vmatpush3.bf16.msra.mxu1 %v1384_v2  ;;  %1266 = vmatprep.subr.bf16.mxu0 %v1385_v3 }
  0x55   : > { %1288 = vmatprep.subr.bf16.mxu1 %v1386_v4 }
  0x57   : > { %1267 = vmatpush3.bf16.msra.mxu0 %v1387_v5 }
  0x58   : > { %1289 = vmatpush3.bf16.msra.mxu1 %v1388_v6 }
  0x5a   : > { %928 = vmatmul.mubr.bf16.vlgmr.msra.gmra.mrb[4].mxu0 %v1134_v8 }
  0x5b   : > { %968 = vmatmul.mubr.bf16.vlgmr.msra.gmra.mrb[4].mxu1 %v1136_v11 }
 0x10d   : > { %v1224_v13 = vpop.f32.mrb[0].mxu0 }
 0x10e   : > { %v1246_v14 = vpop.f32.mrb[0].mxu1  ;;  %v1225_v15 = vpop.f32.mrb[1].mxu0 }
 0x10f   : > { %v1247_v16 = vpop.f32.mrb[1].mxu1  ;;  %v1226_v17 = vadd.f32 %v1225_v15, %v1224_v13  ;;  %v1227_v19 = vpop.f32.mrb[2].mxu0 }
 0x110   : > { %v1248_v18 = vadd.f32 %v1247_v16, %v1246_v14  ;;  %v1249_v20 = vpop.f32.mrb[2].mxu1  ;;  %v1228_v21 = vpop.f32.mrb[3].mxu0 }
 0x111   : > { %v1250_v22 = vpop.f32.mrb[3].mxu1 }
 0x112   : > { %v890_v23 = vadd.f32 %v1248_v18, %v1226_v17 }
 0x12d   : > { %v1268_v24 = vpop.f32.mrb[4].mxu0 }
 0x12e   : > { %v1290_v25 = vpop.f32.mrb[4].mxu1  ;;  %v1269_v26 = vpop.f32.mrb[5].mxu0 }
 0x12f   : > { %v1291_v27 = vpop.f32.mrb[5].mxu1  ;;  %v1270_v28 = vadd.f32 %v1269_v26, %v1268_v24  ;;  %v1271_v30 = vpop.f32.mrb[6].mxu0 }
 0x130   : > { %v1292_v29 = vadd.f32 %v1291_v27, %v1290_v25  ;;  %v1293_v31 = vpop.f32.mrb[6].mxu1  ;;  %v1272_v32 = vpop.f32.mrb[7].mxu0 }
 0x131   : > { %v1294_v33 = vpop.f32.mrb[7].mxu1  ;;  %v930_v34 = vadd.f32 %v1270_v28, %v890_v23  ;;  %980 = sbr.rel (%p1202_p7) target bundleno = 346 (0x15a), region = 36 }
 0x133   : > { %v970_v36 = vadd.f32 %v1292_v29, %v930_v34 }
 0x135   : > { %v975_v37 = vadd.f32 %v970_v36, %v270_v35 }
 0x137   : > { %976 = vst [vmem:[#allocation2] sm:$0xff] %v975_v37 }
 0x13e   : > { %v981_v38 = vld [vmem:[#allocation2] sm:$0xff] }
 0x13f   : > { %982 = vst [vmem:[%s1561_s2] sm:$0xff] %v981_v38  ;;  %v1203_v39 = vmul.f32 -1.442695, %v981_v38 }
 0x141   : > { %1393 = vpow2.f32 %v1203_v39 }
 0x14b   : > { %v1394_v40 = vpop.eup %1393 }
 0x14c   : > { %v986_v41 = vadd.f32 1.0, %v1394_v40 }
 0x14e   : > { %1395 = vrcp.f32 %v986_v41 }
 0x158   : > { %v1396_v42 = vpop.eup %1395 }
 0x159   : > { %989 = vst [vmem:[%s1562_s3] sm:$0xff] %v1396_v42 }
 0x15a PF: > { %s14_s14 = sadd.s32 1, %s1419_s14   ;;  %s1563_s12 = smov %s1415_s13 }
 0x15b   : > { %p11_p8 = scmp.ge.s32.totalorder %s14_s14, 10   ;;  %s1564_s13 = smov %s1566_s15 }
 0x15d   :  { %13 = sbr.rel (!%p11_p8) target bundleno = 2 (0x2), region = 81 }

</bundles_post_ra>
